<compile_context>
chip_gen: v6e
topology: v6e:2x2x1
jax: 0.10.0
libtpu: 0.0.40
codegen_flags: <defaults>
</compile_context>

<pallas_src>
import jax
import jax.numpy as jnp
from jax import lax
from jax.experimental import pallas as pl
from jax.experimental.pallas import tpu as pltpu

LANE = 128
SUBLANE = 8


# ----------------------------- padding helpers ----------------------------- #

def _round_up(x, m):
    return ((x + m - 1) // m) * m


def _gate_pad_cols(w, H, G):
    """(K, 4H) -> (K, 4G): gate k's block [kH:(k+1)H] moves to [k*G : k*G+H]."""
    K = w.shape[0]
    w4 = w.reshape(K, 4, H)
    w4 = jnp.pad(w4, ((0, 0), (0, 0), (0, G - H)))
    return w4.reshape(K, 4 * G)


def _prep_lstm_weights(wih, whh, b, din_pad, G):
    """Gate-pad to G lanes/gate (4G % 128 == 0). Returns bf16 W_ih, bf16 W_hh, f32 bias."""
    H = whh.shape[0]
    wih_p = jnp.pad(_gate_pad_cols(wih, H, G),
                    ((0, din_pad - wih.shape[0]), (0, 0))).astype(jnp.bfloat16)
    whh_p = jnp.pad(_gate_pad_cols(whh, H, G),
                    ((0, G - H), (0, 0))).astype(jnp.bfloat16)
    b_p = _gate_pad_cols(b, H, G).astype(jnp.float32)       # b_ih + b_hh pre-summed
    return wih_p, whh_p, b_p


# ------------------------------ kernel helper ------------------------------- #

def _lstm_cell(xg_t, h, c, whh_bf16, G):
    """One LSTM step.  xg_t = x_t @ W_ih + bias (precomputed before the loop).
    Only the recurrent h @ W_hh (K = G, N = 4G) dot runs on the serial path.
    Gate order [i, f, g, o]; each gate occupies G lanes of the 4G gate tile."""
    gates = xg_t + jnp.dot(h.astype(jnp.bfloat16), whh_bf16,
                           preferred_element_type=jnp.float32)
    sig = jax.nn.sigmoid(gates)          # one EUP pass over the full gate vreg
    tnh = jnp.tanh(gates)
    i = sig[:, 0 * G:1 * G]
    f = sig[:, 1 * G:2 * G]
    g = tnh[:, 2 * G:3 * G]
    o = sig[:, 3 * G:4 * G]
    c_new = f * c + i * g
    h_new = o * jnp.tanh(c_new)
    return h_new, c_new


# -------------------------------- char LSTM --------------------------------- #

def char_lstm_kernel(x_ref, lens_ref, wih_ref, whh_ref, b_ref, out_ref, xg_scr):
    # x_ref:  (Tc, blk, Dcp) f32 time-major     lens_ref: (blk, 1) i32
    # wih:    (Dcp, 4G) bf16   whh: (G, 4G) bf16   b: (1, 4G) f32
    # out:    (blk, G) f32                       xg_scr: (Tc, blk, 4G) f32
    Tc, blk, Dcp = x_ref.shape
    G, G4 = whh_ref.shape

    # Input projection for all timesteps: one big MXU matmul, bias folded in.
    x2d = x_ref[...].reshape(Tc * blk, Dcp).astype(jnp.bfloat16)
    xg_scr[...] = (jnp.dot(x2d, wih_ref[...], preferred_element_type=jnp.float32)
                   + b_ref[...]).reshape(Tc, blk, G4)

    lens_col = lens_ref[...]                                # (blk, 1) i32
    whh = whh_ref[...]

    def body(t, carry):
        h, c = carry
        h_new, c_new = _lstm_cell(xg_scr[t], h, c, whh, G)
        m = (lens_col > t).astype(jnp.float32)              # freeze past char_len
        h = h + m * (h_new - h)
        c = c + m * (c_new - c)
        return h, c

    z = jnp.zeros((blk, G), jnp.float32)
    h, _ = lax.fori_loop(0, Tc, body, (z, z), unroll=min(Tc, 8))
    out_ref[...] = h                                        # last valid hidden state


def char_lstm(c_emb, c_lens, wih, whh, b, blk):
    Tc, Nw_pad, Dcp = c_emb.shape
    G, G4 = whh.shape
    return pl.pallas_call(
        char_lstm_kernel,
        out_shape=jax.ShapeDtypeStruct((Nw_pad, G), jnp.float32),
        grid_spec=pltpu.PrefetchScalarGridSpec(
            num_scalar_prefetch=0,
            grid=(Nw_pad // blk,),
            in_specs=[pl.BlockSpec((Tc, blk, Dcp), lambda i: (0, i, 0)),
                      pl.BlockSpec((blk, 1), lambda i: (i, 0)),
                      pl.BlockSpec(wih.shape, lambda i: (0, 0)),
                      pl.BlockSpec(whh.shape, lambda i: (0, 0)),
                      pl.BlockSpec(b.shape, lambda i: (0, 0))],
            out_specs=pl.BlockSpec((blk, G), lambda i: (i, 0)),
            scratch_shapes=[pltpu.VMEM((Tc, blk, G4), jnp.float32)]),
        compiler_params=pltpu.CompilerParams(
            dimension_semantics=("parallel",),          # shards word blocks over cores
            vmem_limit_bytes=32 * 1024 * 1024),         # explicit: safe on v5e/v6e/v7x
    )(c_emb, c_lens, wih, whh, b)


# ------------------------ word BiLSTM + output Linear ------------------------ #

def bilstm_tagger_kernel(x_ref, lens_ref, wihf_ref, whhf_ref, bf_ref,
                         wihb_ref, whhb_ref, bb_ref,
                         woutf_ref, woutb_ref, bout_ref,
                         out_ref, xgf_scr, xgb_scr, hf_scr, hb_scr):
    # x_ref: (T, Bb, Dinp) f32 time-major    lens_ref: (Bb, 1) i32
    # wih*:  (Dinp, 4G) bf16   whh*: (G, 4G) bf16   b*: (1, 4G) f32
    # wout*: (G, Cp) bf16      bout: (1, Cp) f32
    # out:   (T, Bb, Cp) f32
    # xg*_scr: (T, Bb, 4G) f32   h*_scr: (T, Bb, G) f32
    T, Bb, Dinp = x_ref.shape
    G, G4 = whhf_ref.shape
    Cp = out_ref.shape[-1]

    # Input projections for BOTH directions, all timesteps: two big MXU matmuls,
    # biases folded in, hoisted off the serial recurrence.
    x2d = x_ref[...].reshape(T * Bb, Dinp).astype(jnp.bfloat16)
    xgf_scr[...] = (jnp.dot(x2d, wihf_ref[...], preferred_element_type=jnp.float32)
                    + bf_ref[...]).reshape(T, Bb, G4)
    xgb_scr[...] = (jnp.dot(x2d, wihb_ref[...], preferred_element_type=jnp.float32)
                    + bb_ref[...]).reshape(T, Bb, G4)

    lens_col = lens_ref[...]                               # (Bb, 1) i32
    whh_f = whhf_ref[...]
    whh_b = whhb_ref[...]

    def body(s, carry):
        h_f, c_f, h_b, c_b = carry
        t_b = T - 1 - s
        m_f = (lens_col > s).astype(jnp.float32)
        m_b = (lens_col > t_b).astype(jnp.float32)

        hf_new, cf_new = _lstm_cell(xgf_scr[s], h_f, c_f, whh_f, G)
        hb_new, cb_new = _lstm_cell(xgb_scr[t_b], h_b, c_b, whh_b, G)

        h_f = h_f + m_f * (hf_new - h_f)     # packed-seq: freeze state past lens
        c_f = c_f + m_f * (cf_new - c_f)
        h_b = h_b + m_b * (hb_new - h_b)
        c_b = c_b + m_b * (cb_new - c_b)

        hf_scr[s] = h_f * m_f                # padded outputs are exactly zero
        hb_scr[t_b] = h_b * m_b
        return h_f, c_f, h_b, c_b

    z = jnp.zeros((Bb, G), jnp.float32)
    lax.fori_loop(0, T, body, (z, z, z, z), unroll=min(T, 8))

    # Output Linear(n_hidden -> tag_num) over concat([fwd, bwd]); lane-dense Cp output.
    hf = hf_scr[...].reshape(T * Bb, G).astype(jnp.bfloat16)    # free view (Bb % 8 == 0)
    hb = hb_scr[...].reshape(T * Bb, G).astype(jnp.bfloat16)
    logits = (jnp.dot(hf, woutf_ref[...], preferred_element_type=jnp.float32)
              + jnp.dot(hb, woutb_ref[...], preferred_element_type=jnp.float32)
              + bout_ref[...])
    out_ref[...] = logits.reshape(T, Bb, Cp)


def bilstm_tagger(feats, lens_i32, wih_f, whh_f, b_f, wih_b, whh_b, b_b,
                  woutf, woutb, bout):
    T, Bp, Dinp = feats.shape
    G, G4 = whh_f.shape
    Cp = woutf.shape[1]
    Bblk = 8                                     # batch tile; grid shards over cores
    full = lambda a: pl.BlockSpec(a.shape, lambda i: (0, 0))
    return pl.pallas_call(
        bilstm_tagger_kernel,
        out_shape=jax.ShapeDtypeStruct((T, Bp, Cp), jnp.float32),
        grid_spec=pltpu.PrefetchScalarGridSpec(
            num_scalar_prefetch=0,
            grid=(Bp // Bblk,),
            in_specs=[pl.BlockSpec((T, Bblk, Dinp), lambda i: (0, i, 0)),
                      pl.BlockSpec((Bblk, 1), lambda i: (i, 0)),
                      full(wih_f), full(whh_f), full(b_f),
                      full(wih_b), full(whh_b), full(b_b),
                      full(woutf), full(woutb), full(bout)],
            out_specs=pl.BlockSpec((T, Bblk, Cp), lambda i: (0, i, 0)),
            scratch_shapes=[pltpu.VMEM((T, Bblk, G4), jnp.float32),
                            pltpu.VMEM((T, Bblk, G4), jnp.float32),
                            pltpu.VMEM((T, Bblk, G), jnp.float32),
                            pltpu.VMEM((T, Bblk, G), jnp.float32)]),
        compiler_params=pltpu.CompilerParams(
            dimension_semantics=("parallel",),   # batch blocks -> v7x 2nd TensorCore
            vmem_limit_bytes=32 * 1024 * 1024),
    )(feats, lens_i32, wih_f, whh_f, b_f, wih_b, whh_b, b_b, woutf, woutb, bout)


# ------------------------------ forward (glue) ------------------------------- #

def lstm_tagger_forward(params, x, lens, char_x, char_lens):
    """x: (B, T, N) word ids; lens: (B,); char_x: (B, T, Nc); char_lens: (B, T)."""
    B, T, N = x.shape
    Nc = char_x.shape[-1]
    Nw = B * T

    embed_dim = params['word_embedding'].shape[1]
    char_in_dim = params['char_embedding'].shape[1]
    Hc = params['c_whh'].shape[0]
    H = params['whh_f'].shape[0]
    C = params['wout'].shape[1]
    Din = N * embed_dim + Hc                  # word-window aware (consistent w/ N)

    Gw = _round_up(H, 32)                     # per-gate pad; 4*Gw % 128 == 0
    Gc = _round_up(Hc, 32)
    Dcp = _round_up(char_in_dim, LANE)
    Dinp = _round_up(Din, LANE)
    Cp = _round_up(C, LANE)
    Bp = _round_up(B, SUBLANE)

    # ---- word embedding: self.embedding(x).view(B, T, -1) ----
    word_emb = jnp.take(params['word_embedding'], x.reshape(-1), axis=0)
    word_emb = word_emb.reshape(B, T, N * embed_dim)

    # ---- char features for every word slot (padded slots zeroed afterwards) ----
    # blk sweepable upward (512+) on v5e/v6e when Nw is large; raise vmem_limit too.
    blk = 256 if Nw >= 256 else _round_up(Nw, SUBLANE)
    Nw_pad = _round_up(Nw, blk)

    c_emb = jnp.take(params['char_embedding'], char_x.reshape(Nw * Nc), axis=0)
    c_emb = c_emb.reshape(Nw, Nc, char_in_dim)
    c_emb = jnp.transpose(c_emb, (1, 0, 2))                       # (Nc, Nw, Dc) time-major
    c_emb = jnp.pad(c_emb, ((0, 0), (0, Nw_pad - Nw), (0, Dcp - char_in_dim)))
    c_emb = c_emb.astype(jnp.float32)
    c_lens = jnp.pad(char_lens.reshape(Nw).astype(jnp.int32), (0, Nw_pad - Nw))
    c_lens = c_lens.reshape(Nw_pad, 1)

    c_wih, c_whh, c_b = _prep_lstm_weights(params['c_wih'], params['c_whh'],
                                           params['c_b'], Dcp, Gc)
    char_h = char_lstm(c_emb, c_lens, c_wih, c_whh, c_b, blk)     # (Nw_pad, Gc)
    char_feats = char_h[:Nw, :Hc].reshape(B, T, Hc)

    # pad_sequence(split(clstm(char_x[mask]), lens), True): zero padded word slots
    word_mask = (jnp.arange(T)[None, :] < lens[:, None]).astype(jnp.float32)
    char_feats = char_feats * word_mask[..., None]

    # ---- concat word + char feats; self.drop is identity in eval mode ----
    feats = jnp.concatenate([word_emb, char_feats], axis=-1)      # (B, T, Din)
    feats = jnp.pad(feats, ((0, Bp - B), (0, 0), (0, Dinp - Din)))
    feats = jnp.transpose(feats, (1, 0, 2)).astype(jnp.float32)   # (T, Bp, Dinp)
    w_lens = jnp.pad(lens.astype(jnp.int32), (0, Bp - B)).reshape(Bp, 1)

    # ---- gate-packed / padded BiLSTM + output weights (bf16 matmul operands) ----
    wih_f, whh_f, b_f = _prep_lstm_weights(params['wih_f'], params['whh_f'],
                                           params['b_f'], Dinp, Gw)
    wih_b, whh_b, b_b = _prep_lstm_weights(params['wih_b'], params['whh_b'],
                                           params['b_b'], Dinp, Gw)
    wout = params['wout']
    woutf = jnp.pad(wout[:H], ((0, Gw - H), (0, Cp - C))).astype(jnp.bfloat16)
    woutb = jnp.pad(wout[H:], ((0, Gw - H), (0, Cp - C))).astype(jnp.bfloat16)
    bout = jnp.pad(params['bout'], ((0, 0), (0, Cp - C))).astype(jnp.float32)

    logits = bilstm_tagger(feats, w_lens, wih_f, whh_f, b_f,
                           wih_b, whh_b, b_b, woutf, woutb, bout)
    return jnp.transpose(logits[:, :B, :C], (1, 0, 2))            # (B, T, tag_num)


# ------------------------------ parameter init ------------------------------- #

def init_params(key, word_num, char_num, tag_num, embed_dim, char_embed_dim,
                n_hidden, n_window=1):
    H = n_hidden // 2
    Din = n_window * embed_dim + char_embed_dim
    ks = jax.random.split(key, 10)
    s = 0.1

    def rn(k, shape):
        return (jax.random.normal(k, shape, jnp.float32) * s).astype(jnp.float32)

    return {
        'word_embedding': rn(ks[0], (word_num, embed_dim)),
        # CharLSTM(chrdim, embdim=embed_dim, char_embed=char_embed_dim):
        # char-embedding dim = embed_dim, char LSTM hidden = char_embed_dim.
        'char_embedding': rn(ks[1], (char_num, embed_dim)),
        'c_wih': rn(ks[2], (embed_dim, 4 * char_embed_dim)),
        'c_whh': rn(ks[3], (char_embed_dim, 4 * char_embed_dim)),
        'c_b': jnp.zeros((1, 4 * char_embed_dim), jnp.float32),   # b_ih + b_hh pre-summed
        # word BiLSTM (hidden = n_hidden // 2 per direction)
        'wih_f': rn(ks[4], (Din, 4 * H)),
        'whh_f': rn(ks[5], (H, 4 * H)),
        'b_f': jnp.zeros((1, 4 * H), jnp.float32),                # b_ih + b_hh pre-summed
        'wih_b': rn(ks[6], (Din, 4 * H)),
        'whh_b': rn(ks[7], (H, 4 * H)),
        'b_b': jnp.zeros((1, 4 * H), jnp.float32),
        # output Linear(n_hidden, tag_num)
        'wout': rn(ks[8], (n_hidden, tag_num)),
        'bout': rn(ks[9], (1, tag_num)),
    }


# ---------------------------------- main ------------------------------------- #

if __name__ == "__main__":
    word_num, char_num, tag_num = 50, 20, 8
    embed_dim, char_embed_dim, n_hidden = 16, 16, 32
    B, T, N, Nc = 2, 8, 1, 6

    key = jax.random.PRNGKey(0)
    k_x, k_cx, k_cl, k_p = jax.random.split(key, 4)

    x = jax.random.randint(k_x, (B, T, N), 0, word_num, dtype=jnp.int32)
    lens = jnp.array([T, 5], dtype=jnp.int32)
    char_x = jax.random.randint(k_cx, (B, T, Nc), 0, char_num, dtype=jnp.int32)
    char_lens = jax.random.randint(k_cl, (B, T), 1, Nc + 1, dtype=jnp.int32)

    params = init_params(k_p, word_num, char_num, tag_num,
                         embed_dim, char_embed_dim, n_hidden, n_window=N)

    fwd = jax.jit(lstm_tagger_forward)
    out = jax.block_until_ready(fwd(params, x, lens, char_x, char_lens))

    assert out.shape == (B, T, tag_num), out.shape
    assert out.dtype == jnp.float32
    assert bool(jnp.all(jnp.isfinite(out)))
    print("KERNEL_OK")
</pallas_src>

<mosaic_0001>
module attributes {stable_mosaic.version = 11 : i64} {
  func.func @char_lstm_kernel(%arg0: i32, %arg1: memref<6x16x128xf32, #tpu.memory_space<vmem>>, %arg2: memref<16x1xi32, #tpu.memory_space<vmem>>, %arg3: memref<128x128xbf16, #tpu.memory_space<vmem>>, %arg4: memref<32x128xbf16, #tpu.memory_space<vmem>>, %arg5: memref<1x128xf32, #tpu.memory_space<vmem>>, %arg6: memref<16x32xf32, #tpu.memory_space<vmem>>, %arg7: memref<6x16x128xf32, #tpu.memory_space<vmem>>) attributes {dimension_semantics = [#tpu.dimension_semantics<parallel>], iteration_bounds = array<i64: 1>, scalar_prefetch = 0 : i64, scratch_operands = 1 : i64, tpu.core_type = #tpu.core_type<tc>, window_params = [{transform_indices = @transform_0, window_bounds = array<i64: 6, 16, 128>}, {transform_indices = @transform_1, window_bounds = array<i64: 16, 1>}, {pipeline_mode = #tpu.pipeline_mode<synchronous>, transform_indices = @transform_2, window_bounds = array<i64: 128, 128>}, {pipeline_mode = #tpu.pipeline_mode<synchronous>, transform_indices = @transform_3, window_bounds = array<i64: 32, 128>}, {pipeline_mode = #tpu.pipeline_mode<synchronous>, transform_indices = @transform_4, window_bounds = array<i64: 1, 128>}, {transform_indices = @transform_5, window_bounds = array<i64: 16, 32>}]} {
    %c0 = arith.constant 0 : index
    %c0_0 = arith.constant 0 : index
    %c0_1 = arith.constant 0 : index
    %0 = vector.load %arg1[%c0, %c0_0, %c0_1] : memref<6x16x128xf32, #tpu.memory_space<vmem>>, vector<6x16x128xf32>
    %1 = vector.shape_cast %0 : vector<6x16x128xf32> to vector<96x128xf32>
    %2 = arith.truncf %1 : vector<96x128xf32> to vector<96x128xbf16>
    %c0_2 = arith.constant 0 : index
    %c0_3 = arith.constant 0 : index
    %3 = vector.load %arg3[%c0_2, %c0_3] : memref<128x128xbf16, #tpu.memory_space<vmem>>, vector<128x128xbf16>
    %cst = arith.constant dense<0.000000e+00> : vector<96x128xf32>
    %4 = tpu.matmul %2, %3, %cst {dimension_numbers = #tpu.dot_dimension_numbers<[1], [0], [0], [1], [0, 0, 1, 1], [], []>} : vector<96x128xbf16>, vector<128x128xbf16>, vector<96x128xf32> -> vector<96x128xf32>
    %c0_4 = arith.constant 0 : index
    %c0_5 = arith.constant 0 : index
    %5 = vector.load %arg5[%c0_4, %c0_5] : memref<1x128xf32, #tpu.memory_space<vmem>>, vector<1x128xf32>
    %6 = vector.broadcast %5 : vector<1x128xf32> to vector<96x128xf32>
    %7 = arith.addf %4, %6 : vector<96x128xf32>
    %8 = vector.shape_cast %7 : vector<96x128xf32> to vector<6x16x128xf32>
    %c0_6 = arith.constant 0 : index
    %c0_7 = arith.constant 0 : index
    %c0_8 = arith.constant 0 : index
    %9 = vector.load %arg7[%c0_6, %c0_7, %c0_8] : memref<6x16x128xf32, #tpu.memory_space<vmem>>, vector<6x16x128xf32>
    tpu.vector_store %arg7[%c0_6, %c0_7, %c0_8], %8 {strides = array<i32>} : memref<6x16x128xf32, #tpu.memory_space<vmem>>, vector<6x16x128xf32>,
    %c0_9 = arith.constant 0 : index
    %c0_10 = arith.constant 0 : index
    %10 = vector.load %arg2[%c0_9, %c0_10] : memref<16x1xi32, #tpu.memory_space<vmem>>, vector<16x1xi32>
    %c0_11 = arith.constant 0 : index
    %c0_12 = arith.constant 0 : index
    %11 = vector.load %arg4[%c0_11, %c0_12] : memref<32x128xbf16, #tpu.memory_space<vmem>>, vector<32x128xbf16>
    %cst_13 = arith.constant 0.000000e+00 : f32
    %12 = vector.broadcast %cst_13 : f32 to vector<16x32xf32>
    %c0_i32 = arith.constant 0 : i32
    %13 = arith.index_cast %c0_i32 : i32 to index
    %c0_14 = arith.constant 0 : index
    %c0_15 = arith.constant 0 : index
    %14 = vector.load %arg7[%13, %c0_14, %c0_15] : memref<6x16x128xf32, #tpu.memory_space<vmem>>, vector<1x16x128xf32>
    %15 = vector.shape_cast %14 : vector<1x16x128xf32> to vector<16x128xf32>
    %16 = arith.truncf %12 : vector<16x32xf32> to vector<16x32xbf16>
    %cst_16 = arith.constant dense<0.000000e+00> : vector<16x128xf32>
    %17 = tpu.matmul %16, %11, %cst_16 {dimension_numbers = #tpu.dot_dimension_numbers<[1], [0], [0], [1], [0, 0, 1, 1], [], []>} : vector<16x32xbf16>, vector<32x128xbf16>, vector<16x128xf32> -> vector<16x128xf32>
    %18 = arith.addf %15, %17 : vector<16x128xf32>
    %19 = arith.negf %18 : vector<16x128xf32>
    %20 = math.exp %19 : vector<16x128xf32>
    %cst_17 = arith.constant 1.000000e+00 : f32
    %21 = vector.broadcast %cst_17 : f32 to vector<16x128xf32>
    %22 = arith.addf %21, %20 : vector<16x128xf32>
    %23 = arith.divf %21, %22 : vector<16x128xf32>
    %24 = math.tanh %18 : vector<16x128xf32>
    %25 = vector.extract_strided_slice %23 {offsets = [0, 0], sizes = [16, 32], strides = [1, 1]} : vector<16x128xf32> to vector<16x32xf32>
    %26 = vector.extract_strided_slice %23 {offsets = [0, 32], sizes = [16, 32], strides = [1, 1]} : vector<16x128xf32> to vector<16x32xf32>
    %27 = vector.extract_strided_slice %24 {offsets = [0, 64], sizes = [16, 32], strides = [1, 1]} : vector<16x128xf32> to vector<16x32xf32>
    %28 = vector.extract_strided_slice %23 {offsets = [0, 96], sizes = [16, 32], strides = [1, 1]} : vector<16x128xf32> to vector<16x32xf32>
    %29 = arith.mulf %26, %12 : vector<16x32xf32>
    %30 = arith.mulf %25, %27 : vector<16x32xf32>
    %31 = arith.addf %29, %30 : vector<16x32xf32>
    %32 = math.tanh %31 : vector<16x32xf32>
    %33 = arith.mulf %28, %32 : vector<16x32xf32>
    %34 = vector.broadcast %c0_i32 : i32 to vector<16x1xi32>
    %35 = arith.cmpi sgt, %10, %34 : vector<16x1xi32>
    %36 = arith.extui %35 : vector<16x1xi1> to vector<16x1xi32>
    %37 = arith.sitofp %36 : vector<16x1xi32> to vector<16x1xf32>
    %38 = arith.subf %33, %12 : vector<16x32xf32>
    %39 = vector.broadcast %37 : vector<16x1xf32> to vector<16x32xf32>
    %40 = arith.mulf %39, %38 : vector<16x32xf32>
    %41 = arith.addf %12, %40 : vector<16x32xf32>
    %42 = arith.subf %31, %12 : vector<16x32xf32>
    %43 = vector.broadcast %37 : vector<16x1xf32> to vector<16x32xf32>
    %44 = arith.mulf %43, %42 : vector<16x32xf32>
    %45 = arith.addf %12, %44 : vector<16x32xf32>
    %c1_i32 = arith.constant 1 : i32
    %46 = arith.index_cast %c1_i32 : i32 to index
    %c0_18 = arith.constant 0 : index
    %c0_19 = arith.constant 0 : index
    %47 = vector.load %arg7[%46, %c0_18, %c0_19] : memref<6x16x128xf32, #tpu.memory_space<vmem>>, vector<1x16x128xf32>
    %48 = vector.shape_cast %47 : vector<1x16x128xf32> to vector<16x128xf32>
    %49 = arith.truncf %41 : vector<16x32xf32> to vector<16x32xbf16>
    %cst_20 = arith.constant dense<0.000000e+00> : vector<16x128xf32>
    %50 = tpu.matmul %49, %11, %cst_20 {dimension_numbers = #tpu.dot_dimension_numbers<[1], [0], [0], [1], [0, 0, 1, 1], [], []>} : vector<16x32xbf16>, vector<32x128xbf16>, vector<16x128xf32> -> vector<16x128xf32>
    %51 = arith.addf %48, %50 : vector<16x128xf32>
    %52 = arith.negf %51 : vector<16x128xf32>
    %53 = math.exp %52 : vector<16x128xf32>
    %cst_21 = arith.constant 1.000000e+00 : f32
    %54 = vector.broadcast %cst_21 : f32 to vector<16x128xf32>
    %55 = arith.addf %54, %53 : vector<16x128xf32>
    %56 = arith.divf %54, %55 : vector<16x128xf32>
    %57 = math.tanh %51 : vector<16x128xf32>
    %58 = vector.extract_strided_slice %56 {offsets = [0, 0], sizes = [16, 32], strides = [1, 1]} : vector<16x128xf32> to vector<16x32xf32>
    %59 = vector.extract_strided_slice %56 {offsets = [0, 32], sizes = [16, 32], strides = [1, 1]} : vector<16x128xf32> to vector<16x32xf32>
    %60 = vector.extract_strided_slice %57 {offsets = [0, 64], sizes = [16, 32], strides = [1, 1]} : vector<16x128xf32> to vector<16x32xf32>
    %61 = vector.extract_strided_slice %56 {offsets = [0, 96], sizes = [16, 32], strides = [1, 1]} : vector<16x128xf32> to vector<16x32xf32>
    %62 = arith.mulf %59, %45 : vector<16x32xf32>
    %63 = arith.mulf %58, %60 : vector<16x32xf32>
    %64 = arith.addf %62, %63 : vector<16x32xf32>
    %65 = math.tanh %64 : vector<16x32xf32>
    %66 = arith.mulf %61, %65 : vector<16x32xf32>
    %67 = vector.broadcast %c1_i32 : i32 to vector<16x1xi32>
    %68 = arith.cmpi sgt, %10, %67 : vector<16x1xi32>
    %69 = arith.extui %68 : vector<16x1xi1> to vector<16x1xi32>
    %70 = arith.sitofp %69 : vector<16x1xi32> to vector<16x1xf32>
    %71 = arith.subf %66, %41 : vector<16x32xf32>
    %72 = vector.broadcast %70 : vector<16x1xf32> to vector<16x32xf32>
    %73 = arith.mulf %72, %71 : vector<16x32xf32>
    %74 = arith.addf %41, %73 : vector<16x32xf32>
    %75 = arith.subf %64, %45 : vector<16x32xf32>
    %76 = vector.broadcast %70 : vector<16x1xf32> to vector<16x32xf32>
    %77 = arith.mulf %76, %75 : vector<16x32xf32>
    %78 = arith.addf %45, %77 : vector<16x32xf32>
    %c2_i32 = arith.constant 2 : i32
    %79 = arith.index_cast %c2_i32 : i32 to index
    %c0_22 = arith.constant 0 : index
    %c0_23 = arith.constant 0 : index
    %80 = vector.load %arg7[%79, %c0_22, %c0_23] : memref<6x16x128xf32, #tpu.memory_space<vmem>>, vector<1x16x128xf32>
    %81 = vector.shape_cast %80 : vector<1x16x128xf32> to vector<16x128xf32>
    %82 = arith.truncf %74 : vector<16x32xf32> to vector<16x32xbf16>
    %cst_24 = arith.constant dense<0.000000e+00> : vector<16x128xf32>
    %83 = tpu.matmul %82, %11, %cst_24 {dimension_numbers = #tpu.dot_dimension_numbers<[1], [0], [0], [1], [0, 0, 1, 1], [], []>} : vector<16x32xbf16>, vector<32x128xbf16>, vector<16x128xf32> -> vector<16x128xf32>
    %84 = arith.addf %81, %83 : vector<16x128xf32>
    %85 = arith.negf %84 : vector<16x128xf32>
    %86 = math.exp %85 : vector<16x128xf32>
    %cst_25 = arith.constant 1.000000e+00 : f32
    %87 = vector.broadcast %cst_25 : f32 to vector<16x128xf32>
    %88 = arith.addf %87, %86 : vector<16x128xf32>
    %89 = arith.divf %87, %88 : vector<16x128xf32>
    %90 = math.tanh %84 : vector<16x128xf32>
    %91 = vector.extract_strided_slice %89 {offsets = [0, 0], sizes = [16, 32], strides = [1, 1]} : vector<16x128xf32> to vector<16x32xf32>
    %92 = vector.extract_strided_slice %89 {offsets = [0, 32], sizes = [16, 32], strides = [1, 1]} : vector<16x128xf32> to vector<16x32xf32>
    %93 = vector.extract_strided_slice %90 {offsets = [0, 64], sizes = [16, 32], strides = [1, 1]} : vector<16x128xf32> to vector<16x32xf32>
    %94 = vector.extract_strided_slice %89 {offsets = [0, 96], sizes = [16, 32], strides = [1, 1]} : vector<16x128xf32> to vector<16x32xf32>
    %95 = arith.mulf %92, %78 : vector<16x32xf32>
    %96 = arith.mulf %91, %93 : vector<16x32xf32>
    %97 = arith.addf %95, %96 : vector<16x32xf32>
    %98 = math.tanh %97 : vector<16x32xf32>
    %99 = arith.mulf %94, %98 : vector<16x32xf32>
    %100 = vector.broadcast %c2_i32 : i32 to vector<16x1xi32>
    %101 = arith.cmpi sgt, %10, %100 : vector<16x1xi32>
    %102 = arith.extui %101 : vector<16x1xi1> to vector<16x1xi32>
    %103 = arith.sitofp %102 : vector<16x1xi32> to vector<16x1xf32>
    %104 = arith.subf %99, %74 : vector<16x32xf32>
    %105 = vector.broadcast %103 : vector<16x1xf32> to vector<16x32xf32>
    %106 = arith.mulf %105, %104 : vector<16x32xf32>
    %107 = arith.addf %74, %106 : vector<16x32xf32>
    %108 = arith.subf %97, %78 : vector<16x32xf32>
    %109 = vector.broadcast %103 : vector<16x1xf32> to vector<16x32xf32>
    %110 = arith.mulf %109, %108 : vector<16x32xf32>
    %111 = arith.addf %78, %110 : vector<16x32xf32>
    %c3_i32 = arith.constant 3 : i32
    %112 = arith.index_cast %c3_i32 : i32 to index
    %c0_26 = arith.constant 0 : index
    %c0_27 = arith.constant 0 : index
    %113 = vector.load %arg7[%112, %c0_26, %c0_27] : memref<6x16x128xf32, #tpu.memory_space<vmem>>, vector<1x16x128xf32>
    %114 = vector.shape_cast %113 : vector<1x16x128xf32> to vector<16x128xf32>
    %115 = arith.truncf %107 : vector<16x32xf32> to vector<16x32xbf16>
    %cst_28 = arith.constant dense<0.000000e+00> : vector<16x128xf32>
    %116 = tpu.matmul %115, %11, %cst_28 {dimension_numbers = #tpu.dot_dimension_numbers<[1], [0], [0], [1], [0, 0, 1, 1], [], []>} : vector<16x32xbf16>, vector<32x128xbf16>, vector<16x128xf32> -> vector<16x128xf32>
    %117 = arith.addf %114, %116 : vector<16x128xf32>
    %118 = arith.negf %117 : vector<16x128xf32>
    %119 = math.exp %118 : vector<16x128xf32>
    %cst_29 = arith.constant 1.000000e+00 : f32
    %120 = vector.broadcast %cst_29 : f32 to vector<16x128xf32>
    %121 = arith.addf %120, %119 : vector<16x128xf32>
    %122 = arith.divf %120, %121 : vector<16x128xf32>
    %123 = math.tanh %117 : vector<16x128xf32>
    %124 = vector.extract_strided_slice %122 {offsets = [0, 0], sizes = [16, 32], strides = [1, 1]} : vector<16x128xf32> to vector<16x32xf32>
    %125 = vector.extract_strided_slice %122 {offsets = [0, 32], sizes = [16, 32], strides = [1, 1]} : vector<16x128xf32> to vector<16x32xf32>
    %126 = vector.extract_strided_slice %123 {offsets = [0, 64], sizes = [16, 32], strides = [1, 1]} : vector<16x128xf32> to vector<16x32xf32>
    %127 = vector.extract_strided_slice %122 {offsets = [0, 96], sizes = [16, 32], strides = [1, 1]} : vector<16x128xf32> to vector<16x32xf32>
    %128 = arith.mulf %125, %111 : vector<16x32xf32>
    %129 = arith.mulf %124, %126 : vector<16x32xf32>
    %130 = arith.addf %128, %129 : vector<16x32xf32>
    %131 = math.tanh %130 : vector<16x32xf32>
    %132 = arith.mulf %127, %131 : vector<16x32xf32>
    %133 = vector.broadcast %c3_i32 : i32 to vector<16x1xi32>
    %134 = arith.cmpi sgt, %10, %133 : vector<16x1xi32>
    %135 = arith.extui %134 : vector<16x1xi1> to vector<16x1xi32>
    %136 = arith.sitofp %135 : vector<16x1xi32> to vector<16x1xf32>
    %137 = arith.subf %132, %107 : vector<16x32xf32>
    %138 = vector.broadcast %136 : vector<16x1xf32> to vector<16x32xf32>
    %139 = arith.mulf %138, %137 : vector<16x32xf32>
    %140 = arith.addf %107, %139 : vector<16x32xf32>
    %141 = arith.subf %130, %111 : vector<16x32xf32>
    %142 = vector.broadcast %136 : vector<16x1xf32> to vector<16x32xf32>
    %143 = arith.mulf %142, %141 : vector<16x32xf32>
    %144 = arith.addf %111, %143 : vector<16x32xf32>
    %c4_i32 = arith.constant 4 : i32
    %145 = arith.index_cast %c4_i32 : i32 to index
    %c0_30 = arith.constant 0 : index
    %c0_31 = arith.constant 0 : index
    %146 = vector.load %arg7[%145, %c0_30, %c0_31] : memref<6x16x128xf32, #tpu.memory_space<vmem>>, vector<1x16x128xf32>
    %147 = vector.shape_cast %146 : vector<1x16x128xf32> to vector<16x128xf32>
    %148 = arith.truncf %140 : vector<16x32xf32> to vector<16x32xbf16>
    %cst_32 = arith.constant dense<0.000000e+00> : vector<16x128xf32>
    %149 = tpu.matmul %148, %11, %cst_32 {dimension_numbers = #tpu.dot_dimension_numbers<[1], [0], [0], [1], [0, 0, 1, 1], [], []>} : vector<16x32xbf16>, vector<32x128xbf16>, vector<16x128xf32> -> vector<16x128xf32>
    %150 = arith.addf %147, %149 : vector<16x128xf32>
    %151 = arith.negf %150 : vector<16x128xf32>
    %152 = math.exp %151 : vector<16x128xf32>
    %cst_33 = arith.constant 1.000000e+00 : f32
    %153 = vector.broadcast %cst_33 : f32 to vector<16x128xf32>
    %154 = arith.addf %153, %152 : vector<16x128xf32>
    %155 = arith.divf %153, %154 : vector<16x128xf32>
    %156 = math.tanh %150 : vector<16x128xf32>
    %157 = vector.extract_strided_slice %155 {offsets = [0, 0], sizes = [16, 32], strides = [1, 1]} : vector<16x128xf32> to vector<16x32xf32>
    %158 = vector.extract_strided_slice %155 {offsets = [0, 32], sizes = [16, 32], strides = [1, 1]} : vector<16x128xf32> to vector<16x32xf32>
    %159 = vector.extract_strided_slice %156 {offsets = [0, 64], sizes = [16, 32], strides = [1, 1]} : vector<16x128xf32> to vector<16x32xf32>
    %160 = vector.extract_strided_slice %155 {offsets = [0, 96], sizes = [16, 32], strides = [1, 1]} : vector<16x128xf32> to vector<16x32xf32>
    %161 = arith.mulf %158, %144 : vector<16x32xf32>
    %162 = arith.mulf %157, %159 : vector<16x32xf32>
    %163 = arith.addf %161, %162 : vector<16x32xf32>
    %164 = math.tanh %163 : vector<16x32xf32>
    %165 = arith.mulf %160, %164 : vector<16x32xf32>
    %166 = vector.broadcast %c4_i32 : i32 to vector<16x1xi32>
    %167 = arith.cmpi sgt, %10, %166 : vector<16x1xi32>
    %168 = arith.extui %167 : vector<16x1xi1> to vector<16x1xi32>
    %169 = arith.sitofp %168 : vector<16x1xi32> to vector<16x1xf32>
    %170 = arith.subf %165, %140 : vector<16x32xf32>
    %171 = vector.broadcast %169 : vector<16x1xf32> to vector<16x32xf32>
    %172 = arith.mulf %171, %170 : vector<16x32xf32>
    %173 = arith.addf %140, %172 : vector<16x32xf32>
    %174 = arith.subf %163, %144 : vector<16x32xf32>
    %175 = vector.broadcast %169 : vector<16x1xf32> to vector<16x32xf32>
    %176 = arith.mulf %175, %174 : vector<16x32xf32>
    %177 = arith.addf %144, %176 : vector<16x32xf32>
    %c5_i32 = arith.constant 5 : i32
    %178 = arith.index_cast %c5_i32 : i32 to index
    %c0_34 = arith.constant 0 : index
    %c0_35 = arith.constant 0 : index
    %179 = vector.load %arg7[%178, %c0_34, %c0_35] : memref<6x16x128xf32, #tpu.memory_space<vmem>>, vector<1x16x128xf32>
    %180 = vector.shape_cast %179 : vector<1x16x128xf32> to vector<16x128xf32>
    %181 = arith.truncf %173 : vector<16x32xf32> to vector<16x32xbf16>
    %cst_36 = arith.constant dense<0.000000e+00> : vector<16x128xf32>
    %182 = tpu.matmul %181, %11, %cst_36 {dimension_numbers = #tpu.dot_dimension_numbers<[1], [0], [0], [1], [0, 0, 1, 1], [], []>} : vector<16x32xbf16>, vector<32x128xbf16>, vector<16x128xf32> -> vector<16x128xf32>
    %183 = arith.addf %180, %182 : vector<16x128xf32>
    %184 = arith.negf %183 : vector<16x128xf32>
    %185 = math.exp %184 : vector<16x128xf32>
    %cst_37 = arith.constant 1.000000e+00 : f32
    %186 = vector.broadcast %cst_37 : f32 to vector<16x128xf32>
    %187 = arith.addf %186, %185 : vector<16x128xf32>
    %188 = arith.divf %186, %187 : vector<16x128xf32>
    %189 = math.tanh %183 : vector<16x128xf32>
    %190 = vector.extract_strided_slice %188 {offsets = [0, 0], sizes = [16, 32], strides = [1, 1]} : vector<16x128xf32> to vector<16x32xf32>
    %191 = vector.extract_strided_slice %188 {offsets = [0, 32], sizes = [16, 32], strides = [1, 1]} : vector<16x128xf32> to vector<16x32xf32>
    %192 = vector.extract_strided_slice %189 {offsets = [0, 64], sizes = [16, 32], strides = [1, 1]} : vector<16x128xf32> to vector<16x32xf32>
    %193 = vector.extract_strided_slice %188 {offsets = [0, 96], sizes = [16, 32], strides = [1, 1]} : vector<16x128xf32> to vector<16x32xf32>
    %194 = arith.mulf %191, %177 : vector<16x32xf32>
    %195 = arith.mulf %190, %192 : vector<16x32xf32>
    %196 = arith.addf %194, %195 : vector<16x32xf32>
    %197 = math.tanh %196 : vector<16x32xf32>
    %198 = arith.mulf %193, %197 : vector<16x32xf32>
    %199 = vector.broadcast %c5_i32 : i32 to vector<16x1xi32>
    %200 = arith.cmpi sgt, %10, %199 : vector<16x1xi32>
    %201 = arith.extui %200 : vector<16x1xi1> to vector<16x1xi32>
    %202 = arith.sitofp %201 : vector<16x1xi32> to vector<16x1xf32>
    %203 = arith.subf %198, %173 : vector<16x32xf32>
    %204 = vector.broadcast %202 : vector<16x1xf32> to vector<16x32xf32>
    %205 = arith.mulf %204, %203 : vector<16x32xf32>
    %206 = arith.addf %173, %205 : vector<16x32xf32>
    %207 = arith.subf %196, %177 : vector<16x32xf32>
    %208 = vector.broadcast %202 : vector<16x1xf32> to vector<16x32xf32>
    %209 = arith.mulf %208, %207 : vector<16x32xf32>
    %210 = arith.addf %177, %209 : vector<16x32xf32>
    %c6_i32 = arith.constant 6 : i32
    %c0_38 = arith.constant 0 : index
    %c0_39 = arith.constant 0 : index
    %211 = vector.load %arg6[%c0_38, %c0_39] : memref<16x32xf32, #tpu.memory_space<vmem>>, vector<16x32xf32>
    tpu.vector_store %arg6[%c0_38, %c0_39], %206 {strides = array<i32>} : memref<16x32xf32, #tpu.memory_space<vmem>>, vector<16x32xf32>,
    return
  }
  func.func @transform_0(%arg0: i32) -> (i32, i32, i32) {
    %c0_i32 = arith.constant 0 : i32
    %c0_i32_0 = arith.constant 0 : i32
    %c0_i32_1 = arith.constant 0 : i32
    return %c0_i32, %arg0, %c0_i32_0 : i32, i32, i32
  }
  func.func @transform_1(%arg0: i32) -> (i32, i32) {
    %c0_i32 = arith.constant 0 : i32
    %c0_i32_0 = arith.constant 0 : i32
    return %arg0, %c0_i32 : i32, i32
  }
  func.func @transform_2(%arg0: i32) -> (i32, i32) {
    %c0_i32 = arith.constant 0 : i32
    %c0_i32_0 = arith.constant 0 : i32
    %c0_i32_1 = arith.constant 0 : i32
    return %c0_i32, %c0_i32_0 : i32, i32
  }
  func.func @transform_3(%arg0: i32) -> (i32, i32) {
    %c0_i32 = arith.constant 0 : i32
    %c0_i32_0 = arith.constant 0 : i32
    %c0_i32_1 = arith.constant 0 : i32
    return %c0_i32, %c0_i32_0 : i32, i32
  }
  func.func @transform_4(%arg0: i32) -> (i32, i32) {
    %c0_i32 = arith.constant 0 : i32
    %c0_i32_0 = arith.constant 0 : i32
    %c0_i32_1 = arith.constant 0 : i32
    return %c0_i32, %c0_i32_0 : i32, i32
  }
  func.func @transform_5(%arg0: i32) -> (i32, i32) {
    %c0_i32 = arith.constant 0 : i32
    %c0_i32_0 = arith.constant 0 : i32
    return %arg0, %c0_i32 : i32, i32
  }
}

module attributes {stable_mosaic.version = 11 : i64} {
  func.func @bilstm_tagger_kernel(%arg0: i32, %arg1: memref<8x8x128xf32, #tpu.memory_space<vmem>>, %arg2: memref<8x1xi32, #tpu.memory_space<vmem>>, %arg3: memref<128x128xbf16, #tpu.memory_space<vmem>>, %arg4: memref<32x128xbf16, #tpu.memory_space<vmem>>, %arg5: memref<1x128xf32, #tpu.memory_space<vmem>>, %arg6: memref<128x128xbf16, #tpu.memory_space<vmem>>, %arg7: memref<32x128xbf16, #tpu.memory_space<vmem>>, %arg8: memref<1x128xf32, #tpu.memory_space<vmem>>, %arg9: memref<32x128xbf16, #tpu.memory_space<vmem>>, %arg10: memref<32x128xbf16, #tpu.memory_space<vmem>>, %arg11: memref<1x128xf32, #tpu.memory_space<vmem>>, %arg12: memref<8x8x128xf32, #tpu.memory_space<vmem>>, %arg13: memref<8x8x128xf32, #tpu.memory_space<vmem>>, %arg14: memref<8x8x128xf32, #tpu.memory_space<vmem>>, %arg15: memref<8x8x32xf32, #tpu.memory_space<vmem>>, %arg16: memref<8x8x32xf32, #tpu.memory_space<vmem>>) attributes {dimension_semantics = [#tpu.dimension_semantics<parallel>], iteration_bounds = array<i64: 1>, scalar_prefetch = 0 : i64, scratch_operands = 4 : i64, tpu.core_type = #tpu.core_type<tc>, window_params = [{transform_indices = @transform_0, window_bounds = array<i64: 8, 8, 128>}, {transform_indices = @transform_1, window_bounds = array<i64: 8, 1>}, {pipeline_mode = #tpu.pipeline_mode<synchronous>, transform_indices = @transform_2, window_bounds = array<i64: 128, 128>}, {pipeline_mode = #tpu.pipeline_mode<synchronous>, transform_indices = @transform_3, window_bounds = array<i64: 32, 128>}, {pipeline_mode = #tpu.pipeline_mode<synchronous>, transform_indices = @transform_4, window_bounds = array<i64: 1, 128>}, {pipeline_mode = #tpu.pipeline_mode<synchronous>, transform_indices = @transform_5, window_bounds = array<i64: 128, 128>}, {pipeline_mode = #tpu.pipeline_mode<synchronous>, transform_indices = @transform_6, window_bounds = array<i64: 32, 128>}, {pipeline_mode = #tpu.pipeline_mode<synchronous>, transform_indices = @transform_7, window_bounds = array<i64: 1, 128>}, {pipeline_mode = #tpu.pipeline_mode<synchronous>, transform_indices = @transform_8, window_bounds = array<i64: 32, 128>}, {pipeline_mode = #tpu.pipeline_mode<synchronous>, transform_indices = @transform_9, window_bounds = array<i64: 32, 128>}, {pipeline_mode = #tpu.pipeline_mode<synchronous>, transform_indices = @transform_10, window_bounds = array<i64: 1, 128>}, {transform_indices = @transform_11, window_bounds = array<i64: 8, 8, 128>}]} {
    %c0 = arith.constant 0 : index
    %c0_0 = arith.constant 0 : index
    %c0_1 = arith.constant 0 : index
    %0 = vector.load %arg1[%c0, %c0_0, %c0_1] : memref<8x8x128xf32, #tpu.memory_space<vmem>>, vector<8x8x128xf32>
    %1 = vector.shape_cast %0 : vector<8x8x128xf32> to vector<64x128xf32>
    %2 = arith.truncf %1 : vector<64x128xf32> to vector<64x128xbf16>
    %c0_2 = arith.constant 0 : index
    %c0_3 = arith.constant 0 : index
    %3 = vector.load %arg3[%c0_2, %c0_3] : memref<128x128xbf16, #tpu.memory_space<vmem>>, vector<128x128xbf16>
    %cst = arith.constant dense<0.000000e+00> : vector<64x128xf32>
    %4 = tpu.matmul %2, %3, %cst {dimension_numbers = #tpu.dot_dimension_numbers<[1], [0], [0], [1], [0, 0, 1, 1], [], []>} : vector<64x128xbf16>, vector<128x128xbf16>, vector<64x128xf32> -> vector<64x128xf32>
    %c0_4 = arith.constant 0 : index
    %c0_5 = arith.constant 0 : index
    %5 = vector.load %arg5[%c0_4, %c0_5] : memref<1x128xf32, #tpu.memory_space<vmem>>, vector<1x128xf32>
    %6 = vector.broadcast %5 : vector<1x128xf32> to vector<64x128xf32>
    %7 = arith.addf %4, %6 : vector<64x128xf32>
    %8 = vector.shape_cast %7 : vector<64x128xf32> to vector<8x8x128xf32>
    %c0_6 = arith.constant 0 : index
    %c0_7 = arith.constant 0 : index
    %c0_8 = arith.constant 0 : index
    %9 = vector.load %arg13[%c0_6, %c0_7, %c0_8] : memref<8x8x128xf32, #tpu.memory_space<vmem>>, vector<8x8x128xf32>
    tpu.vector_store %arg13[%c0_6, %c0_7, %c0_8], %8 {strides = array<i32>} : memref<8x8x128xf32, #tpu.memory_space<vmem>>, vector<8x8x128xf32>,
    %c0_9 = arith.constant 0 : index
    %c0_10 = arith.constant 0 : index
    %10 = vector.load %arg6[%c0_9, %c0_10] : memref<128x128xbf16, #tpu.memory_space<vmem>>, vector<128x128xbf16>
    %cst_11 = arith.constant dense<0.000000e+00> : vector<64x128xf32>
    %11 = tpu.matmul %2, %10, %cst_11 {dimension_numbers = #tpu.dot_dimension_numbers<[1], [0], [0], [1], [0, 0, 1, 1], [], []>} : vector<64x128xbf16>, vector<128x128xbf16>, vector<64x128xf32> -> vector<64x128xf32>
    %c0_12 = arith.constant 0 : index
    %c0_13 = arith.constant 0 : index
    %12 = vector.load %arg8[%c0_12, %c0_13] : memref<1x128xf32, #tpu.memory_space<vmem>>, vector<1x128xf32>
    %13 = vector.broadcast %12 : vector<1x128xf32> to vector<64x128xf32>
    %14 = arith.addf %11, %13 : vector<64x128xf32>
    %15 = vector.shape_cast %14 : vector<64x128xf32> to vector<8x8x128xf32>
    %c0_14 = arith.constant 0 : index
    %c0_15 = arith.constant 0 : index
    %c0_16 = arith.constant 0 : index
    %16 = vector.load %arg14[%c0_14, %c0_15, %c0_16] : memref<8x8x128xf32, #tpu.memory_space<vmem>>, vector<8x8x128xf32>
    tpu.vector_store %arg14[%c0_14, %c0_15, %c0_16], %15 {strides = array<i32>} : memref<8x8x128xf32, #tpu.memory_space<vmem>>, vector<8x8x128xf32>,
    %c0_17 = arith.constant 0 : index
    %c0_18 = arith.constant 0 : index
    %17 = vector.load %arg2[%c0_17, %c0_18] : memref<8x1xi32, #tpu.memory_space<vmem>>, vector<8x1xi32>
    %c0_19 = arith.constant 0 : index
    %c0_20 = arith.constant 0 : index
    %18 = vector.load %arg4[%c0_19, %c0_20] : memref<32x128xbf16, #tpu.memory_space<vmem>>, vector<32x128xbf16>
    %c0_21 = arith.constant 0 : index
    %c0_22 = arith.constant 0 : index
    %19 = vector.load %arg7[%c0_21, %c0_22] : memref<32x128xbf16, #tpu.memory_space<vmem>>, vector<32x128xbf16>
    %cst_23 = arith.constant 0.000000e+00 : f32
    %20 = vector.broadcast %cst_23 : f32 to vector<8x32xf32>
    %c0_i32 = arith.constant 0 : i32
    %c7_i32 = arith.constant 7 : i32
    %21 = arith.subi %c7_i32, %c0_i32 : i32
    %22 = vector.broadcast %c0_i32 : i32 to vector<8x1xi32>
    %23 = arith.cmpi sgt, %17, %22 : vector<8x1xi32>
    %24 = arith.extui %23 : vector<8x1xi1> to vector<8x1xi32>
    %25 = arith.sitofp %24 : vector<8x1xi32> to vector<8x1xf32>
    %26 = vector.broadcast %21 : i32 to vector<8x1xi32>
    %27 = arith.cmpi sgt, %17, %26 : vector<8x1xi32>
    %28 = arith.extui %27 : vector<8x1xi1> to vector<8x1xi32>
    %29 = arith.sitofp %28 : vector<8x1xi32> to vector<8x1xf32>
    %30 = arith.index_cast %c0_i32 : i32 to index
    %c0_24 = arith.constant 0 : index
    %c0_25 = arith.constant 0 : index
    %31 = vector.load %arg13[%30, %c0_24, %c0_25] : memref<8x8x128xf32, #tpu.memory_space<vmem>>, vector<1x8x128xf32>
    %32 = vector.shape_cast %31 : vector<1x8x128xf32> to vector<8x128xf32>
    %33 = arith.truncf %20 : vector<8x32xf32> to vector<8x32xbf16>
    %cst_26 = arith.constant dense<0.000000e+00> : vector<8x128xf32>
    %34 = tpu.matmul %33, %18, %cst_26 {dimension_numbers = #tpu.dot_dimension_numbers<[1], [0], [0], [1], [0, 0, 1, 1], [], []>} : vector<8x32xbf16>, vector<32x128xbf16>, vector<8x128xf32> -> vector<8x128xf32>
    %35 = arith.addf %32, %34 : vector<8x128xf32>
    %36 = arith.negf %35 : vector<8x128xf32>
    %37 = math.exp %36 : vector<8x128xf32>
    %cst_27 = arith.constant 1.000000e+00 : f32
    %38 = vector.broadcast %cst_27 : f32 to vector<8x128xf32>
    %39 = arith.addf %38, %37 : vector<8x128xf32>
    %40 = arith.divf %38, %39 : vector<8x128xf32>
    %41 = math.tanh %35 : vector<8x128xf32>
    %42 = vector.extract_strided_slice %40 {offsets = [0, 0], sizes = [8, 32], strides = [1, 1]} : vector<8x128xf32> to vector<8x32xf32>
    %43 = vector.extract_strided_slice %40 {offsets = [0, 32], sizes = [8, 32], strides = [1, 1]} : vector<8x128xf32> to vector<8x32xf32>
    %44 = vector.extract_strided_slice %41 {offsets = [0, 64], sizes = [8, 32], strides = [1, 1]} : vector<8x128xf32> to vector<8x32xf32>
    %45 = vector.extract_strided_slice %40 {offsets = [0, 96], sizes = [8, 32], strides = [1, 1]} : vector<8x128xf32> to vector<8x32xf32>
    %46 = arith.mulf %43, %20 : vector<8x32xf32>
    %47 = arith.mulf %42, %44 : vector<8x32xf32>
    %48 = arith.addf %46, %47 : vector<8x32xf32>
    %49 = math.tanh %48 : vector<8x32xf32>
    %50 = arith.mulf %45, %49 : vector<8x32xf32>
    %51 = arith.index_cast %21 : i32 to index
    %c0_28 = arith.constant 0 : index
    %c0_29 = arith.constant 0 : index
    %52 = vector.load %arg14[%51, %c0_28, %c0_29] : memref<8x8x128xf32, #tpu.memory_space<vmem>>, vector<1x8x128xf32>
    %53 = vector.shape_cast %52 : vector<1x8x128xf32> to vector<8x128xf32>
    %54 = arith.truncf %20 : vector<8x32xf32> to vector<8x32xbf16>
    %cst_30 = arith.constant dense<0.000000e+00> : vector<8x128xf32>
    %55 = tpu.matmul %54, %19, %cst_30 {dimension_numbers = #tpu.dot_dimension_numbers<[1], [0], [0], [1], [0, 0, 1, 1], [], []>} : vector<8x32xbf16>, vector<32x128xbf16>, vector<8x128xf32> -> vector<8x128xf32>
    %56 = arith.addf %53, %55 : vector<8x128xf32>
    %57 = arith.negf %56 : vector<8x128xf32>
    %58 = math.exp %57 : vector<8x128xf32>
    %cst_31 = arith.constant 1.000000e+00 : f32
    %59 = vector.broadcast %cst_31 : f32 to vector<8x128xf32>
    %60 = arith.addf %59, %58 : vector<8x128xf32>
    %61 = arith.divf %59, %60 : vector<8x128xf32>
    %62 = math.tanh %56 : vector<8x128xf32>
    %63 = vector.extract_strided_slice %61 {offsets = [0, 0], sizes = [8, 32], strides = [1, 1]} : vector<8x128xf32> to vector<8x32xf32>
    %64 = vector.extract_strided_slice %61 {offsets = [0, 32], sizes = [8, 32], strides = [1, 1]} : vector<8x128xf32> to vector<8x32xf32>
    %65 = vector.extract_strided_slice %62 {offsets = [0, 64], sizes = [8, 32], strides = [1, 1]} : vector<8x128xf32> to vector<8x32xf32>
    %66 = vector.extract_strided_slice %61 {offsets = [0, 96], sizes = [8, 32], strides = [1, 1]} : vector<8x128xf32> to vector<8x32xf32>
    %67 = arith.mulf %64, %20 : vector<8x32xf32>
    %68 = arith.mulf %63, %65 : vector<8x32xf32>
    %69 = arith.addf %67, %68 : vector<8x32xf32>
    %70 = math.tanh %69 : vector<8x32xf32>
    %71 = arith.mulf %66, %70 : vector<8x32xf32>
    %72 = arith.subf %50, %20 : vector<8x32xf32>
    %73 = vector.broadcast %25 : vector<8x1xf32> to vector<8x32xf32>
    %74 = arith.mulf %73, %72 : vector<8x32xf32>
    %75 = arith.addf %20, %74 : vector<8x32xf32>
    %76 = arith.subf %48, %20 : vector<8x32xf32>
    %77 = vector.broadcast %25 : vector<8x1xf32> to vector<8x32xf32>
    %78 = arith.mulf %77, %76 : vector<8x32xf32>
    %79 = arith.addf %20, %78 : vector<8x32xf32>
    %80 = arith.subf %71, %20 : vector<8x32xf32>
    %81 = vector.broadcast %29 : vector<8x1xf32> to vector<8x32xf32>
    %82 = arith.mulf %81, %80 : vector<8x32xf32>
    %83 = arith.addf %20, %82 : vector<8x32xf32>
    %84 = arith.subf %69, %20 : vector<8x32xf32>
    %85 = vector.broadcast %29 : vector<8x1xf32> to vector<8x32xf32>
    %86 = arith.mulf %85, %84 : vector<8x32xf32>
    %87 = arith.addf %20, %86 : vector<8x32xf32>
    %88 = vector.broadcast %25 : vector<8x1xf32> to vector<8x32xf32>
    %89 = arith.mulf %75, %88 : vector<8x32xf32>
    %90 = arith.index_cast %c0_i32 : i32 to index
    %c0_32 = arith.constant 0 : index
    %c0_33 = arith.constant 0 : index
    %91 = vector.load %arg15[%90, %c0_32, %c0_33] : memref<8x8x32xf32, #tpu.memory_space<vmem>>, vector<1x8x32xf32>
    %92 = vector.shape_cast %91 : vector<1x8x32xf32> to vector<8x32xf32>
    %93 = vector.shape_cast %89 : vector<8x32xf32> to vector<1x8x32xf32>
    tpu.vector_store %arg15[%90, %c0_32, %c0_33], %93 {strides = array<i32>} : memref<8x8x32xf32, #tpu.memory_space<vmem>>, vector<1x8x32xf32>,
    %94 = vector.broadcast %29 : vector<8x1xf32> to vector<8x32xf32>
    %95 = arith.mulf %83, %94 : vector<8x32xf32>
    %96 = arith.index_cast %21 : i32 to index
    %c0_34 = arith.constant 0 : index
    %c0_35 = arith.constant 0 : index
    %97 = vector.load %arg16[%96, %c0_34, %c0_35] : memref<8x8x32xf32, #tpu.memory_space<vmem>>, vector<1x8x32xf32>
    %98 = vector.shape_cast %97 : vector<1x8x32xf32> to vector<8x32xf32>
    %99 = vector.shape_cast %95 : vector<8x32xf32> to vector<1x8x32xf32>
    tpu.vector_store %arg16[%96, %c0_34, %c0_35], %99 {strides = array<i32>} : memref<8x8x32xf32, #tpu.memory_space<vmem>>, vector<1x8x32xf32>,
    %c1_i32 = arith.constant 1 : i32
    %c7_i32_36 = arith.constant 7 : i32
    %100 = arith.subi %c7_i32_36, %c1_i32 : i32
    %101 = vector.broadcast %c1_i32 : i32 to vector<8x1xi32>
    %102 = arith.cmpi sgt, %17, %101 : vector<8x1xi32>
    %103 = arith.extui %102 : vector<8x1xi1> to vector<8x1xi32>
    %104 = arith.sitofp %103 : vector<8x1xi32> to vector<8x1xf32>
    %105 = vector.broadcast %100 : i32 to vector<8x1xi32>
    %106 = arith.cmpi sgt, %17, %105 : vector<8x1xi32>
    %107 = arith.extui %106 : vector<8x1xi1> to vector<8x1xi32>
    %108 = arith.sitofp %107 : vector<8x1xi32> to vector<8x1xf32>
    %109 = arith.index_cast %c1_i32 : i32 to index
    %c0_37 = arith.constant 0 : index
    %c0_38 = arith.constant 0 : index
    %110 = vector.load %arg13[%109, %c0_37, %c0_38] : memref<8x8x128xf32, #tpu.memory_space<vmem>>, vector<1x8x128xf32>
    %111 = vector.shape_cast %110 : vector<1x8x128xf32> to vector<8x128xf32>
    %112 = arith.truncf %75 : vector<8x32xf32> to vector<8x32xbf16>
    %cst_39 = arith.constant dense<0.000000e+00> : vector<8x128xf32>
    %113 = tpu.matmul %112, %18, %cst_39 {dimension_numbers = #tpu.dot_dimension_numbers<[1], [0], [0], [1], [0, 0, 1, 1], [], []>} : vector<8x32xbf16>, vector<32x128xbf16>, vector<8x128xf32> -> vector<8x128xf32>
    %114 = arith.addf %111, %113 : vector<8x128xf32>
    %115 = arith.negf %114 : vector<8x128xf32>
    %116 = math.exp %115 : vector<8x128xf32>
    %cst_40 = arith.constant 1.000000e+00 : f32
    %117 = vector.broadcast %cst_40 : f32 to vector<8x128xf32>
    %118 = arith.addf %117, %116 : vector<8x128xf32>
    %119 = arith.divf %117, %118 : vector<8x128xf32>
    %120 = math.tanh %114 : vector<8x128xf32>
    %121 = vector.extract_strided_slice %119 {offsets = [0, 0], sizes = [8, 32], strides = [1, 1]} : vector<8x128xf32> to vector<8x32xf32>
    %122 = vector.extract_strided_slice %119 {offsets = [0, 32], sizes = [8, 32], strides = [1, 1]} : vector<8x128xf32> to vector<8x32xf32>
    %123 = vector.extract_strided_slice %120 {offsets = [0, 64], sizes = [8, 32], strides = [1, 1]} : vector<8x128xf32> to vector<8x32xf32>
    %124 = vector.extract_strided_slice %119 {offsets = [0, 96], sizes = [8, 32], strides = [1, 1]} : vector<8x128xf32> to vector<8x32xf32>
    %125 = arith.mulf %122, %79 : vector<8x32xf32>
    %126 = arith.mulf %121, %123 : vector<8x32xf32>
    %127 = arith.addf %125, %126 : vector<8x32xf32>
    %128 = math.tanh %127 : vector<8x32xf32>
    %129 = arith.mulf %124, %128 : vector<8x32xf32>
    %130 = arith.index_cast %100 : i32 to index
    %c0_41 = arith.constant 0 : index
    %c0_42 = arith.constant 0 : index
    %131 = vector.load %arg14[%130, %c0_41, %c0_42] : memref<8x8x128xf32, #tpu.memory_space<vmem>>, vector<1x8x128xf32>
    %132 = vector.shape_cast %131 : vector<1x8x128xf32> to vector<8x128xf32>
    %133 = arith.truncf %83 : vector<8x32xf32> to vector<8x32xbf16>
    %cst_43 = arith.constant dense<0.000000e+00> : vector<8x128xf32>
    %134 = tpu.matmul %133, %19, %cst_43 {dimension_numbers = #tpu.dot_dimension_numbers<[1], [0], [0], [1], [0, 0, 1, 1], [], []>} : vector<8x32xbf16>, vector<32x128xbf16>, vector<8x128xf32> -> vector<8x128xf32>
    %135 = arith.addf %132, %134 : vector<8x128xf32>
    %136 = arith.negf %135 : vector<8x128xf32>
    %137 = math.exp %136 : vector<8x128xf32>
    %cst_44 = arith.constant 1.000000e+00 : f32
    %138 = vector.broadcast %cst_44 : f32 to vector<8x128xf32>
    %139 = arith.addf %138, %137 : vector<8x128xf32>
    %140 = arith.divf %138, %139 : vector<8x128xf32>
    %141 = math.tanh %135 : vector<8x128xf32>
    %142 = vector.extract_strided_slice %140 {offsets = [0, 0], sizes = [8, 32], strides = [1, 1]} : vector<8x128xf32> to vector<8x32xf32>
    %143 = vector.extract_strided_slice %140 {offsets = [0, 32], sizes = [8, 32], strides = [1, 1]} : vector<8x128xf32> to vector<8x32xf32>
    %144 = vector.extract_strided_slice %141 {offsets = [0, 64], sizes = [8, 32], strides = [1, 1]} : vector<8x128xf32> to vector<8x32xf32>
    %145 = vector.extract_strided_slice %140 {offsets = [0, 96], sizes = [8, 32], strides = [1, 1]} : vector<8x128xf32> to vector<8x32xf32>
    %146 = arith.mulf %143, %87 : vector<8x32xf32>
    %147 = arith.mulf %142, %144 : vector<8x32xf32>
    %148 = arith.addf %146, %147 : vector<8x32xf32>
    %149 = math.tanh %148 : vector<8x32xf32>
    %150 = arith.mulf %145, %149 : vector<8x32xf32>
    %151 = arith.subf %129, %75 : vector<8x32xf32>
    %152 = vector.broadcast %104 : vector<8x1xf32> to vector<8x32xf32>
    %153 = arith.mulf %152, %151 : vector<8x32xf32>
    %154 = arith.addf %75, %153 : vector<8x32xf32>
    %155 = arith.subf %127, %79 : vector<8x32xf32>
    %156 = vector.broadcast %104 : vector<8x1xf32> to vector<8x32xf32>
    %157 = arith.mulf %156, %155 : vector<8x32xf32>
    %158 = arith.addf %79, %157 : vector<8x32xf32>
    %159 = arith.subf %150, %83 : vector<8x32xf32>
    %160 = vector.broadcast %108 : vector<8x1xf32> to vector<8x32xf32>
    %161 = arith.mulf %160, %159 : vector<8x32xf32>
    %162 = arith.addf %83, %161 : vector<8x32xf32>
    %163 = arith.subf %148, %87 : vector<8x32xf32>
    %164 = vector.broadcast %108 : vector<8x1xf32> to vector<8x32xf32>
    %165 = arith.mulf %164, %163 : vector<8x32xf32>
    %166 = arith.addf %87, %165 : vector<8x32xf32>
    %167 = vector.broadcast %104 : vector<8x1xf32> to vector<8x32xf32>
    %168 = arith.mulf %154, %167 : vector<8x32xf32>
    %169 = arith.index_cast %c1_i32 : i32 to index
    %c0_45 = arith.constant 0 : index
    %c0_46 = arith.constant 0 : index
    %170 = vector.load %arg15[%169, %c0_45, %c0_46] : memref<8x8x32xf32, #tpu.memory_space<vmem>>, vector<1x8x32xf32>
    %171 = vector.shape_cast %170 : vector<1x8x32xf32> to vector<8x32xf32>
    %172 = vector.shape_cast %168 : vector<8x32xf32> to vector<1x8x32xf32>
    tpu.vector_store %arg15[%169, %c0_45, %c0_46], %172 {strides = array<i32>} : memref<8x8x32xf32, #tpu.memory_space<vmem>>, vector<1x8x32xf32>,
    %173 = vector.broadcast %108 : vector<8x1xf32> to vector<8x32xf32>
    %174 = arith.mulf %162, %173 : vector<8x32xf32>
    %175 = arith.index_cast %100 : i32 to index
    %c0_47 = arith.constant 0 : index
    %c0_48 = arith.constant 0 : index
    %176 = vector.load %arg16[%175, %c0_47, %c0_48] : memref<8x8x32xf32, #tpu.memory_space<vmem>>, vector<1x8x32xf32>
    %177 = vector.shape_cast %176 : vector<1x8x32xf32> to vector<8x32xf32>
    %178 = vector.shape_cast %174 : vector<8x32xf32> to vector<1x8x32xf32>
    tpu.vector_store %arg16[%175, %c0_47, %c0_48], %178 {strides = array<i32>} : memref<8x8x32xf32, #tpu.memory_space<vmem>>, vector<1x8x32xf32>,
    %c2_i32 = arith.constant 2 : i32
    %c7_i32_49 = arith.constant 7 : i32
    %179 = arith.subi %c7_i32_49, %c2_i32 : i32
    %180 = vector.broadcast %c2_i32 : i32 to vector<8x1xi32>
    %181 = arith.cmpi sgt, %17, %180 : vector<8x1xi32>
    %182 = arith.extui %181 : vector<8x1xi1> to vector<8x1xi32>
    %183 = arith.sitofp %182 : vector<8x1xi32> to vector<8x1xf32>
    %184 = vector.broadcast %179 : i32 to vector<8x1xi32>
    %185 = arith.cmpi sgt, %17, %184 : vector<8x1xi32>
    %186 = arith.extui %185 : vector<8x1xi1> to vector<8x1xi32>
    %187 = arith.sitofp %186 : vector<8x1xi32> to vector<8x1xf32>
    %188 = arith.index_cast %c2_i32 : i32 to index
    %c0_50 = arith.constant 0 : index
    %c0_51 = arith.constant 0 : index
    %189 = vector.load %arg13[%188, %c0_50, %c0_51] : memref<8x8x128xf32, #tpu.memory_space<vmem>>, vector<1x8x128xf32>
    %190 = vector.shape_cast %189 : vector<1x8x128xf32> to vector<8x128xf32>
    %191 = arith.truncf %154 : vector<8x32xf32> to vector<8x32xbf16>
    %cst_52 = arith.constant dense<0.000000e+00> : vector<8x128xf32>
    %192 = tpu.matmul %191, %18, %cst_52 {dimension_numbers = #tpu.dot_dimension_numbers<[1], [0], [0], [1], [0, 0, 1, 1], [], []>} : vector<8x32xbf16>, vector<32x128xbf16>, vector<8x128xf32> -> vector<8x128xf32>
    %193 = arith.addf %190, %192 : vector<8x128xf32>
    %194 = arith.negf %193 : vector<8x128xf32>
    %195 = math.exp %194 : vector<8x128xf32>
    %cst_53 = arith.constant 1.000000e+00 : f32
    %196 = vector.broadcast %cst_53 : f32 to vector<8x128xf32>
    %197 = arith.addf %196, %195 : vector<8x128xf32>
    %198 = arith.divf %196, %197 : vector<8x128xf32>
    %199 = math.tanh %193 : vector<8x128xf32>
    %200 = vector.extract_strided_slice %198 {offsets = [0, 0], sizes = [8, 32], strides = [1, 1]} : vector<8x128xf32> to vector<8x32xf32>
    %201 = vector.extract_strided_slice %198 {offsets = [0, 32], sizes = [8, 32], strides = [1, 1]} : vector<8x128xf32> to vector<8x32xf32>
    %202 = vector.extract_strided_slice %199 {offsets = [0, 64], sizes = [8, 32], strides = [1, 1]} : vector<8x128xf32> to vector<8x32xf32>
    %203 = vector.extract_strided_slice %198 {offsets = [0, 96], sizes = [8, 32], strides = [1, 1]} : vector<8x128xf32> to vector<8x32xf32>
    %204 = arith.mulf %201, %158 : vector<8x32xf32>
    %205 = arith.mulf %200, %202 : vector<8x32xf32>
    %206 = arith.addf %204, %205 : vector<8x32xf32>
    %207 = math.tanh %206 : vector<8x32xf32>
    %208 = arith.mulf %203, %207 : vector<8x32xf32>
    %209 = arith.index_cast %179 : i32 to index
    %c0_54 = arith.constant 0 : index
    %c0_55 = arith.constant 0 : index
    %210 = vector.load %arg14[%209, %c0_54, %c0_55] : memref<8x8x128xf32, #tpu.memory_space<vmem>>, vector<1x8x128xf32>
    %211 = vector.shape_cast %210 : vector<1x8x128xf32> to vector<8x128xf32>
    %212 = arith.truncf %162 : vector<8x32xf32> to vector<8x32xbf16>
    %cst_56 = arith.constant dense<0.000000e+00> : vector<8x128xf32>
    %213 = tpu.matmul %212, %19, %cst_56 {dimension_numbers = #tpu.dot_dimension_numbers<[1], [0], [0], [1], [0, 0, 1, 1], [], []>} : vector<8x32xbf16>, vector<32x128xbf16>, vector<8x128xf32> -> vector<8x128xf32>
    %214 = arith.addf %211, %213 : vector<8x128xf32>
    %215 = arith.negf %214 : vector<8x128xf32>
    %216 = math.exp %215 : vector<8x128xf32>
    %cst_57 = arith.constant 1.000000e+00 : f32
    %217 = vector.broadcast %cst_57 : f32 to vector<8x128xf32>
    %218 = arith.addf %217, %216 : vector<8x128xf32>
    %219 = arith.divf %217, %218 : vector<8x128xf32>
    %220 = math.tanh %214 : vector<8x128xf32>
    %221 = vector.extract_strided_slice %219 {offsets = [0, 0], sizes = [8, 32], strides = [1, 1]} : vector<8x128xf32> to vector<8x32xf32>
    %222 = vector.extract_strided_slice %219 {offsets = [0, 32], sizes = [8, 32], strides = [1, 1]} : vector<8x128xf32> to vector<8x32xf32>
    %223 = vector.extract_strided_slice %220 {offsets = [0, 64], sizes = [8, 32], strides = [1, 1]} : vector<8x128xf32> to vector<8x32xf32>
    %224 = vector.extract_strided_slice %219 {offsets = [0, 96], sizes = [8, 32], strides = [1, 1]} : vector<8x128xf32> to vector<8x32xf32>
    %225 = arith.mulf %222, %166 : vector<8x32xf32>
    %226 = arith.mulf %221, %223 : vector<8x32xf32>
    %227 = arith.addf %225, %226 : vector<8x32xf32>
    %228 = math.tanh %227 : vector<8x32xf32>
    %229 = arith.mulf %224, %228 : vector<8x32xf32>
    %230 = arith.subf %208, %154 : vector<8x32xf32>
    %231 = vector.broadcast %183 : vector<8x1xf32> to vector<8x32xf32>
    %232 = arith.mulf %231, %230 : vector<8x32xf32>
    %233 = arith.addf %154, %232 : vector<8x32xf32>
    %234 = arith.subf %206, %158 : vector<8x32xf32>
    %235 = vector.broadcast %183 : vector<8x1xf32> to vector<8x32xf32>
    %236 = arith.mulf %235, %234 : vector<8x32xf32>
    %237 = arith.addf %158, %236 : vector<8x32xf32>
    %238 = arith.subf %229, %162 : vector<8x32xf32>
    %239 = vector.broadcast %187 : vector<8x1xf32> to vector<8x32xf32>
    %240 = arith.mulf %239, %238 : vector<8x32xf32>
    %241 = arith.addf %162, %240 : vector<8x32xf32>
    %242 = arith.subf %227, %166 : vector<8x32xf32>
    %243 = vector.broadcast %187 : vector<8x1xf32> to vector<8x32xf32>
    %244 = arith.mulf %243, %242 : vector<8x32xf32>
    %245 = arith.addf %166, %244 : vector<8x32xf32>
    %246 = vector.broadcast %183 : vector<8x1xf32> to vector<8x32xf32>
    %247 = arith.mulf %233, %246 : vector<8x32xf32>
    %248 = arith.index_cast %c2_i32 : i32 to index
    %c0_58 = arith.constant 0 : index
    %c0_59 = arith.constant 0 : index
    %249 = vector.load %arg15[%248, %c0_58, %c0_59] : memref<8x8x32xf32, #tpu.memory_space<vmem>>, vector<1x8x32xf32>
    %250 = vector.shape_cast %249 : vector<1x8x32xf32> to vector<8x32xf32>
    %251 = vector.shape_cast %247 : vector<8x32xf32> to vector<1x8x32xf32>
    tpu.vector_store %arg15[%248, %c0_58, %c0_59], %251 {strides = array<i32>} : memref<8x8x32xf32, #tpu.memory_space<vmem>>, vector<1x8x32xf32>,
    %252 = vector.broadcast %187 : vector<8x1xf32> to vector<8x32xf32>
    %253 = arith.mulf %241, %252 : vector<8x32xf32>
    %254 = arith.index_cast %179 : i32 to index
    %c0_60 = arith.constant 0 : index
    %c0_61 = arith.constant 0 : index
    %255 = vector.load %arg16[%254, %c0_60, %c0_61] : memref<8x8x32xf32, #tpu.memory_space<vmem>>, vector<1x8x32xf32>
    %256 = vector.shape_cast %255 : vector<1x8x32xf32> to vector<8x32xf32>
    %257 = vector.shape_cast %253 : vector<8x32xf32> to vector<1x8x32xf32>
    tpu.vector_store %arg16[%254, %c0_60, %c0_61], %257 {strides = array<i32>} : memref<8x8x32xf32, #tpu.memory_space<vmem>>, vector<1x8x32xf32>,
    %c3_i32 = arith.constant 3 : i32
    %c7_i32_62 = arith.constant 7 : i32
    %258 = arith.subi %c7_i32_62, %c3_i32 : i32
    %259 = vector.broadcast %c3_i32 : i32 to vector<8x1xi32>
    %260 = arith.cmpi sgt, %17, %259 : vector<8x1xi32>
    %261 = arith.extui %260 : vector<8x1xi1> to vector<8x1xi32>
    %262 = arith.sitofp %261 : vector<8x1xi32> to vector<8x1xf32>
    %263 = vector.broadcast %258 : i32 to vector<8x1xi32>
    %264 = arith.cmpi sgt, %17, %263 : vector<8x1xi32>
    %265 = arith.extui %264 : vector<8x1xi1> to vector<8x1xi32>
    %266 = arith.sitofp %265 : vector<8x1xi32> to vector<8x1xf32>
    %267 = arith.index_cast %c3_i32 : i32 to index
    %c0_63 = arith.constant 0 : index
    %c0_64 = arith.constant 0 : index
    %268 = vector.load %arg13[%267, %c0_63, %c0_64] : memref<8x8x128xf32, #tpu.memory_space<vmem>>, vector<1x8x128xf32>
    %269 = vector.shape_cast %268 : vector<1x8x128xf32> to vector<8x128xf32>
    %270 = arith.truncf %233 : vector<8x32xf32> to vector<8x32xbf16>
    %cst_65 = arith.constant dense<0.000000e+00> : vector<8x128xf32>
    %271 = tpu.matmul %270, %18, %cst_65 {dimension_numbers = #tpu.dot_dimension_numbers<[1], [0], [0], [1], [0, 0, 1, 1], [], []>} : vector<8x32xbf16>, vector<32x128xbf16>, vector<8x128xf32> -> vector<8x128xf32>
    %272 = arith.addf %269, %271 : vector<8x128xf32>
    %273 = arith.negf %272 : vector<8x128xf32>
    %274 = math.exp %273 : vector<8x128xf32>
    %cst_66 = arith.constant 1.000000e+00 : f32
    %275 = vector.broadcast %cst_66 : f32 to vector<8x128xf32>
    %276 = arith.addf %275, %274 : vector<8x128xf32>
    %277 = arith.divf %275, %276 : vector<8x128xf32>
    %278 = math.tanh %272 : vector<8x128xf32>
    %279 = vector.extract_strided_slice %277 {offsets = [0, 0], sizes = [8, 32], strides = [1, 1]} : vector<8x128xf32> to vector<8x32xf32>
    %280 = vector.extract_strided_slice %277 {offsets = [0, 32], sizes = [8, 32], strides = [1, 1]} : vector<8x128xf32> to vector<8x32xf32>
    %281 = vector.extract_strided_slice %278 {offsets = [0, 64], sizes = [8, 32], strides = [1, 1]} : vector<8x128xf32> to vector<8x32xf32>
    %282 = vector.extract_strided_slice %277 {offsets = [0, 96], sizes = [8, 32], strides = [1, 1]} : vector<8x128xf32> to vector<8x32xf32>
    %283 = arith.mulf %280, %237 : vector<8x32xf32>
    %284 = arith.mulf %279, %281 : vector<8x32xf32>
    %285 = arith.addf %283, %284 : vector<8x32xf32>
    %286 = math.tanh %285 : vector<8x32xf32>
    %287 = arith.mulf %282, %286 : vector<8x32xf32>
    %288 = arith.index_cast %258 : i32 to index
    %c0_67 = arith.constant 0 : index
    %c0_68 = arith.constant 0 : index
    %289 = vector.load %arg14[%288, %c0_67, %c0_68] : memref<8x8x128xf32, #tpu.memory_space<vmem>>, vector<1x8x128xf32>
    %290 = vector.shape_cast %289 : vector<1x8x128xf32> to vector<8x128xf32>
    %291 = arith.truncf %241 : vector<8x32xf32> to vector<8x32xbf16>
    %cst_69 = arith.constant dense<0.000000e+00> : vector<8x128xf32>
    %292 = tpu.matmul %291, %19, %cst_69 {dimension_numbers = #tpu.dot_dimension_numbers<[1], [0], [0], [1], [0, 0, 1, 1], [], []>} : vector<8x32xbf16>, vector<32x128xbf16>, vector<8x128xf32> -> vector<8x128xf32>
    %293 = arith.addf %290, %292 : vector<8x128xf32>
    %294 = arith.negf %293 : vector<8x128xf32>
    %295 = math.exp %294 : vector<8x128xf32>
    %cst_70 = arith.constant 1.000000e+00 : f32
    %296 = vector.broadcast %cst_70 : f32 to vector<8x128xf32>
    %297 = arith.addf %296, %295 : vector<8x128xf32>
    %298 = arith.divf %296, %297 : vector<8x128xf32>
    %299 = math.tanh %293 : vector<8x128xf32>
    %300 = vector.extract_strided_slice %298 {offsets = [0, 0], sizes = [8, 32], strides = [1, 1]} : vector<8x128xf32> to vector<8x32xf32>
    %301 = vector.extract_strided_slice %298 {offsets = [0, 32], sizes = [8, 32], strides = [1, 1]} : vector<8x128xf32> to vector<8x32xf32>
    %302 = vector.extract_strided_slice %299 {offsets = [0, 64], sizes = [8, 32], strides = [1, 1]} : vector<8x128xf32> to vector<8x32xf32>
    %303 = vector.extract_strided_slice %298 {offsets = [0, 96], sizes = [8, 32], strides = [1, 1]} : vector<8x128xf32> to vector<8x32xf32>
    %304 = arith.mulf %301, %245 : vector<8x32xf32>
    %305 = arith.mulf %300, %302 : vector<8x32xf32>
    %306 = arith.addf %304, %305 : vector<8x32xf32>
    %307 = math.tanh %306 : vector<8x32xf32>
    %308 = arith.mulf %303, %307 : vector<8x32xf32>
    %309 = arith.subf %287, %233 : vector<8x32xf32>
    %310 = vector.broadcast %262 : vector<8x1xf32> to vector<8x32xf32>
    %311 = arith.mulf %310, %309 : vector<8x32xf32>
    %312 = arith.addf %233, %311 : vector<8x32xf32>
    %313 = arith.subf %285, %237 : vector<8x32xf32>
    %314 = vector.broadcast %262 : vector<8x1xf32> to vector<8x32xf32>
    %315 = arith.mulf %314, %313 : vector<8x32xf32>
    %316 = arith.addf %237, %315 : vector<8x32xf32>
    %317 = arith.subf %308, %241 : vector<8x32xf32>
    %318 = vector.broadcast %266 : vector<8x1xf32> to vector<8x32xf32>
    %319 = arith.mulf %318, %317 : vector<8x32xf32>
    %320 = arith.addf %241, %319 : vector<8x32xf32>
    %321 = arith.subf %306, %245 : vector<8x32xf32>
    %322 = vector.broadcast %266 : vector<8x1xf32> to vector<8x32xf32>
    %323 = arith.mulf %322, %321 : vector<8x32xf32>
    %324 = arith.addf %245, %323 : vector<8x32xf32>
    %325 = vector.broadcast %262 : vector<8x1xf32> to vector<8x32xf32>
    %326 = arith.mulf %312, %325 : vector<8x32xf32>
    %327 = arith.index_cast %c3_i32 : i32 to index
    %c0_71 = arith.constant 0 : index
    %c0_72 = arith.constant 0 : index
    %328 = vector.load %arg15[%327, %c0_71, %c0_72] : memref<8x8x32xf32, #tpu.memory_space<vmem>>, vector<1x8x32xf32>
    %329 = vector.shape_cast %328 : vector<1x8x32xf32> to vector<8x32xf32>
    %330 = vector.shape_cast %326 : vector<8x32xf32> to vector<1x8x32xf32>
    tpu.vector_store %arg15[%327, %c0_71, %c0_72], %330 {strides = array<i32>} : memref<8x8x32xf32, #tpu.memory_space<vmem>>, vector<1x8x32xf32>,
    %331 = vector.broadcast %266 : vector<8x1xf32> to vector<8x32xf32>
    %332 = arith.mulf %320, %331 : vector<8x32xf32>
    %333 = arith.index_cast %258 : i32 to index
    %c0_73 = arith.constant 0 : index
    %c0_74 = arith.constant 0 : index
    %334 = vector.load %arg16[%333, %c0_73, %c0_74] : memref<8x8x32xf32, #tpu.memory_space<vmem>>, vector<1x8x32xf32>
    %335 = vector.shape_cast %334 : vector<1x8x32xf32> to vector<8x32xf32>
    %336 = vector.shape_cast %332 : vector<8x32xf32> to vector<1x8x32xf32>
    tpu.vector_store %arg16[%333, %c0_73, %c0_74], %336 {strides = array<i32>} : memref<8x8x32xf32, #tpu.memory_space<vmem>>, vector<1x8x32xf32>,
    %c4_i32 = arith.constant 4 : i32
    %c7_i32_75 = arith.constant 7 : i32
    %337 = arith.subi %c7_i32_75, %c4_i32 : i32
    %338 = vector.broadcast %c4_i32 : i32 to vector<8x1xi32>
    %339 = arith.cmpi sgt, %17, %338 : vector<8x1xi32>
    %340 = arith.extui %339 : vector<8x1xi1> to vector<8x1xi32>
    %341 = arith.sitofp %340 : vector<8x1xi32> to vector<8x1xf32>
    %342 = vector.broadcast %337 : i32 to vector<8x1xi32>
    %343 = arith.cmpi sgt, %17, %342 : vector<8x1xi32>
    %344 = arith.extui %343 : vector<8x1xi1> to vector<8x1xi32>
    %345 = arith.sitofp %344 : vector<8x1xi32> to vector<8x1xf32>
    %346 = arith.index_cast %c4_i32 : i32 to index
    %c0_76 = arith.constant 0 : index
    %c0_77 = arith.constant 0 : index
    %347 = vector.load %arg13[%346, %c0_76, %c0_77] : memref<8x8x128xf32, #tpu.memory_space<vmem>>, vector<1x8x128xf32>
    %348 = vector.shape_cast %347 : vector<1x8x128xf32> to vector<8x128xf32>
    %349 = arith.truncf %312 : vector<8x32xf32> to vector<8x32xbf16>
    %cst_78 = arith.constant dense<0.000000e+00> : vector<8x128xf32>
    %350 = tpu.matmul %349, %18, %cst_78 {dimension_numbers = #tpu.dot_dimension_numbers<[1], [0], [0], [1], [0, 0, 1, 1], [], []>} : vector<8x32xbf16>, vector<32x128xbf16>, vector<8x128xf32> -> vector<8x128xf32>
    %351 = arith.addf %348, %350 : vector<8x128xf32>
    %352 = arith.negf %351 : vector<8x128xf32>
    %353 = math.exp %352 : vector<8x128xf32>
    %cst_79 = arith.constant 1.000000e+00 : f32
    %354 = vector.broadcast %cst_79 : f32 to vector<8x128xf32>
    %355 = arith.addf %354, %353 : vector<8x128xf32>
    %356 = arith.divf %354, %355 : vector<8x128xf32>
    %357 = math.tanh %351 : vector<8x128xf32>
    %358 = vector.extract_strided_slice %356 {offsets = [0, 0], sizes = [8, 32], strides = [1, 1]} : vector<8x128xf32> to vector<8x32xf32>
    %359 = vector.extract_strided_slice %356 {offsets = [0, 32], sizes = [8, 32], strides = [1, 1]} : vector<8x128xf32> to vector<8x32xf32>
    %360 = vector.extract_strided_slice %357 {offsets = [0, 64], sizes = [8, 32], strides = [1, 1]} : vector<8x128xf32> to vector<8x32xf32>
    %361 = vector.extract_strided_slice %356 {offsets = [0, 96], sizes = [8, 32], strides = [1, 1]} : vector<8x128xf32> to vector<8x32xf32>
    %362 = arith.mulf %359, %316 : vector<8x32xf32>
    %363 = arith.mulf %358, %360 : vector<8x32xf32>
    %364 = arith.addf %362, %363 : vector<8x32xf32>
    %365 = math.tanh %364 : vector<8x32xf32>
    %366 = arith.mulf %361, %365 : vector<8x32xf32>
    %367 = arith.index_cast %337 : i32 to index
    %c0_80 = arith.constant 0 : index
    %c0_81 = arith.constant 0 : index
    %368 = vector.load %arg14[%367, %c0_80, %c0_81] : memref<8x8x128xf32, #tpu.memory_space<vmem>>, vector<1x8x128xf32>
    %369 = vector.shape_cast %368 : vector<1x8x128xf32> to vector<8x128xf32>
    %370 = arith.truncf %320 : vector<8x32xf32> to vector<8x32xbf16>
    %cst_82 = arith.constant dense<0.000000e+00> : vector<8x128xf32>
    %371 = tpu.matmul %370, %19, %cst_82 {dimension_numbers = #tpu.dot_dimension_numbers<[1], [0], [0], [1], [0, 0, 1, 1], [], []>} : vector<8x32xbf16>, vector<32x128xbf16>, vector<8x128xf32> -> vector<8x128xf32>
    %372 = arith.addf %369, %371 : vector<8x128xf32>
    %373 = arith.negf %372 : vector<8x128xf32>
    %374 = math.exp %373 : vector<8x128xf32>
    %cst_83 = arith.constant 1.000000e+00 : f32
    %375 = vector.broadcast %cst_83 : f32 to vector<8x128xf32>
    %376 = arith.addf %375, %374 : vector<8x128xf32>
    %377 = arith.divf %375, %376 : vector<8x128xf32>
    %378 = math.tanh %372 : vector<8x128xf32>
    %379 = vector.extract_strided_slice %377 {offsets = [0, 0], sizes = [8, 32], strides = [1, 1]} : vector<8x128xf32> to vector<8x32xf32>
    %380 = vector.extract_strided_slice %377 {offsets = [0, 32], sizes = [8, 32], strides = [1, 1]} : vector<8x128xf32> to vector<8x32xf32>
    %381 = vector.extract_strided_slice %378 {offsets = [0, 64], sizes = [8, 32], strides = [1, 1]} : vector<8x128xf32> to vector<8x32xf32>
    %382 = vector.extract_strided_slice %377 {offsets = [0, 96], sizes = [8, 32], strides = [1, 1]} : vector<8x128xf32> to vector<8x32xf32>
    %383 = arith.mulf %380, %324 : vector<8x32xf32>
    %384 = arith.mulf %379, %381 : vector<8x32xf32>
    %385 = arith.addf %383, %384 : vector<8x32xf32>
    %386 = math.tanh %385 : vector<8x32xf32>
    %387 = arith.mulf %382, %386 : vector<8x32xf32>
    %388 = arith.subf %366, %312 : vector<8x32xf32>
    %389 = vector.broadcast %341 : vector<8x1xf32> to vector<8x32xf32>
    %390 = arith.mulf %389, %388 : vector<8x32xf32>
    %391 = arith.addf %312, %390 : vector<8x32xf32>
    %392 = arith.subf %364, %316 : vector<8x32xf32>
    %393 = vector.broadcast %341 : vector<8x1xf32> to vector<8x32xf32>
    %394 = arith.mulf %393, %392 : vector<8x32xf32>
    %395 = arith.addf %316, %394 : vector<8x32xf32>
    %396 = arith.subf %387, %320 : vector<8x32xf32>
    %397 = vector.broadcast %345 : vector<8x1xf32> to vector<8x32xf32>
    %398 = arith.mulf %397, %396 : vector<8x32xf32>
    %399 = arith.addf %320, %398 : vector<8x32xf32>
    %400 = arith.subf %385, %324 : vector<8x32xf32>
    %401 = vector.broadcast %345 : vector<8x1xf32> to vector<8x32xf32>
    %402 = arith.mulf %401, %400 : vector<8x32xf32>
    %403 = arith.addf %324, %402 : vector<8x32xf32>
    %404 = vector.broadcast %341 : vector<8x1xf32> to vector<8x32xf32>
    %405 = arith.mulf %391, %404 : vector<8x32xf32>
    %406 = arith.index_cast %c4_i32 : i32 to index
    %c0_84 = arith.constant 0 : index
    %c0_85 = arith.constant 0 : index
    %407 = vector.load %arg15[%406, %c0_84, %c0_85] : memref<8x8x32xf32, #tpu.memory_space<vmem>>, vector<1x8x32xf32>
    %408 = vector.shape_cast %407 : vector<1x8x32xf32> to vector<8x32xf32>
    %409 = vector.shape_cast %405 : vector<8x32xf32> to vector<1x8x32xf32>
    tpu.vector_store %arg15[%406, %c0_84, %c0_85], %409 {strides = array<i32>} : memref<8x8x32xf32, #tpu.memory_space<vmem>>, vector<1x8x32xf32>,
    %410 = vector.broadcast %345 : vector<8x1xf32> to vector<8x32xf32>
    %411 = arith.mulf %399, %410 : vector<8x32xf32>
    %412 = arith.index_cast %337 : i32 to index
    %c0_86 = arith.constant 0 : index
    %c0_87 = arith.constant 0 : index
    %413 = vector.load %arg16[%412, %c0_86, %c0_87] : memref<8x8x32xf32, #tpu.memory_space<vmem>>, vector<1x8x32xf32>
    %414 = vector.shape_cast %413 : vector<1x8x32xf32> to vector<8x32xf32>
    %415 = vector.shape_cast %411 : vector<8x32xf32> to vector<1x8x32xf32>
    tpu.vector_store %arg16[%412, %c0_86, %c0_87], %415 {strides = array<i32>} : memref<8x8x32xf32, #tpu.memory_space<vmem>>, vector<1x8x32xf32>,
    %c5_i32 = arith.constant 5 : i32
    %c7_i32_88 = arith.constant 7 : i32
    %416 = arith.subi %c7_i32_88, %c5_i32 : i32
    %417 = vector.broadcast %c5_i32 : i32 to vector<8x1xi32>
    %418 = arith.cmpi sgt, %17, %417 : vector<8x1xi32>
    %419 = arith.extui %418 : vector<8x1xi1> to vector<8x1xi32>
    %420 = arith.sitofp %419 : vector<8x1xi32> to vector<8x1xf32>
    %421 = vector.broadcast %416 : i32 to vector<8x1xi32>
    %422 = arith.cmpi sgt, %17, %421 : vector<8x1xi32>
    %423 = arith.extui %422 : vector<8x1xi1> to vector<8x1xi32>
    %424 = arith.sitofp %423 : vector<8x1xi32> to vector<8x1xf32>
    %425 = arith.index_cast %c5_i32 : i32 to index
    %c0_89 = arith.constant 0 : index
    %c0_90 = arith.constant 0 : index
    %426 = vector.load %arg13[%425, %c0_89, %c0_90] : memref<8x8x128xf32, #tpu.memory_space<vmem>>, vector<1x8x128xf32>
    %427 = vector.shape_cast %426 : vector<1x8x128xf32> to vector<8x128xf32>
    %428 = arith.truncf %391 : vector<8x32xf32> to vector<8x32xbf16>
    %cst_91 = arith.constant dense<0.000000e+00> : vector<8x128xf32>
    %429 = tpu.matmul %428, %18, %cst_91 {dimension_numbers = #tpu.dot_dimension_numbers<[1], [0], [0], [1], [0, 0, 1, 1], [], []>} : vector<8x32xbf16>, vector<32x128xbf16>, vector<8x128xf32> -> vector<8x128xf32>
    %430 = arith.addf %427, %429 : vector<8x128xf32>
    %431 = arith.negf %430 : vector<8x128xf32>
    %432 = math.exp %431 : vector<8x128xf32>
    %cst_92 = arith.constant 1.000000e+00 : f32
    %433 = vector.broadcast %cst_92 : f32 to vector<8x128xf32>
    %434 = arith.addf %433, %432 : vector<8x128xf32>
    %435 = arith.divf %433, %434 : vector<8x128xf32>
    %436 = math.tanh %430 : vector<8x128xf32>
    %437 = vector.extract_strided_slice %435 {offsets = [0, 0], sizes = [8, 32], strides = [1, 1]} : vector<8x128xf32> to vector<8x32xf32>
    %438 = vector.extract_strided_slice %435 {offsets = [0, 32], sizes = [8, 32], strides = [1, 1]} : vector<8x128xf32> to vector<8x32xf32>
    %439 = vector.extract_strided_slice %436 {offsets = [0, 64], sizes = [8, 32], strides = [1, 1]} : vector<8x128xf32> to vector<8x32xf32>
    %440 = vector.extract_strided_slice %435 {offsets = [0, 96], sizes = [8, 32], strides = [1, 1]} : vector<8x128xf32> to vector<8x32xf32>
    %441 = arith.mulf %438, %395 : vector<8x32xf32>
    %442 = arith.mulf %437, %439 : vector<8x32xf32>
    %443 = arith.addf %441, %442 : vector<8x32xf32>
    %444 = math.tanh %443 : vector<8x32xf32>
    %445 = arith.mulf %440, %444 : vector<8x32xf32>
    %446 = arith.index_cast %416 : i32 to index
    %c0_93 = arith.constant 0 : index
    %c0_94 = arith.constant 0 : index
    %447 = vector.load %arg14[%446, %c0_93, %c0_94] : memref<8x8x128xf32, #tpu.memory_space<vmem>>, vector<1x8x128xf32>
    %448 = vector.shape_cast %447 : vector<1x8x128xf32> to vector<8x128xf32>
    %449 = arith.truncf %399 : vector<8x32xf32> to vector<8x32xbf16>
    %cst_95 = arith.constant dense<0.000000e+00> : vector<8x128xf32>
    %450 = tpu.matmul %449, %19, %cst_95 {dimension_numbers = #tpu.dot_dimension_numbers<[1], [0], [0], [1], [0, 0, 1, 1], [], []>} : vector<8x32xbf16>, vector<32x128xbf16>, vector<8x128xf32> -> vector<8x128xf32>
    %451 = arith.addf %448, %450 : vector<8x128xf32>
    %452 = arith.negf %451 : vector<8x128xf32>
    %453 = math.exp %452 : vector<8x128xf32>
    %cst_96 = arith.constant 1.000000e+00 : f32
    %454 = vector.broadcast %cst_96 : f32 to vector<8x128xf32>
    %455 = arith.addf %454, %453 : vector<8x128xf32>
    %456 = arith.divf %454, %455 : vector<8x128xf32>
    %457 = math.tanh %451 : vector<8x128xf32>
    %458 = vector.extract_strided_slice %456 {offsets = [0, 0], sizes = [8, 32], strides = [1, 1]} : vector<8x128xf32> to vector<8x32xf32>
    %459 = vector.extract_strided_slice %456 {offsets = [0, 32], sizes = [8, 32], strides = [1, 1]} : vector<8x128xf32> to vector<8x32xf32>
    %460 = vector.extract_strided_slice %457 {offsets = [0, 64], sizes = [8, 32], strides = [1, 1]} : vector<8x128xf32> to vector<8x32xf32>
    %461 = vector.extract_strided_slice %456 {offsets = [0, 96], sizes = [8, 32], strides = [1, 1]} : vector<8x128xf32> to vector<8x32xf32>
    %462 = arith.mulf %459, %403 : vector<8x32xf32>
    %463 = arith.mulf %458, %460 : vector<8x32xf32>
    %464 = arith.addf %462, %463 : vector<8x32xf32>
    %465 = math.tanh %464 : vector<8x32xf32>
    %466 = arith.mulf %461, %465 : vector<8x32xf32>
    %467 = arith.subf %445, %391 : vector<8x32xf32>
    %468 = vector.broadcast %420 : vector<8x1xf32> to vector<8x32xf32>
    %469 = arith.mulf %468, %467 : vector<8x32xf32>
    %470 = arith.addf %391, %469 : vector<8x32xf32>
    %471 = arith.subf %443, %395 : vector<8x32xf32>
    %472 = vector.broadcast %420 : vector<8x1xf32> to vector<8x32xf32>
    %473 = arith.mulf %472, %471 : vector<8x32xf32>
    %474 = arith.addf %395, %473 : vector<8x32xf32>
    %475 = arith.subf %466, %399 : vector<8x32xf32>
    %476 = vector.broadcast %424 : vector<8x1xf32> to vector<8x32xf32>
    %477 = arith.mulf %476, %475 : vector<8x32xf32>
    %478 = arith.addf %399, %477 : vector<8x32xf32>
    %479 = arith.subf %464, %403 : vector<8x32xf32>
    %480 = vector.broadcast %424 : vector<8x1xf32> to vector<8x32xf32>
    %481 = arith.mulf %480, %479 : vector<8x32xf32>
    %482 = arith.addf %403, %481 : vector<8x32xf32>
    %483 = vector.broadcast %420 : vector<8x1xf32> to vector<8x32xf32>
    %484 = arith.mulf %470, %483 : vector<8x32xf32>
    %485 = arith.index_cast %c5_i32 : i32 to index
    %c0_97 = arith.constant 0 : index
    %c0_98 = arith.constant 0 : index
    %486 = vector.load %arg15[%485, %c0_97, %c0_98] : memref<8x8x32xf32, #tpu.memory_space<vmem>>, vector<1x8x32xf32>
    %487 = vector.shape_cast %486 : vector<1x8x32xf32> to vector<8x32xf32>
    %488 = vector.shape_cast %484 : vector<8x32xf32> to vector<1x8x32xf32>
    tpu.vector_store %arg15[%485, %c0_97, %c0_98], %488 {strides = array<i32>} : memref<8x8x32xf32, #tpu.memory_space<vmem>>, vector<1x8x32xf32>,
    %489 = vector.broadcast %424 : vector<8x1xf32> to vector<8x32xf32>
    %490 = arith.mulf %478, %489 : vector<8x32xf32>
    %491 = arith.index_cast %416 : i32 to index
    %c0_99 = arith.constant 0 : index
    %c0_100 = arith.constant 0 : index
    %492 = vector.load %arg16[%491, %c0_99, %c0_100] : memref<8x8x32xf32, #tpu.memory_space<vmem>>, vector<1x8x32xf32>
    %493 = vector.shape_cast %492 : vector<1x8x32xf32> to vector<8x32xf32>
    %494 = vector.shape_cast %490 : vector<8x32xf32> to vector<1x8x32xf32>
    tpu.vector_store %arg16[%491, %c0_99, %c0_100], %494 {strides = array<i32>} : memref<8x8x32xf32, #tpu.memory_space<vmem>>, vector<1x8x32xf32>,
    %c6_i32 = arith.constant 6 : i32
    %c7_i32_101 = arith.constant 7 : i32
    %495 = arith.subi %c7_i32_101, %c6_i32 : i32
    %496 = vector.broadcast %c6_i32 : i32 to vector<8x1xi32>
    %497 = arith.cmpi sgt, %17, %496 : vector<8x1xi32>
    %498 = arith.extui %497 : vector<8x1xi1> to vector<8x1xi32>
    %499 = arith.sitofp %498 : vector<8x1xi32> to vector<8x1xf32>
    %500 = vector.broadcast %495 : i32 to vector<8x1xi32>
    %501 = arith.cmpi sgt, %17, %500 : vector<8x1xi32>
    %502 = arith.extui %501 : vector<8x1xi1> to vector<8x1xi32>
    %503 = arith.sitofp %502 : vector<8x1xi32> to vector<8x1xf32>
    %504 = arith.index_cast %c6_i32 : i32 to index
    %c0_102 = arith.constant 0 : index
    %c0_103 = arith.constant 0 : index
    %505 = vector.load %arg13[%504, %c0_102, %c0_103] : memref<8x8x128xf32, #tpu.memory_space<vmem>>, vector<1x8x128xf32>
    %506 = vector.shape_cast %505 : vector<1x8x128xf32> to vector<8x128xf32>
    %507 = arith.truncf %470 : vector<8x32xf32> to vector<8x32xbf16>
    %cst_104 = arith.constant dense<0.000000e+00> : vector<8x128xf32>
    %508 = tpu.matmul %507, %18, %cst_104 {dimension_numbers = #tpu.dot_dimension_numbers<[1], [0], [0], [1], [0, 0, 1, 1], [], []>} : vector<8x32xbf16>, vector<32x128xbf16>, vector<8x128xf32> -> vector<8x128xf32>
    %509 = arith.addf %506, %508 : vector<8x128xf32>
    %510 = arith.negf %509 : vector<8x128xf32>
    %511 = math.exp %510 : vector<8x128xf32>
    %cst_105 = arith.constant 1.000000e+00 : f32
    %512 = vector.broadcast %cst_105 : f32 to vector<8x128xf32>
    %513 = arith.addf %512, %511 : vector<8x128xf32>
    %514 = arith.divf %512, %513 : vector<8x128xf32>
    %515 = math.tanh %509 : vector<8x128xf32>
    %516 = vector.extract_strided_slice %514 {offsets = [0, 0], sizes = [8, 32], strides = [1, 1]} : vector<8x128xf32> to vector<8x32xf32>
    %517 = vector.extract_strided_slice %514 {offsets = [0, 32], sizes = [8, 32], strides = [1, 1]} : vector<8x128xf32> to vector<8x32xf32>
    %518 = vector.extract_strided_slice %515 {offsets = [0, 64], sizes = [8, 32], strides = [1, 1]} : vector<8x128xf32> to vector<8x32xf32>
    %519 = vector.extract_strided_slice %514 {offsets = [0, 96], sizes = [8, 32], strides = [1, 1]} : vector<8x128xf32> to vector<8x32xf32>
    %520 = arith.mulf %517, %474 : vector<8x32xf32>
    %521 = arith.mulf %516, %518 : vector<8x32xf32>
    %522 = arith.addf %520, %521 : vector<8x32xf32>
    %523 = math.tanh %522 : vector<8x32xf32>
    %524 = arith.mulf %519, %523 : vector<8x32xf32>
    %525 = arith.index_cast %495 : i32 to index
    %c0_106 = arith.constant 0 : index
    %c0_107 = arith.constant 0 : index
    %526 = vector.load %arg14[%525, %c0_106, %c0_107] : memref<8x8x128xf32, #tpu.memory_space<vmem>>, vector<1x8x128xf32>
    %527 = vector.shape_cast %526 : vector<1x8x128xf32> to vector<8x128xf32>
    %528 = arith.truncf %478 : vector<8x32xf32> to vector<8x32xbf16>
    %cst_108 = arith.constant dense<0.000000e+00> : vector<8x128xf32>
    %529 = tpu.matmul %528, %19, %cst_108 {dimension_numbers = #tpu.dot_dimension_numbers<[1], [0], [0], [1], [0, 0, 1, 1], [], []>} : vector<8x32xbf16>, vector<32x128xbf16>, vector<8x128xf32> -> vector<8x128xf32>
    %530 = arith.addf %527, %529 : vector<8x128xf32>
    %531 = arith.negf %530 : vector<8x128xf32>
    %532 = math.exp %531 : vector<8x128xf32>
    %cst_109 = arith.constant 1.000000e+00 : f32
    %533 = vector.broadcast %cst_109 : f32 to vector<8x128xf32>
    %534 = arith.addf %533, %532 : vector<8x128xf32>
    %535 = arith.divf %533, %534 : vector<8x128xf32>
    %536 = math.tanh %530 : vector<8x128xf32>
    %537 = vector.extract_strided_slice %535 {offsets = [0, 0], sizes = [8, 32], strides = [1, 1]} : vector<8x128xf32> to vector<8x32xf32>
    %538 = vector.extract_strided_slice %535 {offsets = [0, 32], sizes = [8, 32], strides = [1, 1]} : vector<8x128xf32> to vector<8x32xf32>
    %539 = vector.extract_strided_slice %536 {offsets = [0, 64], sizes = [8, 32], strides = [1, 1]} : vector<8x128xf32> to vector<8x32xf32>
    %540 = vector.extract_strided_slice %535 {offsets = [0, 96], sizes = [8, 32], strides = [1, 1]} : vector<8x128xf32> to vector<8x32xf32>
    %541 = arith.mulf %538, %482 : vector<8x32xf32>
    %542 = arith.mulf %537, %539 : vector<8x32xf32>
    %543 = arith.addf %541, %542 : vector<8x32xf32>
    %544 = math.tanh %543 : vector<8x32xf32>
    %545 = arith.mulf %540, %544 : vector<8x32xf32>
    %546 = arith.subf %524, %470 : vector<8x32xf32>
    %547 = vector.broadcast %499 : vector<8x1xf32> to vector<8x32xf32>
    %548 = arith.mulf %547, %546 : vector<8x32xf32>
    %549 = arith.addf %470, %548 : vector<8x32xf32>
    %550 = arith.subf %522, %474 : vector<8x32xf32>
    %551 = vector.broadcast %499 : vector<8x1xf32> to vector<8x32xf32>
    %552 = arith.mulf %551, %550 : vector<8x32xf32>
    %553 = arith.addf %474, %552 : vector<8x32xf32>
    %554 = arith.subf %545, %478 : vector<8x32xf32>
    %555 = vector.broadcast %503 : vector<8x1xf32> to vector<8x32xf32>
    %556 = arith.mulf %555, %554 : vector<8x32xf32>
    %557 = arith.addf %478, %556 : vector<8x32xf32>
    %558 = arith.subf %543, %482 : vector<8x32xf32>
    %559 = vector.broadcast %503 : vector<8x1xf32> to vector<8x32xf32>
    %560 = arith.mulf %559, %558 : vector<8x32xf32>
    %561 = arith.addf %482, %560 : vector<8x32xf32>
    %562 = vector.broadcast %499 : vector<8x1xf32> to vector<8x32xf32>
    %563 = arith.mulf %549, %562 : vector<8x32xf32>
    %564 = arith.index_cast %c6_i32 : i32 to index
    %c0_110 = arith.constant 0 : index
    %c0_111 = arith.constant 0 : index
    %565 = vector.load %arg15[%564, %c0_110, %c0_111] : memref<8x8x32xf32, #tpu.memory_space<vmem>>, vector<1x8x32xf32>
    %566 = vector.shape_cast %565 : vector<1x8x32xf32> to vector<8x32xf32>
    %567 = vector.shape_cast %563 : vector<8x32xf32> to vector<1x8x32xf32>
    tpu.vector_store %arg15[%564, %c0_110, %c0_111], %567 {strides = array<i32>} : memref<8x8x32xf32, #tpu.memory_space<vmem>>, vector<1x8x32xf32>,
    %568 = vector.broadcast %503 : vector<8x1xf32> to vector<8x32xf32>
    %569 = arith.mulf %557, %568 : vector<8x32xf32>
    %570 = arith.index_cast %495 : i32 to index
    %c0_112 = arith.constant 0 : index
    %c0_113 = arith.constant 0 : index
    %571 = vector.load %arg16[%570, %c0_112, %c0_113] : memref<8x8x32xf32, #tpu.memory_space<vmem>>, vector<1x8x32xf32>
    %572 = vector.shape_cast %571 : vector<1x8x32xf32> to vector<8x32xf32>
    %573 = vector.shape_cast %569 : vector<8x32xf32> to vector<1x8x32xf32>
    tpu.vector_store %arg16[%570, %c0_112, %c0_113], %573 {strides = array<i32>} : memref<8x8x32xf32, #tpu.memory_space<vmem>>, vector<1x8x32xf32>,
    %c7_i32_114 = arith.constant 7 : i32
    %c7_i32_115 = arith.constant 7 : i32
    %574 = arith.subi %c7_i32_115, %c7_i32_114 : i32
    %575 = vector.broadcast %c7_i32_114 : i32 to vector<8x1xi32>
    %576 = arith.cmpi sgt, %17, %575 : vector<8x1xi32>
    %577 = arith.extui %576 : vector<8x1xi1> to vector<8x1xi32>
    %578 = arith.sitofp %577 : vector<8x1xi32> to vector<8x1xf32>
    %579 = vector.broadcast %574 : i32 to vector<8x1xi32>
    %580 = arith.cmpi sgt, %17, %579 : vector<8x1xi32>
    %581 = arith.extui %580 : vector<8x1xi1> to vector<8x1xi32>
    %582 = arith.sitofp %581 : vector<8x1xi32> to vector<8x1xf32>
    %583 = arith.index_cast %c7_i32_114 : i32 to index
    %c0_116 = arith.constant 0 : index
    %c0_117 = arith.constant 0 : index
    %584 = vector.load %arg13[%583, %c0_116, %c0_117] : memref<8x8x128xf32, #tpu.memory_space<vmem>>, vector<1x8x128xf32>
    %585 = vector.shape_cast %584 : vector<1x8x128xf32> to vector<8x128xf32>
    %586 = arith.truncf %549 : vector<8x32xf32> to vector<8x32xbf16>
    %cst_118 = arith.constant dense<0.000000e+00> : vector<8x128xf32>
    %587 = tpu.matmul %586, %18, %cst_118 {dimension_numbers = #tpu.dot_dimension_numbers<[1], [0], [0], [1], [0, 0, 1, 1], [], []>} : vector<8x32xbf16>, vector<32x128xbf16>, vector<8x128xf32> -> vector<8x128xf32>
    %588 = arith.addf %585, %587 : vector<8x128xf32>
    %589 = arith.negf %588 : vector<8x128xf32>
    %590 = math.exp %589 : vector<8x128xf32>
    %cst_119 = arith.constant 1.000000e+00 : f32
    %591 = vector.broadcast %cst_119 : f32 to vector<8x128xf32>
    %592 = arith.addf %591, %590 : vector<8x128xf32>
    %593 = arith.divf %591, %592 : vector<8x128xf32>
    %594 = math.tanh %588 : vector<8x128xf32>
    %595 = vector.extract_strided_slice %593 {offsets = [0, 0], sizes = [8, 32], strides = [1, 1]} : vector<8x128xf32> to vector<8x32xf32>
    %596 = vector.extract_strided_slice %593 {offsets = [0, 32], sizes = [8, 32], strides = [1, 1]} : vector<8x128xf32> to vector<8x32xf32>
    %597 = vector.extract_strided_slice %594 {offsets = [0, 64], sizes = [8, 32], strides = [1, 1]} : vector<8x128xf32> to vector<8x32xf32>
    %598 = vector.extract_strided_slice %593 {offsets = [0, 96], sizes = [8, 32], strides = [1, 1]} : vector<8x128xf32> to vector<8x32xf32>
    %599 = arith.mulf %596, %553 : vector<8x32xf32>
    %600 = arith.mulf %595, %597 : vector<8x32xf32>
    %601 = arith.addf %599, %600 : vector<8x32xf32>
    %602 = math.tanh %601 : vector<8x32xf32>
    %603 = arith.mulf %598, %602 : vector<8x32xf32>
    %604 = arith.index_cast %574 : i32 to index
    %c0_120 = arith.constant 0 : index
    %c0_121 = arith.constant 0 : index
    %605 = vector.load %arg14[%604, %c0_120, %c0_121] : memref<8x8x128xf32, #tpu.memory_space<vmem>>, vector<1x8x128xf32>
    %606 = vector.shape_cast %605 : vector<1x8x128xf32> to vector<8x128xf32>
    %607 = arith.truncf %557 : vector<8x32xf32> to vector<8x32xbf16>
    %cst_122 = arith.constant dense<0.000000e+00> : vector<8x128xf32>
    %608 = tpu.matmul %607, %19, %cst_122 {dimension_numbers = #tpu.dot_dimension_numbers<[1], [0], [0], [1], [0, 0, 1, 1], [], []>} : vector<8x32xbf16>, vector<32x128xbf16>, vector<8x128xf32> -> vector<8x128xf32>
    %609 = arith.addf %606, %608 : vector<8x128xf32>
    %610 = arith.negf %609 : vector<8x128xf32>
    %611 = math.exp %610 : vector<8x128xf32>
    %cst_123 = arith.constant 1.000000e+00 : f32
    %612 = vector.broadcast %cst_123 : f32 to vector<8x128xf32>
    %613 = arith.addf %612, %611 : vector<8x128xf32>
    %614 = arith.divf %612, %613 : vector<8x128xf32>
    %615 = math.tanh %609 : vector<8x128xf32>
    %616 = vector.extract_strided_slice %614 {offsets = [0, 0], sizes = [8, 32], strides = [1, 1]} : vector<8x128xf32> to vector<8x32xf32>
    %617 = vector.extract_strided_slice %614 {offsets = [0, 32], sizes = [8, 32], strides = [1, 1]} : vector<8x128xf32> to vector<8x32xf32>
    %618 = vector.extract_strided_slice %615 {offsets = [0, 64], sizes = [8, 32], strides = [1, 1]} : vector<8x128xf32> to vector<8x32xf32>
    %619 = vector.extract_strided_slice %614 {offsets = [0, 96], sizes = [8, 32], strides = [1, 1]} : vector<8x128xf32> to vector<8x32xf32>
    %620 = arith.mulf %617, %561 : vector<8x32xf32>
    %621 = arith.mulf %616, %618 : vector<8x32xf32>
    %622 = arith.addf %620, %621 : vector<8x32xf32>
    %623 = math.tanh %622 : vector<8x32xf32>
    %624 = arith.mulf %619, %623 : vector<8x32xf32>
    %625 = arith.subf %603, %549 : vector<8x32xf32>
    %626 = vector.broadcast %578 : vector<8x1xf32> to vector<8x32xf32>
    %627 = arith.mulf %626, %625 : vector<8x32xf32>
    %628 = arith.addf %549, %627 : vector<8x32xf32>
    %629 = arith.subf %601, %553 : vector<8x32xf32>
    %630 = vector.broadcast %578 : vector<8x1xf32> to vector<8x32xf32>
    %631 = arith.mulf %630, %629 : vector<8x32xf32>
    %632 = arith.addf %553, %631 : vector<8x32xf32>
    %633 = arith.subf %624, %557 : vector<8x32xf32>
    %634 = vector.broadcast %582 : vector<8x1xf32> to vector<8x32xf32>
    %635 = arith.mulf %634, %633 : vector<8x32xf32>
    %636 = arith.addf %557, %635 : vector<8x32xf32>
    %637 = arith.subf %622, %561 : vector<8x32xf32>
    %638 = vector.broadcast %582 : vector<8x1xf32> to vector<8x32xf32>
    %639 = arith.mulf %638, %637 : vector<8x32xf32>
    %640 = arith.addf %561, %639 : vector<8x32xf32>
    %641 = vector.broadcast %578 : vector<8x1xf32> to vector<8x32xf32>
    %642 = arith.mulf %628, %641 : vector<8x32xf32>
    %643 = arith.index_cast %c7_i32_114 : i32 to index
    %c0_124 = arith.constant 0 : index
    %c0_125 = arith.constant 0 : index
    %644 = vector.load %arg15[%643, %c0_124, %c0_125] : memref<8x8x32xf32, #tpu.memory_space<vmem>>, vector<1x8x32xf32>
    %645 = vector.shape_cast %644 : vector<1x8x32xf32> to vector<8x32xf32>
    %646 = vector.shape_cast %642 : vector<8x32xf32> to vector<1x8x32xf32>
    tpu.vector_store %arg15[%643, %c0_124, %c0_125], %646 {strides = array<i32>} : memref<8x8x32xf32, #tpu.memory_space<vmem>>, vector<1x8x32xf32>,
    %647 = vector.broadcast %582 : vector<8x1xf32> to vector<8x32xf32>
    %648 = arith.mulf %636, %647 : vector<8x32xf32>
    %649 = arith.index_cast %574 : i32 to index
    %c0_126 = arith.constant 0 : index
    %c0_127 = arith.constant 0 : index
    %650 = vector.load %arg16[%649, %c0_126, %c0_127] : memref<8x8x32xf32, #tpu.memory_space<vmem>>, vector<1x8x32xf32>
    %651 = vector.shape_cast %650 : vector<1x8x32xf32> to vector<8x32xf32>
    %652 = vector.shape_cast %648 : vector<8x32xf32> to vector<1x8x32xf32>
    tpu.vector_store %arg16[%649, %c0_126, %c0_127], %652 {strides = array<i32>} : memref<8x8x32xf32, #tpu.memory_space<vmem>>, vector<1x8x32xf32>,
    %c8_i32 = arith.constant 8 : i32
    %c0_128 = arith.constant 0 : index
    %c0_129 = arith.constant 0 : index
    %c0_130 = arith.constant 0 : index
    %653 = vector.load %arg15[%c0_128, %c0_129, %c0_130] : memref<8x8x32xf32, #tpu.memory_space<vmem>>, vector<8x8x32xf32>
    %654 = vector.shape_cast %653 : vector<8x8x32xf32> to vector<64x32xf32>
    %655 = arith.truncf %654 : vector<64x32xf32> to vector<64x32xbf16>
    %c0_131 = arith.constant 0 : index
    %c0_132 = arith.constant 0 : index
    %c0_133 = arith.constant 0 : index
    %656 = vector.load %arg16[%c0_131, %c0_132, %c0_133] : memref<8x8x32xf32, #tpu.memory_space<vmem>>, vector<8x8x32xf32>
    %657 = vector.shape_cast %656 : vector<8x8x32xf32> to vector<64x32xf32>
    %658 = arith.truncf %657 : vector<64x32xf32> to vector<64x32xbf16>
    %c0_134 = arith.constant 0 : index
    %c0_135 = arith.constant 0 : index
    %659 = vector.load %arg9[%c0_134, %c0_135] : memref<32x128xbf16, #tpu.memory_space<vmem>>, vector<32x128xbf16>
    %cst_136 = arith.constant dense<0.000000e+00> : vector<64x128xf32>
    %660 = tpu.matmul %655, %659, %cst_136 {dimension_numbers = #tpu.dot_dimension_numbers<[1], [0], [0], [1], [0, 0, 1, 1], [], []>} : vector<64x32xbf16>, vector<32x128xbf16>, vector<64x128xf32> -> vector<64x128xf32>
    %c0_137 = arith.constant 0 : index
    %c0_138 = arith.constant 0 : index
    %661 = vector.load %arg10[%c0_137, %c0_138] : memref<32x128xbf16, #tpu.memory_space<vmem>>, vector<32x128xbf16>
    %cst_139 = arith.constant dense<0.000000e+00> : vector<64x128xf32>
    %662 = tpu.matmul %658, %661, %cst_139 {dimension_numbers = #tpu.dot_dimension_numbers<[1], [0], [0], [1], [0, 0, 1, 1], [], []>} : vector<64x32xbf16>, vector<32x128xbf16>, vector<64x128xf32> -> vector<64x128xf32>
    %663 = arith.addf %660, %662 : vector<64x128xf32>
    %c0_140 = arith.constant 0 : index
    %c0_141 = arith.constant 0 : index
    %664 = vector.load %arg11[%c0_140, %c0_141] : memref<1x128xf32, #tpu.memory_space<vmem>>, vector<1x128xf32>
    %665 = vector.broadcast %664 : vector<1x128xf32> to vector<64x128xf32>
    %666 = arith.addf %663, %665 : vector<64x128xf32>
    %667 = vector.shape_cast %666 : vector<64x128xf32> to vector<8x8x128xf32>
    %c0_142 = arith.constant 0 : index
    %c0_143 = arith.constant 0 : index
    %c0_144 = arith.constant 0 : index
    %668 = vector.load %arg12[%c0_142, %c0_143, %c0_144] : memref<8x8x128xf32, #tpu.memory_space<vmem>>, vector<8x8x128xf32>
    tpu.vector_store %arg12[%c0_142, %c0_143, %c0_144], %667 {strides = array<i32>} : memref<8x8x128xf32, #tpu.memory_space<vmem>>, vector<8x8x128xf32>,
    return
  }
  func.func @transform_0(%arg0: i32) -> (i32, i32, i32) {
    %c0_i32 = arith.constant 0 : i32
    %c0_i32_0 = arith.constant 0 : i32
    %c0_i32_1 = arith.constant 0 : i32
    return %c0_i32, %arg0, %c0_i32_0 : i32, i32, i32
  }
  func.func @transform_1(%arg0: i32) -> (i32, i32) {
    %c0_i32 = arith.constant 0 : i32
    %c0_i32_0 = arith.constant 0 : i32
    return %arg0, %c0_i32 : i32, i32
  }
  func.func @transform_2(%arg0: i32) -> (i32, i32) {
    %c0_i32 = arith.constant 0 : i32
    %c0_i32_0 = arith.constant 0 : i32
    %c0_i32_1 = arith.constant 0 : i32
    return %c0_i32, %c0_i32_0 : i32, i32
  }
  func.func @transform_3(%arg0: i32) -> (i32, i32) {
    %c0_i32 = arith.constant 0 : i32
    %c0_i32_0 = arith.constant 0 : i32
    %c0_i32_1 = arith.constant 0 : i32
    return %c0_i32, %c0_i32_0 : i32, i32
  }
  func.func @transform_4(%arg0: i32) -> (i32, i32) {
    %c0_i32 = arith.constant 0 : i32
    %c0_i32_0 = arith.constant 0 : i32
    %c0_i32_1 = arith.constant 0 : i32
    return %c0_i32, %c0_i32_0 : i32, i32
  }
  func.func @transform_5(%arg0: i32) -> (i32, i32) {
    %c0_i32 = arith.constant 0 : i32
    %c0_i32_0 = arith.constant 0 : i32
    %c0_i32_1 = arith.constant 0 : i32
    return %c0_i32, %c0_i32_0 : i32, i32
  }
  func.func @transform_6(%arg0: i32) -> (i32, i32) {
    %c0_i32 = arith.constant 0 : i32
    %c0_i32_0 = arith.constant 0 : i32
    %c0_i32_1 = arith.constant 0 : i32
    return %c0_i32, %c0_i32_0 : i32, i32
  }
  func.func @transform_7(%arg0: i32) -> (i32, i32) {
    %c0_i32 = arith.constant 0 : i32
    %c0_i32_0 = arith.constant 0 : i32
    %c0_i32_1 = arith.constant 0 : i32
    return %c0_i32, %c0_i32_0 : i32, i32
  }
  func.func @transform_8(%arg0: i32) -> (i32, i32) {
    %c0_i32 = arith.constant 0 : i32
    %c0_i32_0 = arith.constant 0 : i32
    %c0_i32_1 = arith.constant 0 : i32
    return %c0_i32, %c0_i32_0 : i32, i32
  }
  func.func @transform_9(%arg0: i32) -> (i32, i32) {
    %c0_i32 = arith.constant 0 : i32
    %c0_i32_0 = arith.constant 0 : i32
    %c0_i32_1 = arith.constant 0 : i32
    return %c0_i32, %c0_i32_0 : i32, i32
  }
  func.func @transform_10(%arg0: i32) -> (i32, i32) {
    %c0_i32 = arith.constant 0 : i32
    %c0_i32_0 = arith.constant 0 : i32
    %c0_i32_1 = arith.constant 0 : i32
    return %c0_i32, %c0_i32_0 : i32, i32
  }
  func.func @transform_11(%arg0: i32) -> (i32, i32, i32) {
    %c0_i32 = arith.constant 0 : i32
    %c0_i32_0 = arith.constant 0 : i32
    %c0_i32_1 = arith.constant 0 : i32
    return %c0_i32, %arg0, %c0_i32_0 : i32, i32, i32
  }
}

</mosaic_0001>

<bundles_post_ra>
// kernel: lstm_tagger_forward.2
= control target key start
LH: loop header
LB: loop body
LE: loop exit
PB: predicated region body
PF: predicated region fallthrough
CT: control target
= control target key end

     0   :  { %v1286_v1 = vmov 0.0   ;;  %vm1287_vm0 = vmmov 0   ;;  %v1288_v3 = vmov 0   ;;  %s1289_s24 = smov 64   ;;  %vm223_vm3 = vcmask 261120   ;;  %s1694_s2 = inlined_call_operand.vmem [shape: bf16[128,128], index: 2, kind: input, shape index: {}]   ;;  %s1695_s3 = inlined_call_operand.vmem [shape: bf16[32,128], index: 3, kind: input, shape index: {}]   ;;  %s1696_s0 = inlined_call_operand.vmem [shape: f32[6,16,128], index: 0, kind: input, shape index: {}]   ;;  %s1697_s4 = inlined_call_operand.vmem [shape: f32[1,128], index: 4, kind: input, shape index: {}]   ;;  %s1698_s1 = inlined_call_operand.vmem [shape: s32[16,1], index: 1, kind: input, shape index: {}]   ;;  %s1699_s5 = inlined_call_operand.vmem [shape: f32[16,32], index: 5, kind: output, shape index: {}]  }
   0x1   :  { %v1180_v0 = vld [vmem:[%s1694_s2 + $0x38] sm:$0xff]   ;;  %1095 = vmatprep.subr.bf16.mxu1 %v1286_v1  ;;  %1099 = vmatprep.mubr.msk.bf16.mxu1 %vm1287_vm0, %v1286_v1  ;;  %v1181_v2 = vld [vmem:[%s1694_s2 + $0x30] sm:$0xff]   ;;  %v1182_v4 = vld [vmem:[%s1694_s2 + $0x28] sm:$0xff]  }
   0x2   :  { %1148 = vset.pattern.permute.xlu0 %v1288_v3  ;;  %1154 = vset.pattern.permute.xlu1 %v1288_v3  ;;  %v1336_v5 = vld [vmem:[%s1695_s3 + $0x8] sm:$0xff]   ;;  %v1183_v6 = vld [vmem:[%s1694_s2 + $0x20] sm:$0xff]   ;;  %v1184_v11 = vld [vmem:[%s1694_s2 + $0x18] sm:$0xff]  }
   0x3   :  { %1067 = vmatprep.subr.bf16.mxu0 %v1180_v0  ;;  %1096 = vmatpush3.bf16.msra.mxu1 %v1336_v5  ;;  %v1345_v7 = vld [vmem:[%s1695_s3] sm:$0xff]   ;;  %v22_v9 = vld [vmem:[%s1696_s0 + $0x8] sm:$0xff]  ;;  %v1185_v12 = vld [vmem:[%s1694_s2 + $0x10] sm:$0xff]  }
   0x4   :  { %1068 = vmatpush3.bf16.msra.mxu0 %v1180_v0  ;;  %1097 = vmatprep.subr.bf16.mxu1 %v1286_v1  ;;  %v21_v8 = vld [vmem:[%s1696_s0] sm:$0xff]  ;;  %v1187_v13 = vld [vmem:[%s1694_s2 + $0x8] sm:$0xff]   ;;  %v23_v15 = vld [vmem:[%s1696_s0 + $0x10] sm:$0xff] }
   0x5   :  { %1069 = vmatprep.subr.bf16.mxu0 %v1181_v2  ;;  %v33_v10 = vpack.c.bf16 %v22_v9, %v21_v8  ;;  %v1189_v14 = vld [vmem:[%s1694_s2] sm:$0xff]   ;;  %v24_v16 = vld [vmem:[%s1696_s0 + $0x18] sm:$0xff]  ;;  %v1399_v32 = vld [vmem:[%s1698_s1 + $0x8] sm:$0xff] }
   0x6   :  { %v34_v17 = vpack.c.bf16 %v24_v16, %v23_v15  ;;  %v1385_v23 = vld [vmem:[%s1697_s4] ss:$0 sm:$0xff]  ;;  %vm319_vm2 = vcmp.gt.s32.totalorder %v1399_v32, 0  ;;  %vm444_vm5 = vcmp.gt.s32.totalorder %v1399_v32, 1  ;;  %vm573_vm7 = vcmp.gt.s32.totalorder %v1399_v32, 2 }
   0x7   :  { %1098 = vmatpush3.bf16.msra.mxu1 %v1345_v7  ;;  %1083 = vmatprep.mubr.bf16.mxu0 %v33_v10  ;;  %v1394_v31 = vld [vmem:[%s1698_s1] sm:$0xff]  ;;  %v1009_v35 = vsel %vm319_vm2, 1.0, %v1286_v1  ;;  %s1290_s1 = smov 32   ;;  %vm702_vm9 = vcmp.gt.s32.totalorder %v1399_v32, 3  ;;  %vm831_vm11 = vcmp.gt.s32.totalorder %v1399_v32, 4  ;;  %vm960_vm13 = vcmp.gt.s32.totalorder %v1399_v32, 5 }
   0x8   :  { %1070 = vmatpush3.bf16.msra.mxu0 %v1181_v2  ;;  %1103 = vmatprep.subr.bf16.mxu1 %v1286_v1  ;;  %vm318_vm1 = vcmp.gt.s32.totalorder %v1394_v31, 0  ;;  %vm443_vm4 = vcmp.gt.s32.totalorder %v1394_v31, 1  ;;  %vm572_vm6 = vcmp.gt.s32.totalorder %v1394_v31, 2  ;;  %vm701_vm8 = vcmp.gt.s32.totalorder %v1394_v31, 3 }
   0x9   :  { %1071 = vmatprep.subr.bf16.mxu0 %v1182_v4  ;;  %v1008_v34 = vsel %vm318_vm1, 1.0, %v1286_v1  ;;  %vm830_vm10 = vcmp.gt.s32.totalorder %v1394_v31, 4  ;;  %vm959_vm12 = vcmp.gt.s32.totalorder %v1394_v31, 5 }
   0xa   :  { %1100 = vmatmul.mubr.bf16.vlgmr.msra.gmra.mxu1 %v1288_v3  ;;  %v1149_v37 = vpack.i.bf16 %v1009_v35, %v1008_v34 }
   0xb   :  { %1104 = vmatpush3.bf16.msra.mxu1 %v1336_v5  ;;  %1107 = vmatprep.mubr.msk.bf16.mxu1 %vm1287_vm0, %v1286_v1 }
   0xc   :  { %1072 = vmatpush3.bf16.msra.mxu0 %v1182_v4  ;;  %1105 = vmatprep.subr.bf16.mxu1 %v1286_v1 }
   0xd   :  { %1073 = vmatprep.subr.bf16.mxu0 %v1183_v6 }
   0xf   :  { %1106 = vmatpush3.bf16.msra.mxu1 %v1345_v7 }
  0x10   :  { %1074 = vmatpush3.bf16.msra.mxu0 %v1183_v6  ;;  %1111 = vmatprep.subr.bf16.mxu1 %v1286_v1 }
  0x11   :  { %1075 = vmatprep.subr.bf16.mxu0 %v1184_v11 }
  0x14   :  { %1076 = vmatpush3.bf16.msra.mxu0 %v1184_v11 }
  0x15   :  { %1077 = vmatprep.subr.bf16.mxu0 %v1185_v12 }
  0x18   :  { %1078 = vmatpush3.bf16.msra.mxu0 %v1185_v12 }
  0x19   :  { %1079 = vmatprep.subr.bf16.mxu0 %v1187_v13 }
  0x1c   :  { %1080 = vmatpush3.bf16.msra.mxu0 %v1187_v13 }
  0x1d   :  { %1081 = vmatprep.subr.bf16.mxu0 %v1189_v14 }
  0x20   :  { %1082 = vmatpush3.bf16.msra.mxu0 %v1189_v14 }
  0x23   :  { %1084 = vmatmul.mubr.bf16.vlgmr.msra.gmra.mxu0 %v34_v17 }
  0xca   :  { %v261_v18 = vpop.f32.mrf.mxu1 }
  0xcc   :  { %v1101_v19 = vpop.f32.mrf.mxu1 }
  0xce   :  { %v264_v20 = vpop.f32.mrf.mxu1 }
  0xd0   :  { %v1102_v21 = vpop.f32.mrf.mxu1 }
  0xe3   :  { %v1380_v22 = vpop.f32.mrf.mxu0 }
  0xe4   :  { %v153_v8 = vadd.f32 %v1380_v22, %v1385_v23 }
  0xe5   :  { %v144_v24 = vpop.f32.mrf.mxu0 }
  0xe6   :  { %v145_v25 = vadd.f32 %v1385_v23, %v144_v24 }
  0xe7   :  { %v1388_v26 = vpop.f32.mrf.mxu0 }
  0xe8   :  { %v268_v27 = vadd.f32 %v261_v18, %v145_v25  ;;  %v156_v12 = vadd.f32 %v1388_v26, %v1385_v23 }
  0xe9   :  { %v147_v28 = vpop.f32.mrf.mxu0 }
  0xea   :  { %1190 = vtanh.f32 %v268_v27  ;;  %v148_v29 = vadd.f32 %v1385_v23, %v147_v28  ;;  %v1006_v38 = vmul.f32 -1.442695, %v268_v27  ;;  %v1013_v27 = vsel %vm443_vm4, 1.0, %v1286_v1 }
  0xeb   :  { %v1014_v28 = vsel %vm444_vm5, 1.0, %v1286_v1 }
  0xec   :  { %v269_v30 = vadd.f32 %v264_v20, %v148_v29 }
  0xee   :  { %1192 = vtanh.f32 %v269_v30  ;;  %v1007_v39 = vmul.f32 -1.442695, %v269_v30  ;;  %v1155_v30 = vpack.i.bf16 %v1014_v28, %v1013_v27 }
  0xef   :  { %1194 = vpow2.f32 %v1006_v38 }
  0xf0   :  { %1196 = vpow2.f32 %v1007_v39 }
  0xf7   :  { %v1191_v33 = vpop.eup %1190 }
  0xf8   :  { %288 = vrot.lane.b32.xlu0 %v1191_v33, %s1289_s24 }
  0xfb   :  { %v1193_v36 = vpop.eup %1192 }
  0xfc   :  { %290 = vrot.lane.b32.xlu0 %v1193_v36, %s1289_s24  ;;  %v1195_v40 = vpop.eup %1194 }
  0xfd   :  { %v276_v41 = vadd.f32 1.0, %v1195_v40  ;;  %v1197_v42 = vpop.eup %1196 }
  0xfe   :  { %v277_v43 = vadd.f32 1.0, %v1197_v42 }
  0xff   :  { %1198 = vrcp.f32 %v276_v41 }
 0x100   :  { %1150 = vperm.xlu0 %1148, %v1149_v37   ;;  %1200 = vrcp.f32 %v277_v43 }
 0x10c   :  { %v1199_v44 = vpop.eup %1198 }
 0x10d   :  { %v1201_v47 = vpop.eup %1200  ;;  %v284_v50 = vmul.f32 0.0, %v1199_v44 }
 0x10e   :  { %v285_v53 = vmul.f32 0.0, %v1201_v47 }
 0x16a   :  { %v289_v45 = vpop.permute.xlu0 %288 }
 0x16b   :  { %v294_v46 = vmul.f32 %v1199_v44, %v289_v45  ;;  %v25_v45 = vld [vmem:[%s1696_s0 + $0x20] sm:$0xff] }
 0x16d   :  { %298 = vrot.lane.b32.xlu1 %v294_v46, %s1290_s1  ;;  %v26_v46 = vld [vmem:[%s1696_s0 + $0x28] sm:$0xff] }
 0x16e   :  { %v291_v48 = vpop.permute.xlu0 %290 }
 0x16f   :  { %v295_v49 = vmul.f32 %v1201_v47, %v291_v48  ;;  %v35_v48 = vpack.c.bf16 %v26_v46, %v25_v45 }
 0x171   :  { %300 = vrot.lane.b32.xlu1 %v295_v49, %s1290_s1  ;;  %v28_v49 = vld [vmem:[%s1696_s0 + $0x38] sm:$0xff]  ;;  %1087 = vmatprep.mubr.bf16.mxu0 %v35_v48 }
 0x17b   :  { %v1151_v59 = vpop.permute.xlu0 %1150 }
 0x17c   :  { %v1153_v62 = vunpack.i.h.bf16 %v1151_v59  ;;  %v1152_v63 = vunpack.i.l.bf16 %v1151_v59 }
 0x1df   :  { %v299_v51 = vpop.permute.xlu1 %298 }
 0x1e0   :  { %v1409_v52 = vadd.f32 %v299_v51, %v284_v50 }
 0x1e2   :  { %1202 = vtanh.f32 %v1409_v52  ;;  %v1444_v36 = vmul.f32 %v1152_v63, %v1409_v52 }
 0x1e3   :  { %v301_v54 = vpop.permute.xlu1 %300 }
 0x1e4   :  { %v1412_v55 = vadd.f32 %v301_v54, %v285_v53 }
 0x1e6   :  { %1204 = vtanh.f32 %v1412_v55  ;;  %v1448_v39 = vmul.f32 %v1153_v62, %v1412_v55 }
 0x1ef   :  { %v1203_v56 = vpop.eup %1202 }
 0x1f0   :  { %310 = vrot.lane.b32.xlu1 %v1203_v56, %s1289_s24 }
 0x1f3   :  { %v1205_v57 = vpop.eup %1204 }
 0x1f4   :  { %312 = vrot.lane.b32.xlu1 %v1205_v57, %s1289_s24 }
 0x262   :  { %v311_v58 = vpop.permute.xlu1 %310 }
 0x263   :  { %v316_v60 = vmul.f32 %v1199_v44, %v311_v58 }
 0x265   :  { %v1417_v2 = vmul.f32 %v1152_v63, %v316_v60 }
 0x266   :  { %v313_v61 = vpop.permute.xlu1 %312 }
 0x267   :  { %v317_v0 = vmul.f32 %v1201_v47, %v313_v61  ;;  %v27_v47 = vld [vmem:[%s1696_s0 + $0x30] sm:$0xff] }
 0x268   :  { %v36_v51 = vpack.c.bf16 %v28_v49, %v27_v47 }
 0x269   :  { %v1419_v3 = vmul.f32 %v1153_v62, %v317_v0 }
 0x26a   :  { %1088 = vmatmul.mubr.bf16.gmra.mxu0 %v36_v51 }
 0x26b   :  { %v345_v4 = vpack.c.bf16 %v1419_v3, %v1417_v2 }
 0x26d   :  { %347 = vrot.lane.b32.xlu0 %v345_v4, %s1290_s1 }
 0x2df   :  { %v348_v6 = vpop.permute.xlu0 %347 }
 0x2e0   :  { %1108 = vmatmul.mubr.msk.bf16.vlgmr.msra.gmra.mxu1 %vm223_vm3, %v348_v6 }
 0x2e1   :  { %1112 = vmatpush3.bf16.msra.mxu1 %v1336_v5  ;;  %1115 = vmatprep.mubr.msk.bf16.mxu1 %vm1287_vm0, %v1286_v1 }
 0x2e2   :  { %1113 = vmatprep.subr.bf16.mxu1 %v1286_v1 }
 0x2e5   :  { %1114 = vmatpush3.bf16.msra.mxu1 %v1345_v7 }
 0x2e6   :  { %1119 = vmatprep.subr.bf16.mxu1 %v1286_v1 }
 0x3a0   :  { %v386_v9 = vpop.f32.mrf.mxu1 }
 0x3a1   :  { %v393_v10 = vadd.f32 %v386_v9, %v153_v8 }
 0x3a2   :  { %v1109_v11 = vpop.f32.mrf.mxu1 }
 0x3a3   :  { %1206 = vtanh.f32 %v393_v10  ;;  %v1011_v18 = vmul.f32 -1.442695, %v393_v10 }
 0x3a4   :  { %v389_v13 = vpop.f32.mrf.mxu1 }
 0x3a5   :  { %v394_v14 = vadd.f32 %v389_v13, %v156_v12 }
 0x3a6   :  { %v1110_v15 = vpop.f32.mrf.mxu1 }
 0x3a7   :  { %1208 = vtanh.f32 %v394_v14  ;;  %v1012_v19 = vmul.f32 -1.442695, %v394_v14 }
 0x3a8   :  { %1210 = vpow2.f32 %v1011_v18 }
 0x3a9   :  { %1212 = vpow2.f32 %v1012_v19 }
 0x3b0   :  { %v1207_v16 = vpop.eup %1206 }
 0x3b1   :  { %413 = vrot.lane.b32.xlu1 %v1207_v16, %s1289_s24 }
 0x3b4   :  { %v1209_v17 = vpop.eup %1208 }
 0x3b5   :  { %415 = vrot.lane.b32.xlu0 %v1209_v17, %s1289_s24  ;;  %v1211_v20 = vpop.eup %1210 }
 0x3b6   :  { %v401_v21 = vadd.f32 1.0, %v1211_v20  ;;  %v1213_v22 = vpop.eup %1212 }
 0x3b7   :  { %v402_v24 = vadd.f32 1.0, %v1213_v22 }
 0x3b8   :  { %1214 = vrcp.f32 %v401_v21 }
 0x3b9   :  { %1216 = vrcp.f32 %v402_v24 }
 0x3c5   :  { %v1215_v25 = vpop.eup %1214 }
 0x3c6   :  { %v1217_v33 = vpop.eup %1216  ;;  %v409_v37 = vmul.f32 %v1215_v25, %v1444_v36 }
 0x3c7   :  { %v410_v41 = vmul.f32 %v1217_v33, %v1448_v39 }
 0x423   :  { %v414_v26 = vpop.permute.xlu1 %413 }
 0x424   :  { %v419_v29 = vmul.f32 %v1215_v25, %v414_v26 }
 0x426   :  { %423 = vrot.lane.b32.xlu1 %v419_v29, %s1290_s1  ;;  %v1018_v29 = vsel %vm572_vm6, 1.0, %v1286_v1 }
 0x427   :  { %v416_v34 = vpop.permute.xlu0 %415 }
 0x428   :  { %v420_v35 = vmul.f32 %v1217_v33, %v416_v34 }
 0x42a   :  { %1156 = vperm.xlu1 %1154, %v1155_v30   ;;  %425 = vrot.lane.b32.xlu0 %v420_v35, %s1290_s1  ;;  %v1019_v30 = vsel %vm573_vm7, 1.0, %v1286_v1 }
 0x42b   :  { %v1160_v34 = vpack.i.bf16 %v1019_v30, %v1018_v29 }
 0x498   :  { %v424_v38 = vpop.permute.xlu1 %423 }
 0x499   :  { %v1450_v40 = vadd.f32 %v424_v38, %v409_v37 }
 0x49b   :  { %1218 = vtanh.f32 %v1450_v40 }
 0x49c   :  { %v426_v42 = vpop.permute.xlu0 %425 }
 0x49d   :  { %v1454_v43 = vadd.f32 %v426_v42, %v410_v41  ;;  %v465_v41 = vsub.f32 %v1450_v40, %v1444_v36 }
 0x49f   :  { %1220 = vtanh.f32 %v1454_v43 }
 0x4a5   :  { %v1471_v52 = vpop.permute.xlu1 %1156 }
 0x4a6   :  { %v1158_v57 = vunpack.i.l.bf16 %v1471_v52  ;;  %v1159_v59 = vunpack.i.h.bf16 %v1471_v52 }
 0x4a8   :  { %v1219_v44 = vpop.eup %1218  ;;  %v467_v42 = vmul.f32 %v1158_v57, %v465_v41 }
 0x4a9   :  { %435 = vrot.lane.b32.xlu0 %v1219_v44, %s1289_s24  ;;  %v466_v44 = vsub.f32 %v1454_v43, %v1448_v39 }
 0x4aa   :  { %v1512_v46 = vadd.f32 %v467_v42, %v1444_v36 }
 0x4ab   :  { %v468_v45 = vmul.f32 %v1159_v59, %v466_v44 }
 0x4ac   :  { %v1221_v50 = vpop.eup %1220 }
 0x4ad   :  { %437 = vrot.lane.b32.xlu1 %v1221_v50, %s1289_s24  ;;  %v1516_v49 = vadd.f32 %v468_v45, %v1448_v39 }
 0x51b   :  { %v436_v53 = vpop.permute.xlu0 %435 }
 0x51c   :  { %v441_v54 = vmul.f32 %v1215_v25, %v436_v53 }
 0x51e   :  { %v449_v55 = vsub.f32 %v441_v54, %v1417_v2 }
 0x51f   :  { %v438_v56 = vpop.permute.xlu1 %437 }
 0x520   :  { %v442_v58 = vmul.f32 %v1217_v33, %v438_v56  ;;  %v461_v60 = vmul.f32 %v1158_v57, %v449_v55 }
 0x522   :  { %v450_v61 = vsub.f32 %v442_v58, %v1419_v3  ;;  %v1478_v63 = vadd.f32 %v461_v60, %v1417_v2  ;;  %v1493_v2 = vpop.f32.mrf.mxu0 }
 0x524   :  { %v462_v62 = vmul.f32 %v1159_v59, %v450_v61 }
 0x526   :  { %v1481_v0 = vadd.f32 %v462_v62, %v1419_v3  ;;  %v160_v3 = vpop.f32.mrf.mxu0 }
 0x527   :  { %v161_v9 = vadd.f32 %v1385_v23, %v160_v3 }
 0x528   :  { %v474_v4 = vpack.c.bf16 %v1481_v0, %v1478_v63  ;;  %v1495_v8 = vpop.f32.mrf.mxu0 }
 0x52a   :  { %476 = vrot.lane.b32.xlu0 %v474_v4, %s1290_s1  ;;  %v163_v10 = vpop.f32.mrf.mxu0 }
 0x52b   :  { %v164_v14 = vadd.f32 %v1385_v23, %v163_v10 }
 0x59c   :  { %v477_v6 = vpop.permute.xlu0 %476 }
 0x59d   :  { %1116 = vmatmul.mubr.msk.bf16.vlgmr.msra.gmra.mxu1 %vm223_vm3, %v477_v6 }
 0x59e   :  { %1120 = vmatpush3.bf16.msra.mxu1 %v1336_v5  ;;  %1123 = vmatprep.mubr.msk.bf16.mxu1 %vm1287_vm0, %v1286_v1 }
 0x59f   :  { %1121 = vmatprep.subr.bf16.mxu1 %v1286_v1 }
 0x5a2   :  { %1122 = vmatpush3.bf16.msra.mxu1 %v1345_v7 }
 0x5a3   :  { %1127 = vmatprep.subr.bf16.mxu1 %v1286_v1 }
 0x65d   :  { %v515_v11 = vpop.f32.mrf.mxu1 }
 0x65e   :  { %v522_v12 = vadd.f32 %v515_v11, %v161_v9 }
 0x65f   :  { %v1117_v13 = vpop.f32.mrf.mxu1 }
 0x660   :  { %1222 = vtanh.f32 %v522_v12  ;;  %v1016_v20 = vmul.f32 -1.442695, %v522_v12  ;;  %v172_v12 = vadd.f32 %v1495_v8, %v1385_v23 }
 0x661   :  { %v518_v15 = vpop.f32.mrf.mxu1 }
 0x662   :  { %v523_v16 = vadd.f32 %v518_v15, %v164_v14 }
 0x663   :  { %v1118_v17 = vpop.f32.mrf.mxu1 }
 0x664   :  { %1224 = vtanh.f32 %v523_v16  ;;  %v1017_v21 = vmul.f32 -1.442695, %v523_v16 }
 0x665   :  { %1226 = vpow2.f32 %v1016_v20 }
 0x666   :  { %1228 = vpow2.f32 %v1017_v21 }
 0x66d   :  { %v1223_v18 = vpop.eup %1222 }
 0x66e   :  { %542 = vrot.lane.b32.xlu1 %v1223_v18, %s1289_s24 }
 0x671   :  { %v1225_v19 = vpop.eup %1224 }
 0x672   :  { %544 = vrot.lane.b32.xlu0 %v1225_v19, %s1289_s24  ;;  %v1227_v22 = vpop.eup %1226 }
 0x673   :  { %v530_v24 = vadd.f32 1.0, %v1227_v22  ;;  %v1229_v25 = vpop.eup %1228 }
 0x674   :  { %v531_v26 = vadd.f32 1.0, %v1229_v25  ;;  %v1023_v25 = vsel %vm701_vm8, 1.0, %v1286_v1 }
 0x675   :  { %1230 = vrcp.f32 %v530_v24 }
 0x676   :  { %1232 = vrcp.f32 %v531_v26  ;;  %v1024_v26 = vsel %vm702_vm9, 1.0, %v1286_v1 }
 0x682   :  { %v1231_v27 = vpop.eup %1230 }
 0x683   :  { %v1233_v35 = vpop.eup %1232  ;;  %v538_v47 = vmul.f32 %v1231_v27, %v1512_v46 }
 0x684   :  { %v539_v40 = vmul.f32 %v1233_v35, %v1516_v49 }
 0x6e0   :  { %v543_v28 = vpop.permute.xlu1 %542 }
 0x6e1   :  { %v548_v33 = vmul.f32 %v1231_v27, %v543_v28  ;;  %v1165_v28 = vpack.i.bf16 %v1024_v26, %v1023_v25 }
 0x6e3   :  { %552 = vrot.lane.b32.xlu1 %v548_v33, %s1290_s1 }
 0x6e4   :  { %v545_v37 = vpop.permute.xlu0 %544 }
 0x6e5   :  { %v549_v38 = vmul.f32 %v1233_v35, %v545_v37 }
 0x6e7   :  { %1161 = vperm.xlu1 %1154, %v1160_v34   ;;  %554 = vrot.lane.b32.xlu0 %v549_v38, %s1290_s1 }
 0x755   :  { %v553_v48 = vpop.permute.xlu1 %552 }
 0x756   :  { %v1518_v50 = vadd.f32 %v553_v48, %v538_v47 }
 0x758   :  { %1234 = vtanh.f32 %v1518_v50  ;;  %v594_v34 = vsub.f32 %v1518_v50, %v1512_v46 }
 0x759   :  { %v555_v51 = vpop.permute.xlu0 %554 }
 0x75a   :  { %v1522_v52 = vadd.f32 %v555_v51, %v539_v40 }
 0x75c   :  { %1236 = vtanh.f32 %v1522_v52  ;;  %v595_v37 = vsub.f32 %v1522_v52, %v1516_v49  ;;  %v31_v52 = vld [vmem:[%s1696_s0 + $0x50] sm:$0xff] }
 0x762   :  { %v1527_v53 = vpop.permute.xlu1 %1161 }
 0x763   :  { %v1163_v57 = vunpack.i.l.bf16 %v1527_v53  ;;  %v1164_v59 = vunpack.i.h.bf16 %v1527_v53 }
 0x765   :  { %v1235_v43 = vpop.eup %1234  ;;  %v597_v38 = vmul.f32 %v1164_v59, %v595_v37 }
 0x766   :  { %564 = vrot.lane.b32.xlu0 %v1235_v43, %s1289_s24 }
 0x767   :  { %v1570_v45 = vadd.f32 %v597_v38, %v1516_v49  ;;  %v30_v49 = vld [vmem:[%s1696_s0 + $0x48] sm:$0xff] }
 0x769   :  { %v1237_v36 = vpop.eup %1236 }
 0x76a   :  { %566 = vrot.lane.b32.xlu1 %v1237_v36, %s1289_s24  ;;  %v32_v36 = vld [vmem:[%s1696_s0 + $0x58] sm:$0xff] }
 0x7d8   :  { %v565_v39 = vpop.permute.xlu0 %564 }
 0x7d9   :  { %v570_v54 = vmul.f32 %v1231_v27, %v565_v39  ;;  %v38_v39 = vpack.c.bf16 %v32_v36, %v31_v52 }
 0x7db   :  { %v578_v55 = vsub.f32 %v570_v54, %v1478_v63 }
 0x7dc   :  { %v567_v56 = vpop.permute.xlu1 %566 }
 0x7dd   :  { %v571_v58 = vmul.f32 %v1233_v35, %v567_v56  ;;  %v590_v60 = vmul.f32 %v1163_v57, %v578_v55  ;;  %v596_v35 = vmul.f32 %v1163_v57, %v594_v34 }
 0x7df   :  { %v579_v61 = vsub.f32 %v571_v58, %v1481_v0  ;;  %v1534_v4 = vadd.f32 %v590_v60, %v1478_v63  ;;  %v169_v63 = vadd.f32 %v1493_v2, %v1385_v23  ;;  %v1566_v41 = vadd.f32 %v596_v35, %v1512_v46  ;;  %v29_v46 = vld [vmem:[%s1696_s0 + $0x40] sm:$0xff] }
 0x7e0   :  { %v37_v43 = vpack.c.bf16 %v30_v49, %v29_v46 }
 0x7e1   :  { %v591_v62 = vmul.f32 %v1164_v59, %v579_v61 }
 0x7e2   :  { %1091 = vmatprep.mubr.bf16.mxu0 %v37_v43 }
 0x7e3   :  { %v1537_v6 = vadd.f32 %v591_v62, %v1481_v0  ;;  %1092 = vmatmul.mubr.bf16.gmra.mxu0 %v38_v39 }
 0x7e5   :  { %v603_v3 = vpack.c.bf16 %v1537_v6, %v1534_v4 }
 0x7e7   :  { %605 = vrot.lane.b32.xlu0 %v603_v3, %s1290_s1 }
 0x859   :  { %v606_v9 = vpop.permute.xlu0 %605 }
 0x85a   :  { %1124 = vmatmul.mubr.msk.bf16.vlgmr.msra.gmra.mxu1 %vm223_vm3, %v606_v9 }
 0x85b   :  { %1128 = vmatpush3.bf16.msra.mxu1 %v1336_v5  ;;  %1131 = vmatprep.mubr.msk.bf16.mxu1 %vm1287_vm0, %v1286_v1 }
 0x85c   :  { %1129 = vmatprep.subr.bf16.mxu1 %v1286_v1 }
 0x85f   :  { %1130 = vmatpush3.bf16.msra.mxu1 %v1345_v7 }
 0x860   :  { %1135 = vmatprep.subr.bf16.mxu1 %v1286_v1 }
 0x91a   :  { %v644_v0 = vpop.f32.mrf.mxu1 }
 0x91b   :  { %v651_v10 = vadd.f32 %v644_v0, %v169_v63 }
 0x91c   :  { %v1125_v11 = vpop.f32.mrf.mxu1 }
 0x91d   :  { %1238 = vtanh.f32 %v651_v10  ;;  %v1021_v18 = vmul.f32 -1.442695, %v651_v10 }
 0x91e   :  { %v647_v13 = vpop.f32.mrf.mxu1 }
 0x91f   :  { %v652_v14 = vadd.f32 %v647_v13, %v172_v12 }
 0x920   :  { %v1126_v15 = vpop.f32.mrf.mxu1 }
 0x921   :  { %1240 = vtanh.f32 %v652_v14  ;;  %v1022_v2 = vmul.f32 -1.442695, %v652_v14 }
 0x922   :  { %1242 = vpow2.f32 %v1021_v18 }
 0x923   :  { %1244 = vpow2.f32 %v1022_v2 }
 0x92a   :  { %v1239_v16 = vpop.eup %1238 }
 0x92b   :  { %671 = vrot.lane.b32.xlu1 %v1239_v16, %s1289_s24 }
 0x92e   :  { %v1241_v17 = vpop.eup %1240 }
 0x92f   :  { %673 = vrot.lane.b32.xlu0 %v1241_v17, %s1289_s24  ;;  %v1243_v19 = vpop.eup %1242 }
 0x930   :  { %v659_v20 = vadd.f32 1.0, %v1243_v19  ;;  %v1245_v21 = vpop.eup %1244 }
 0x931   :  { %v660_v8 = vadd.f32 1.0, %v1245_v21 }
 0x932   :  { %1246 = vrcp.f32 %v659_v20 }
 0x933   :  { %1248 = vrcp.f32 %v660_v8 }
 0x93f   :  { %v1247_v22 = vpop.eup %1246 }
 0x940   :  { %v1249_v29 = vpop.eup %1248  ;;  %v667_v42 = vmul.f32 %v1247_v22, %v1566_v41 }
 0x941   :  { %v668_v48 = vmul.f32 %v1249_v29, %v1570_v45 }
 0x99d   :  { %v672_v24 = vpop.permute.xlu1 %671 }
 0x99e   :  { %v677_v27 = vmul.f32 %v1247_v22, %v672_v24 }
 0x9a0   :  { %681 = vrot.lane.b32.xlu1 %v677_v27, %s1290_s1 }
 0x9a1   :  { %v674_v30 = vpop.permute.xlu0 %673 }
 0x9a2   :  { %v678_v33 = vmul.f32 %v1249_v29, %v674_v30  ;;  %v1029_v30 = vsel %vm831_vm11, 1.0, %v1286_v1 }
 0x9a4   :  { %1166 = vperm.xlu1 %1154, %v1165_v28   ;;  %683 = vrot.lane.b32.xlu0 %v678_v33, %s1290_s1 }
 0xa12   :  { %v682_v44 = vpop.permute.xlu1 %681 }
 0xa13   :  { %v1572_v47 = vadd.f32 %v682_v44, %v667_v42 }
 0xa15   :  { %1250 = vtanh.f32 %v1572_v47  ;;  %v723_v42 = vsub.f32 %v1572_v47, %v1566_v41 }
 0xa16   :  { %v684_v50 = vpop.permute.xlu0 %683 }
 0xa17   :  { %v1576_v40 = vadd.f32 %v684_v50, %v668_v48 }
 0xa19   :  { %1252 = vtanh.f32 %v1576_v40  ;;  %v724_v48 = vsub.f32 %v1576_v40, %v1570_v45 }
 0xa1f   :  { %v1593_v54 = vpop.permute.xlu1 %1166 }
 0xa20   :  { %v1168_v59 = vunpack.i.l.bf16 %v1593_v54  ;;  %v1169_v61 = vunpack.i.h.bf16 %v1593_v54 }
 0xa22   :  { %v1251_v51 = vpop.eup %1250  ;;  %v725_v44 = vmul.f32 %v1168_v59, %v723_v42  ;;  %v726_v50 = vmul.f32 %v1169_v61, %v724_v48 }
 0xa23   :  { %693 = vrot.lane.b32.xlu0 %v1251_v51, %s1289_s24 }
 0xa24   :  { %v1633_v51 = vadd.f32 %v725_v44, %v1566_v41  ;;  %v1637_v52 = vadd.f32 %v726_v50, %v1570_v45 }
 0xa26   :  { %v1253_v53 = vpop.eup %1252 }
 0xa27   :  { %695 = vrot.lane.b32.xlu1 %v1253_v53, %s1289_s24 }
 0xa95   :  { %v694_v55 = vpop.permute.xlu0 %693 }
 0xa96   :  { %v699_v56 = vmul.f32 %v1247_v22, %v694_v55 }
 0xa98   :  { %v707_v57 = vsub.f32 %v699_v56, %v1534_v4 }
 0xa99   :  { %v696_v58 = vpop.permute.xlu1 %695 }
 0xa9a   :  { %v700_v60 = vmul.f32 %v1249_v29, %v696_v58  ;;  %v719_v62 = vmul.f32 %v1168_v59, %v707_v57  ;;  %v1028_v29 = vsel %vm830_vm10, 1.0, %v1286_v1 }
 0xa9b   :  { %v1170_v34 = vpack.i.bf16 %v1029_v30, %v1028_v29 }
 0xa9c   :  { %v708_v3 = vsub.f32 %v700_v60, %v1537_v6  ;;  %v1600_v63 = vadd.f32 %v719_v62, %v1534_v4  ;;  %v1614_v4 = vpop.f32.mrf.mxu0 }
 0xa9e   :  { %v720_v9 = vmul.f32 %v1169_v61, %v708_v3 }
 0xaa0   :  { %v1603_v0 = vadd.f32 %v720_v9, %v1537_v6  ;;  %v176_v6 = vpop.f32.mrf.mxu0 }
 0xaa1   :  { %v177_v13 = vadd.f32 %v1385_v23, %v176_v6  ;;  %v185_v6 = vadd.f32 %v1614_v4, %v1385_v23 }
 0xaa2   :  { %v732_v10 = vpack.c.bf16 %v1603_v0, %v1600_v63  ;;  %v1616_v12 = vpop.f32.mrf.mxu0 }
 0xaa4   :  { %734 = vrot.lane.b32.xlu0 %v732_v10, %s1290_s1  ;;  %v179_v14 = vpop.f32.mrf.mxu0 }
 0xb16   :  { %v735_v11 = vpop.permute.xlu0 %734 }
 0xb17   :  { %1132 = vmatmul.mubr.msk.bf16.vlgmr.msra.gmra.mxu1 %vm223_vm3, %v735_v11 }
 0xb18   :  { %1136 = vmatpush3.bf16.msra.mxu1 %v1336_v5  ;;  %1139 = vmatprep.mubr.msk.bf16.mxu1 %vm1287_vm0, %v1286_v1  ;;  %v180_v5 = vadd.f32 %v1385_v23, %v179_v14 }
 0xb19   :  { %1137 = vmatprep.subr.bf16.mxu1 %v1286_v1 }
 0xb1c   :  { %1138 = vmatpush3.bf16.msra.mxu1 %v1345_v7 }
 0xbd7   :  { %v773_v15 = vpop.f32.mrf.mxu1 }
 0xbd8   :  { %v780_v16 = vadd.f32 %v773_v15, %v177_v13 }
 0xbd9   :  { %v1133_v17 = vpop.f32.mrf.mxu1 }
 0xbda   :  { %1254 = vtanh.f32 %v780_v16  ;;  %v1026_v21 = vmul.f32 -1.442695, %v780_v16 }
 0xbdb   :  { %v776_v18 = vpop.f32.mrf.mxu1 }
 0xbdc   :  { %v781_v2 = vadd.f32 %v776_v18, %v180_v5 }
 0xbdd   :  { %v1134_v19 = vpop.f32.mrf.mxu1 }
 0xbde   :  { %1256 = vtanh.f32 %v781_v2  ;;  %v1027_v8 = vmul.f32 -1.442695, %v781_v2 }
 0xbdf   :  { %1258 = vpow2.f32 %v1026_v21 }
 0xbe0   :  { %1260 = vpow2.f32 %v1027_v8  ;;  %v1033_v8 = vsel %vm959_vm12, 1.0, %v1286_v1 }
 0xbe7   :  { %v1255_v20 = vpop.eup %1254 }
 0xbe8   :  { %800 = vrot.lane.b32.xlu1 %v1255_v20, %s1289_s24 }
 0xbeb   :  { %v1257_v7 = vpop.eup %1256 }
 0xbec   :  { %802 = vrot.lane.b32.xlu0 %v1257_v7, %s1289_s24  ;;  %v1259_v22 = vpop.eup %1258 }
 0xbed   :  { %v788_v24 = vadd.f32 1.0, %v1259_v22  ;;  %v1261_v25 = vpop.eup %1260  ;;  %v1034_v22 = vsel %vm960_vm13, 1.0, %v1286_v1 }
 0xbee   :  { %v789_v26 = vadd.f32 1.0, %v1261_v25  ;;  %v1175_v25 = vpack.i.bf16 %v1034_v22, %v1033_v8 }
 0xbef   :  { %1262 = vrcp.f32 %v788_v24 }
 0xbf0   :  { %1264 = vrcp.f32 %v789_v26 }
 0xbfc   :  { %v1263_v27 = vpop.eup %1262 }
 0xbfd   :  { %v1265_v35 = vpop.eup %1264  ;;  %v796_v46 = vmul.f32 %v1263_v27, %v1633_v51 }
 0xbfe   :  { %v797_v47 = vmul.f32 %v1265_v35, %v1637_v52 }
 0xc5a   :  { %v801_v28 = vpop.permute.xlu1 %800 }
 0xc5b   :  { %v806_v33 = vmul.f32 %v1263_v27, %v801_v28 }
 0xc5d   :  { %810 = vrot.lane.b32.xlu1 %v806_v33, %s1290_s1 }
 0xc5e   :  { %v803_v37 = vpop.permute.xlu0 %802 }
 0xc5f   :  { %v807_v38 = vmul.f32 %v1265_v35, %v803_v37 }
 0xc61   :  { %1171 = vperm.xlu1 %1154, %v1170_v34   ;;  %812 = vrot.lane.b32.xlu0 %v807_v38, %s1290_s1 }
 0xccf   :  { %v811_v49 = vpop.permute.xlu1 %810 }
 0xcd0   :  { %v1639_v43 = vadd.f32 %v811_v49, %v796_v46 }
 0xcd2   :  { %1266 = vtanh.f32 %v1639_v43  ;;  %v852_v31 = vsub.f32 %v1639_v43, %v1633_v51 }
 0xcd3   :  { %v813_v36 = vpop.permute.xlu0 %812 }
 0xcd4   :  { %v1643_v53 = vadd.f32 %v813_v36, %v797_v47 }
 0xcd6   :  { %1268 = vtanh.f32 %v1643_v53  ;;  %v853_v29 = vsub.f32 %v1643_v53, %v1637_v52 }
 0xcdc   :  { %v1172_v39 = vpop.permute.xlu1 %1171 }
 0xcdd   :  { %v1173_v57 = vunpack.i.l.bf16 %v1172_v39  ;;  %v1174_v59 = vunpack.i.h.bf16 %v1172_v39 }
 0xcdf   :  { %v1267_v40 = vpop.eup %1266  ;;  %v854_v32 = vmul.f32 %v1173_v57, %v852_v31  ;;  %v855_v30 = vmul.f32 %v1174_v59, %v853_v29 }
 0xce0   :  { %822 = vrot.lane.b32.xlu0 %v1267_v40, %s1289_s24 }
 0xce1   :  { %v856_v1 = vadd.f32 %v854_v32, %v1633_v51  ;;  %v857_v37 = vadd.f32 %v855_v30, %v1637_v52 }
 0xce3   :  { %v1269_v41 = vpop.eup %1268 }
 0xce4   :  { %824 = vrot.lane.b32.xlu1 %v1269_v41, %s1289_s24 }
 0xd52   :  { %v823_v45 = vpop.permute.xlu0 %822 }
 0xd53   :  { %v828_v54 = vmul.f32 %v1263_v27, %v823_v45 }
 0xd55   :  { %v836_v55 = vsub.f32 %v828_v54, %v1600_v63 }
 0xd56   :  { %v825_v56 = vpop.permute.xlu1 %824 }
 0xd57   :  { %v829_v58 = vmul.f32 %v1265_v35, %v825_v56  ;;  %v848_v60 = vmul.f32 %v1173_v57, %v836_v55 }
 0xd59   :  { %v837_v61 = vsub.f32 %v829_v58, %v1603_v0  ;;  %v1651_v3 = vadd.f32 %v848_v60, %v1600_v63  ;;  %v188_v63 = vadd.f32 %v1616_v12, %v1385_v23 }
 0xd5b   :  { %v849_v62 = vmul.f32 %v1174_v59, %v837_v61 }
 0xd5d   :  { %v1654_v9 = vadd.f32 %v849_v62, %v1603_v0 }
 0xd5f   :  { %v861_v10 = vpack.c.bf16 %v1654_v9, %v1651_v3 }
 0xd61   :  { %863 = vrot.lane.b32.xlu0 %v861_v10, %s1290_s1 }
 0xdd3   :  { %v864_v11 = vpop.permute.xlu0 %863 }
 0xdd4   :  { %1140 = vmatmul.mubr.msk.bf16.vlgmr.msra.gmra.mxu1 %vm223_vm3, %v864_v11 }
 0xe94   :  { %v902_v13 = vpop.f32.mrf.mxu1 }
 0xe95   :  { %v909_v14 = vadd.f32 %v902_v13, %v185_v6 }
 0xe96   :  { %v1141_v15 = vpop.f32.mrf.mxu1 }
 0xe97   :  { %1270 = vtanh.f32 %v909_v14  ;;  %v1031_v2 = vmul.f32 -1.442695, %v909_v14 }
 0xe98   :  { %v905_v0 = vpop.f32.mrf.mxu1 }
 0xe99   :  { %v910_v16 = vadd.f32 %v905_v0, %v188_v63 }
 0xe9a   :  { %v1142_v17 = vpop.f32.mrf.mxu1 }
 0xe9b   :  { %1272 = vtanh.f32 %v910_v16  ;;  %v1032_v4 = vmul.f32 -1.442695, %v910_v16 }
 0xe9c   :  { %1274 = vpow2.f32 %v1031_v2 }
 0xe9d   :  { %1276 = vpow2.f32 %v1032_v4 }
 0xea4   :  { %v1271_v5 = vpop.eup %1270 }
 0xea5   :  { %929 = vrot.lane.b32.xlu1 %v1271_v5, %s1289_s24 }
 0xea8   :  { %v1273_v18 = vpop.eup %1272 }
 0xea9   :  { %931 = vrot.lane.b32.xlu0 %v1273_v18, %s1289_s24  ;;  %v1275_v19 = vpop.eup %1274 }
 0xeaa   :  { %v917_v20 = vadd.f32 1.0, %v1275_v19  ;;  %v1277_v7 = vpop.eup %1276 }
 0xeab   :  { %v918_v23 = vadd.f32 1.0, %v1277_v7 }
 0xeac   :  { %1278 = vrcp.f32 %v917_v20 }
 0xead   :  { %1280 = vrcp.f32 %v918_v23 }
 0xeb9   :  { %v1279_v12 = vpop.eup %1278 }
 0xeba   :  { %v1281_v26 = vpop.eup %1280  ;;  %v925_v33 = vmul.f32 %v1279_v12, %v856_v1 }
 0xebb   :  { %v926_v38 = vmul.f32 %v1281_v26, %v857_v37 }
 0xf17   :  { %v930_v21 = vpop.permute.xlu1 %929 }
 0xf18   :  { %v935_v24 = vmul.f32 %v1279_v12, %v930_v21 }
 0xf1a   :  { %939 = vrot.lane.b32.xlu1 %v935_v24, %s1290_s1 }
 0xf1b   :  { %v932_v27 = vpop.permute.xlu0 %931 }
 0xf1c   :  { %v936_v28 = vmul.f32 %v1281_v26, %v932_v27 }
 0xf1e   :  { %1176 = vperm.xlu1 %1154, %v1175_v25   ;;  %941 = vrot.lane.b32.xlu0 %v936_v28, %s1290_s1 }
 0xf8c   :  { %v940_v34 = vpop.permute.xlu1 %939 }
 0xf8d   :  { %v945_v35 = vadd.f32 %v940_v34, %v925_v33 }
 0xf8f   :  { %1282 = vtanh.f32 %v945_v35 }
 0xf90   :  { %v942_v42 = vpop.permute.xlu0 %941 }
 0xf91   :  { %v946_v44 = vadd.f32 %v942_v42, %v926_v38 }
 0xf93   :  { %1284 = vtanh.f32 %v946_v44 }
 0xf99   :  { %v1177_v46 = vpop.permute.xlu1 %1176 }
 0xf9a   :  { %v1178_v51 = vunpack.i.l.bf16 %v1177_v46  ;;  %v1179_v40 = vunpack.i.h.bf16 %v1177_v46 }
 0xf9c   :  { %v1283_v48 = vpop.eup %1282 }
 0xf9d   :  { %951 = vrot.lane.b32.xlu0 %v1283_v48, %s1289_s24 }
 0xfa0   :  { %v1285_v50 = vpop.eup %1284 }
 0xfa1   :  { %953 = vrot.lane.b32.xlu1 %v1285_v50, %s1289_s24 }
0x100f   :  { %v952_v49 = vpop.permute.xlu0 %951 }
0x1010   :  { %v957_v43 = vmul.f32 %v1279_v12, %v952_v49 }
0x1012   :  { %v965_v47 = vsub.f32 %v957_v43, %v1651_v3 }
0x1013   :  { %v954_v36 = vpop.permute.xlu1 %953 }
0x1014   :  { %v977_v53 = vmul.f32 %v1178_v51, %v965_v47  ;;  %v958_v52 = vmul.f32 %v1281_v26, %v954_v36 }
0x1016   :  { %v966_v41 = vsub.f32 %v958_v52, %v1654_v9  ;;  %v979_v39 = vadd.f32 %v977_v53, %v1651_v3 }
0x1018   :  { %v978_v45 = vmul.f32 %v1179_v40, %v966_v41  ;;  %983 = vrot.lane.b32.xlu0 %v979_v39, %s1290_s1 }
0x101a   :  { %v980_v54 = vadd.f32 %v978_v45, %v1654_v9 }
0x101c   :  { %985 = vrot.lane.b32.xlu1 %v980_v54, %s1290_s1 }
0x108a   :  { %v984_v55 = vpop.permute.xlu0 %983 }
0x108b   :  { %989 = vst.msk [vmem:[%s1699_s5] sm:$0xff] %vm223_vm3, %v984_v55 }
0x108e   :  { %v986_v56 = vpop.permute.xlu1 %985 }
0x108f   :  { %990 = vst.msk [vmem:[%s1699_s5 + $0x8] sm:$0xff] %vm223_vm3, %v986_v56 }

// kernel: lstm_tagger_forward.3
= control target key start
LH: loop header
LB: loop body
LE: loop exit
PB: predicated region body
PF: predicated region fallthrough
CT: control target
= control target key end

     0   :  { %v2561_v1 = vmov 0   ;;  %v2562_v27 = vmov 0.0   ;;  %vm2563_vm0 = vmmov 0   ;;  %s2564_s17 = smov 64   ;;  %vm367_vm3 = vcmask 261120   ;;  %s3331_s2 = inlined_call_operand.vmem [shape: bf16[128,128], index: 2, kind: input, shape index: {}]   ;;  %s3332_s5 = inlined_call_operand.vmem [shape: bf16[128,128], index: 5, kind: input, shape index: {}]   ;;  %s3333_s0 = inlined_call_operand.vmem [shape: f32[8,8,128], index: 0, kind: input, shape index: {}]   ;;  %s3334_s6 = inlined_call_operand.vmem [shape: bf16[32,128], index: 6, kind: input, shape index: {}]   ;;  %s3335_s3 = inlined_call_operand.vmem [shape: bf16[32,128], index: 3, kind: input, shape index: {}]   ;;  %s3336_s4 = inlined_call_operand.vmem [shape: f32[1,128], index: 4, kind: input, shape index: {}]   ;;  %s3337_s7 = inlined_call_operand.vmem [shape: f32[1,128], index: 7, kind: input, shape index: {}]   ;;  %s3338_s1 = inlined_call_operand.vmem [shape: s32[8,1], index: 1, kind: input, shape index: {}]   ;;  %s3339_s8 = inlined_call_operand.vmem [shape: bf16[32,128], index: 8, kind: input, shape index: {}]   ;;  %s3340_s9 = inlined_call_operand.vmem [shape: bf16[32,128], index: 9, kind: input, shape index: {}]   ;;  %s3341_s10 = inlined_call_operand.vmem [shape: f32[1,128], index: 10, kind: input, shape index: {}]   ;;  %s3342_s11 = inlined_call_operand.vmem [shape: f32[8,8,128], index: 11, kind: output, shape index: {}]  }
   0x1   :  { %v2405_v0 = vld [vmem:[%s3331_s2 + $0x38] sm:$0xff]   ;;  %2403 = vset.pattern.permute.xlu0 %v2561_v1  ;;  %2404 = vset.pattern.permute.xlu1 %v2561_v1  ;;  %v2407_v3 = vld [vmem:[%s3331_s2 + $0x30] sm:$0xff]   ;;  %v2409_v5 = vld [vmem:[%s3331_s2 + $0x28] sm:$0xff]  }
   0x2   :  { %v2406_v2 = vld [vmem:[%s3332_s5 + $0x38] sm:$0xff]   ;;  %2198 = vmatprep.subr.bf16.mxu0 %v2405_v0  ;;  %v2408_v4 = vld [vmem:[%s3332_s5 + $0x30] sm:$0xff]   ;;  %v2410_v6 = vld [vmem:[%s3332_s5 + $0x28] sm:$0xff]  }
   0x3   :  { %2222 = vmatprep.subr.bf16.mxu1 %v2406_v2  ;;  %2199 = vmatpush3.bf16.msra.mxu0 %v2405_v0  ;;  %v2411_v7 = vld [vmem:[%s3331_s2 + $0x20] sm:$0xff]   ;;  %v2413_v9 = vld [vmem:[%s3331_s2 + $0x18] sm:$0xff]   ;;  %v2415_v11 = vld [vmem:[%s3331_s2 + $0x10] sm:$0xff]  }
   0x4   :  { %2223 = vmatpush3.bf16.msra.mxu1 %v2406_v2  ;;  %2200 = vmatprep.subr.bf16.mxu0 %v2407_v3  ;;  %v2412_v8 = vld [vmem:[%s3332_s5 + $0x20] sm:$0xff]   ;;  %v2414_v10 = vld [vmem:[%s3332_s5 + $0x18] sm:$0xff]   ;;  %v40_v13 = vld [vmem:[%s3333_s0 + $0x8] sm:$0xff] }
   0x5   :  { %2224 = vmatprep.subr.bf16.mxu1 %v2408_v4  ;;  %v39_v12 = vld [vmem:[%s3333_s0] sm:$0xff]  ;;  %v2416_v14 = vld [vmem:[%s3332_s5 + $0x10] sm:$0xff]   ;;  %v2417_v16 = vld [vmem:[%s3331_s2 + $0x8] sm:$0xff]  }
   0x6   :  { %v47_v15 = vpack.c.bf16 %v40_v13, %v39_v12  ;;  %v2418_v17 = vld [vmem:[%s3332_s5 + $0x8] sm:$0xff]   ;;  %v2419_v18 = vld [vmem:[%s3331_s2] sm:$0xff]   ;;  %v41_v20 = vld [vmem:[%s3333_s0 + $0x10] sm:$0xff] }
   0x7   :  { %2201 = vmatpush3.bf16.msra.mxu0 %v2407_v3  ;;  %v2420_v19 = vld [vmem:[%s3332_s5] sm:$0xff]   ;;  %v42_v21 = vld [vmem:[%s3333_s0 + $0x18] sm:$0xff]  ;;  %v44_v23 = vld [vmem:[%s3333_s0 + $0x28] sm:$0xff] }
   0x8   :  { %2225 = vmatpush3.bf16.msra.mxu1 %v2408_v4  ;;  %2202 = vmatprep.subr.bf16.mxu0 %v2409_v5  ;;  %v43_v22 = vld [vmem:[%s3333_s0 + $0x20] sm:$0xff]  ;;  %v48_v24 = vpack.c.bf16 %v42_v21, %v41_v20  ;;  %v2697_v26 = vld [vmem:[%s3334_s6 + $0x8] sm:$0xff]   ;;  %v45_v29 = vld [vmem:[%s3333_s0 + $0x30] sm:$0xff] }
   0x9   :  { %2226 = vmatprep.subr.bf16.mxu1 %v2410_v6  ;;  %2214 = vmatprep.mubr.bf16.mxu0 %v47_v15  ;;  %v49_v25 = vpack.c.bf16 %v44_v23, %v43_v22  ;;  %v2704_v28 = vld [vmem:[%s3335_s3 + $0x8] sm:$0xff]   ;;  %v46_v30 = vld [vmem:[%s3333_s0 + $0x38] sm:$0xff]  ;;  %v2716_v31 = vld [vmem:[%s3334_s6] sm:$0xff]  }
   0xa   :  { %2238 = vmatprep.mubr.bf16.mxu1 %v47_v15  ;;  %v2723_v32 = vld [vmem:[%s3335_s3] sm:$0xff]   ;;  %v50_v33 = vpack.c.bf16 %v46_v30, %v45_v29 }
   0xb   :  { %2203 = vmatpush3.bf16.msra.mxu0 %v2409_v5  ;;  %v2041_v34 = vld [vmem:[%s3336_s4] ss:$0 sm:$0xff] }
   0xc   :  { %2227 = vmatpush3.bf16.msra.mxu1 %v2410_v6  ;;  %2204 = vmatprep.subr.bf16.mxu0 %v2411_v7  ;;  %v2050_v35 = vld [vmem:[%s3337_s7] ss:$0 sm:$0xff] }
   0xd   :  { %2228 = vmatprep.subr.bf16.mxu1 %v2412_v8  ;;  %v2785_v15 = vld [vmem:[%s3338_s1] sm:$0xff]  ;;  %s2565_s1 = smov 32  }
   0xe   :  { %vm351_vm1 = vcmp.gt.s32.totalorder %v2785_v15, 7  ;;  %vm348_vm2 = vcmp.gt.s32.totalorder %v2785_v15, 0  ;;  %vm549_vm4 = vcmp.gt.s32.totalorder %v2785_v15, 6  ;;  %vm546_vm5 = vcmp.gt.s32.totalorder %v2785_v15, 1 }
   0xf   :  { %2205 = vmatpush3.bf16.msra.mxu0 %v2411_v7  ;;  %vm739_vm6 = vcmp.gt.s32.totalorder %v2785_v15, 5  ;;  %vm736_vm7 = vcmp.gt.s32.totalorder %v2785_v15, 2  ;;  %vm929_vm8 = vcmp.gt.s32.totalorder %v2785_v15, 4  ;;  %vm926_vm9 = vcmp.gt.s32.totalorder %v2785_v15, 3 }
  0x10   :  { %2229 = vmatpush3.bf16.msra.mxu1 %v2412_v8  ;;  %2206 = vmatprep.subr.bf16.mxu0 %v2413_v9 }
  0x11   :  { %2230 = vmatprep.subr.bf16.mxu1 %v2414_v10 }
  0x13   :  { %2207 = vmatpush3.bf16.msra.mxu0 %v2413_v9 }
  0x14   :  { %2231 = vmatpush3.bf16.msra.mxu1 %v2414_v10  ;;  %2208 = vmatprep.subr.bf16.mxu0 %v2415_v11 }
  0x15   :  { %2232 = vmatprep.subr.bf16.mxu1 %v2416_v14 }
  0x17   :  { %2209 = vmatpush3.bf16.msra.mxu0 %v2415_v11 }
  0x18   :  { %2233 = vmatpush3.bf16.msra.mxu1 %v2416_v14  ;;  %2210 = vmatprep.subr.bf16.mxu0 %v2417_v16 }
  0x19   :  { %2234 = vmatprep.subr.bf16.mxu1 %v2418_v17 }
  0x1b   :  { %2211 = vmatpush3.bf16.msra.mxu0 %v2417_v16 }
  0x1c   :  { %2235 = vmatpush3.bf16.msra.mxu1 %v2418_v17  ;;  %2212 = vmatprep.subr.bf16.mxu0 %v2419_v18  ;;  %v2060_v17 = vsel %vm351_vm1, 1.0, %v2562_v27 }
  0x1d   :  { %2236 = vmatprep.subr.bf16.mxu1 %v2420_v19 }
  0x1f   :  { %2213 = vmatpush3.bf16.msra.mxu0 %v2419_v18 }
  0x20   :  { %2237 = vmatpush3.bf16.msra.mxu1 %v2420_v19  ;;  %2246 = vmatprep.subr.bf16.mxu0 %v2562_v27 }
  0x21   :  { %2254 = vmatprep.subr.bf16.mxu1 %v2562_v27 }
  0x22   :  { %2215 = vmatmul.mubr.bf16.vlgmr.msra.gmra.mxu0 %v48_v24 }
  0x23   :  { %2239 = vmatmul.mubr.bf16.vlgmr.msra.gmra.mxu1 %v48_v24  ;;  %2218 = vmatprep.mubr.bf16.mxu0 %v49_v25 }
  0x24   :  { %2255 = vmatpush3.bf16.msra.mxu1 %v2697_v26  ;;  %2242 = vmatprep.mubr.bf16.mxu1 %v49_v25 }
  0x25   :  { %2256 = vmatprep.subr.bf16.mxu1 %v2562_v27  ;;  %2247 = vmatpush3.bf16.msra.mxu0 %v2704_v28 }
  0x26   :  { %2248 = vmatprep.subr.bf16.mxu0 %v2562_v27 }
  0x28   :  { %2257 = vmatpush3.bf16.msra.mxu1 %v2716_v31 }
  0x29   :  { %2249 = vmatpush3.bf16.msra.mxu0 %v2723_v32  ;;  %2270 = vmatprep.subr.bf16.mxu1 %v2562_v27 }
  0x2a   :  { %2219 = vmatmul.mubr.bf16.gmra.mxu0 %v50_v33  ;;  %2262 = vmatprep.subr.bf16.mxu0 %v2562_v27 }
  0x2b   :  { %2243 = vmatmul.mubr.bf16.gmra.mxu1 %v50_v33  ;;  %2250 = vmatprep.mubr.msk.bf16.mxu0 %vm2563_vm0, %v2562_v27 }
  0x2c   :  { %2258 = vmatprep.mubr.msk.bf16.mxu1 %vm2563_vm0, %v2562_v27 }
  0x32   :  { %2251 = vmatmul.mubr.bf16.vlgmr.msra.gmra.mxu0 %v2561_v1 }
  0x33   :  { %2259 = vmatmul.mubr.bf16.vlgmr.msra.gmra.mxu1 %v2561_v1  ;;  %2263 = vmatpush3.bf16.msra.mxu0 %v2704_v28 }
  0x34   :  { %2271 = vmatpush3.bf16.msra.mxu1 %v2697_v26  ;;  %2274 = vmatprep.mubr.msk.bf16.mxu1 %vm2563_vm0, %v2562_v27 }
  0x35   :  { %2272 = vmatprep.subr.bf16.mxu1 %v2562_v27  ;;  %2264 = vmatprep.subr.bf16.mxu0 %v2562_v27 }
  0x36   :  { %2266 = vmatprep.mubr.msk.bf16.mxu0 %vm2563_vm0, %v2562_v27 }
  0x37   :  { %2265 = vmatpush3.bf16.msra.mxu0 %v2723_v32 }
  0x38   :  { %2273 = vmatpush3.bf16.msra.mxu1 %v2716_v31  ;;  %2278 = vmatprep.subr.bf16.mxu0 %v2562_v27 }
  0x39   :  { %2286 = vmatprep.subr.bf16.mxu1 %v2562_v27 }
  0xe2   :  { %v2216_v36 = vpop.f32.mrf.mxu0 }
  0xe3   :  { %v2754_v37 = vadd.f32 %v2216_v36, %v2041_v34  ;;  %v2240_v38 = vpop.f32.mrf.mxu1 }
  0xe4   :  { %v2756_v39 = vadd.f32 %v2240_v38, %v2050_v35  ;;  %v156_v40 = vpop.f32.mrf.mxu0 }
  0xe5   :  { %v300_v41 = vpop.f32.mrf.mxu1  ;;  %v157_v5 = vadd.f32 %v2041_v34, %v156_v40 }
  0xe6   :  { %v2758_v42 = vadd.f32 %v2050_v35, %v300_v41  ;;  %v2217_v43 = vpop.f32.mrf.mxu0 }
  0xe7   :  { %v2760_v44 = vadd.f32 %v2217_v43, %v2041_v34  ;;  %v2241_v45 = vpop.f32.mrf.mxu1 }
  0xe8   :  { %v2762_v46 = vadd.f32 %v2241_v45, %v2050_v35  ;;  %v159_v47 = vpop.f32.mrf.mxu0 }
  0xe9   :  { %v2764_v48 = vadd.f32 %v2041_v34, %v159_v47  ;;  %v303_v49 = vpop.f32.mrf.mxu1  ;;  %v2059_v47 = vsel %vm348_vm2, 1.0, %v2562_v27 }
  0xea   :  { %v2766_v50 = vadd.f32 %v2050_v35, %v303_v49  ;;  %v2220_v51 = vpop.f32.mrf.mxu0 }
  0xeb   :  { %v2768_v52 = vadd.f32 %v2220_v51, %v2041_v34  ;;  %v2244_v53 = vpop.f32.mrf.mxu1 }
  0xec   :  { %v2770_v54 = vadd.f32 %v2244_v53, %v2050_v35  ;;  %v172_v55 = vpop.f32.mrf.mxu0 }
  0xed   :  { %v2772_v56 = vadd.f32 %v2041_v34, %v172_v55  ;;  %v316_v57 = vpop.f32.mrf.mxu1 }
  0xee   :  { %v2774_v58 = vadd.f32 %v2050_v35, %v316_v57  ;;  %v2221_v59 = vpop.f32.mrf.mxu0 }
  0xef   :  { %v2776_v60 = vadd.f32 %v2221_v59, %v2041_v34  ;;  %v2245_v61 = vpop.f32.mrf.mxu1 }
  0xf0   :  { %v175_v62 = vpop.f32.mrf.mxu0  ;;  %v328_v1 = vadd.f32 %v2245_v61, %v2050_v35 }
  0xf1   :  { %v2778_v63 = vadd.f32 %v2041_v34, %v175_v62  ;;  %v319_v0 = vpop.f32.mrf.mxu1 }
  0xf2   :  { %v2780_v2 = vadd.f32 %v2050_v35, %v319_v0  ;;  %v405_v3 = vpop.f32.mrf.mxu0 }
  0xf3   :  { %v484_v4 = vpop.f32.mrf.mxu1  ;;  %v411_v9 = vadd.f32 %v405_v3, %v157_v5 }
  0xf4   :  { %v490_v6 = vadd.f32 %v484_v4, %v328_v1  ;;  %v2252_v7 = vpop.f32.mrf.mxu0 }
  0xf5   :  { %v2260_v8 = vpop.f32.mrf.mxu1  ;;  %v2063_v19 = vmul.f32 -1.442695, %v411_v9 }
  0xf6   :  { %2429 = vtanh.f32 %v490_v6  ;;  %v408_v10 = vpop.f32.mrf.mxu0  ;;  %v2066_v18 = vmul.f32 -1.442695, %v490_v6 }
  0xf7   :  { %v487_v11 = vpop.f32.mrf.mxu1  ;;  %2431 = vtanh.f32 %v411_v9 }
  0xf8   :  { %v2253_v12 = vpop.f32.mrf.mxu0  ;;  %2433 = vpow2.f32 %v2066_v18 }
  0xf9   :  { %v2261_v13 = vpop.f32.mrf.mxu1  ;;  %2435 = vpow2.f32 %v2063_v19 }
 0x103   :  { %v2430_v14 = vpop.eup %2429 }
 0x104   :  { %500 = vrot.lane.b32.xlu0 %v2430_v14, %s2564_s17  ;;  %v2432_v16 = vpop.eup %2431 }
 0x105   :  { %v2434_v20 = vpop.eup %2433 }
 0x106   :  { %v494_v21 = vadd.f32 1.0, %v2434_v20  ;;  %v2436_v22 = vpop.eup %2435 }
 0x107   :  { %v415_v23 = vadd.f32 1.0, %v2436_v22 }
 0x108   :  { %421 = vrot.lane.b32.xlu0 %v2432_v16, %s2564_s17  ;;  %2437 = vrcp.f32 %v494_v21 }
 0x109   :  { %2439 = vrcp.f32 %v415_v23 }
 0x10c   :  { %526 = vperm.xlu0 %2403, %v2060_v17  }
 0x115   :  { %v2438_v24 = vpop.eup %2437 }
 0x116   :  { %v2440_v30 = vpop.eup %2439  ;;  %v498_v35 = vmul.f32 0.0, %v2438_v24 }
 0x117   :  { %v419_v40 = vmul.f32 0.0, %v2440_v30 }
 0x176   :  { %v501_v25 = vpop.permute.xlu0 %500 }
 0x177   :  { %v503_v29 = vmul.f32 %v2438_v24, %v501_v25 }
 0x179   :  { %505 = vrot.lane.b32.xlu1 %v503_v29, %s2565_s1  ;;  %v2068_v29 = vsel %vm549_vm4, 1.0, %v2562_v27 }
 0x17a   :  { %v422_v33 = vpop.permute.xlu0 %421 }
 0x17b   :  { %v424_v34 = vmul.f32 %v2440_v30, %v422_v33 }
 0x17d   :  { %426 = vrot.lane.b32.xlu1 %v424_v34, %s2565_s1 }
 0x187   :  { %v2803_v55 = vpop.permute.xlu0 %526 }
 0x1eb   :  { %v506_v36 = vpop.permute.xlu1 %505 }
 0x1ec   :  { %v2793_v38 = vadd.f32 %v506_v36, %v498_v35 }
 0x1ee   :  { %2441 = vtanh.f32 %v2793_v38  ;;  %v2845_v36 = vmul.f32 %v2803_v55, %v2793_v38 }
 0x1ef   :  { %v427_v41 = vpop.permute.xlu1 %426 }
 0x1f0   :  { %v2796_v43 = vadd.f32 %v427_v41, %v419_v40 }
 0x1f2   :  { %2443 = vtanh.f32 %v2796_v43 }
 0x1fb   :  { %v2442_v45 = vpop.eup %2441 }
 0x1fc   :  { %511 = vrot.lane.b32.xlu1 %v2442_v45, %s2564_s17 }
 0x1ff   :  { %v2444_v49 = vpop.eup %2443 }
 0x200   :  { %517 = vperm.xlu1 %2404, %v2059_v47   ;;  %432 = vrot.lane.b32.xlu0 %v2444_v49, %s2564_s17 }
 0x26e   :  { %v512_v51 = vpop.permute.xlu1 %511 }
 0x26f   :  { %v514_v53 = vmul.f32 %v2438_v24, %v512_v51 }
 0x271   :  { %v2806_v57 = vmul.f32 %v2803_v55, %v514_v53 }
 0x272   :  { %v433_v61 = vpop.permute.xlu0 %432 }
 0x273   :  { %v628_v59 = vpack.c.bf16 %v2806_v57, %v2806_v57  ;;  %v435_v62 = vmul.f32 %v2440_v30, %v433_v61  ;;  %v2067_v30 = vsel %vm546_vm5, 1.0, %v2562_v27 }
 0x275   :  { %630 = vrot.lane.b32.xlu1 %v628_v59, %s2565_s1 }
 0x27b   :  { %v2811_v0 = vpop.permute.xlu1 %517 }
 0x27c   :  { %v2814_v1 = vmul.f32 %v2811_v0, %v435_v62  ;;  %v2853_v47 = vmul.f32 %v2811_v0, %v2796_v43 }
 0x27e   :  { %v554_v3 = vpack.c.bf16 %v2814_v1, %v2814_v1 }
 0x280   :  { %556 = vrot.lane.b32.xlu0 %v554_v3, %s2565_s1 }
 0x2e7   :  { %v631_v4 = vpop.permute.xlu1 %630 }
 0x2e8   :  { %2275 = vmatmul.mubr.msk.bf16.vlgmr.msra.gmra.mxu1 %vm367_vm3, %v631_v4 }
 0x2e9   :  { %2287 = vmatpush3.bf16.msra.mxu1 %v2697_v26  ;;  %2290 = vmatprep.mubr.msk.bf16.mxu1 %vm2563_vm0, %v2562_v27 }
 0x2ea   :  { %2288 = vmatprep.subr.bf16.mxu1 %v2562_v27 }
 0x2ed   :  { %2289 = vmatpush3.bf16.msra.mxu1 %v2716_v31 }
 0x2ee   :  { %2302 = vmatprep.subr.bf16.mxu1 %v2562_v27 }
 0x2f2   :  { %v557_v5 = vpop.permute.xlu0 %556 }
 0x2f3   :  { %2267 = vmatmul.mubr.msk.bf16.vlgmr.msra.gmra.mxu0 %vm367_vm3, %v557_v5 }
 0x2f4   :  { %2279 = vmatpush3.bf16.msra.mxu0 %v2704_v28  ;;  %2282 = vmatprep.mubr.msk.bf16.mxu0 %vm2563_vm0, %v2562_v27 }
 0x2f5   :  { %2280 = vmatprep.subr.bf16.mxu0 %v2562_v27 }
 0x2f8   :  { %2281 = vmatpush3.bf16.msra.mxu0 %v2723_v32 }
 0x2f9   :  { %2294 = vmatprep.subr.bf16.mxu0 %v2562_v27 }
 0x3a8   :  { %v669_v6 = vpop.f32.mrf.mxu1 }
 0x3a9   :  { %v675_v7 = vadd.f32 %v669_v6, %v2770_v54 }
 0x3aa   :  { %v2276_v8 = vpop.f32.mrf.mxu1 }
 0x3ab   :  { %2445 = vtanh.f32 %v675_v7  ;;  %v2072_v19 = vmul.f32 -1.442695, %v675_v7 }
 0x3ac   :  { %v672_v9 = vpop.f32.mrf.mxu1 }
 0x3ae   :  { %v2277_v10 = vpop.f32.mrf.mxu1 }
 0x3b3   :  { %v595_v11 = vpop.f32.mrf.mxu0 }
 0x3b4   :  { %v601_v12 = vadd.f32 %v595_v11, %v2764_v48 }
 0x3b5   :  { %v2268_v13 = vpop.f32.mrf.mxu0 }
 0x3b6   :  { %2447 = vtanh.f32 %v601_v12  ;;  %v2070_v54 = vmul.f32 -1.442695, %v601_v12 }
 0x3b7   :  { %v598_v14 = vpop.f32.mrf.mxu0  ;;  %2449 = vpow2.f32 %v2072_v19 }
 0x3b8   :  { %v2446_v16 = vpop.eup %2445  ;;  %2451 = vpow2.f32 %v2070_v54 }
 0x3b9   :  { %685 = vrot.lane.b32.xlu1 %v2446_v16, %s2564_s17  ;;  %v2269_v17 = vpop.f32.mrf.mxu0 }
 0x3c3   :  { %v2448_v18 = vpop.eup %2447 }
 0x3c4   :  { %611 = vrot.lane.b32.xlu0 %v2448_v18, %s2564_s17  ;;  %v2450_v20 = vpop.eup %2449 }
 0x3c5   :  { %v679_v21 = vadd.f32 1.0, %v2450_v20  ;;  %v2452_v22 = vpop.eup %2451 }
 0x3c6   :  { %v605_v23 = vadd.f32 1.0, %v2452_v22 }
 0x3c7   :  { %2453 = vrcp.f32 %v679_v21 }
 0x3c8   :  { %2455 = vrcp.f32 %v605_v23 }
 0x3d4   :  { %v2454_v48 = vpop.eup %2453 }
 0x3d5   :  { %v2456_v33 = vpop.eup %2455  ;;  %v683_v40 = vmul.f32 %v2454_v48, %v2845_v36 }
 0x3d6   :  { %v609_v49 = vmul.f32 %v2456_v33, %v2853_v47 }
 0x42b   :  { %v686_v24 = vpop.permute.xlu1 %685 }
 0x42c   :  { %v688_v25 = vmul.f32 %v2454_v48, %v686_v24 }
 0x42e   :  { %690 = vrot.lane.b32.xlu1 %v688_v25, %s2565_s1 }
 0x432   :  { %714 = vperm.xlu1 %2404, %v2068_v29  }
 0x436   :  { %703 = vperm.xlu1 %2404, %v2067_v30   ;;  %v612_v34 = vpop.permute.xlu0 %611 }
 0x437   :  { %v614_v35 = vmul.f32 %v2456_v33, %v612_v34 }
 0x439   :  { %616 = vrot.lane.b32.xlu0 %v614_v35, %s2565_s1 }
 0x4a0   :  { %v691_v41 = vpop.permute.xlu1 %690 }
 0x4a1   :  { %v2848_v45 = vadd.f32 %v691_v41, %v683_v40 }
 0x4a3   :  { %2457 = vtanh.f32 %v2848_v45 }
 0x4ab   :  { %v617_v51 = vpop.permute.xlu0 %616 }
 0x4ac   :  { %v2856_v53 = vadd.f32 %v617_v51, %v609_v49  ;;  %v2074_v51 = vsel %vm739_vm6, 1.0, %v2562_v27 }
 0x4ad   :  { %v2862_v4 = vpop.permute.xlu1 %714 }
 0x4ae   :  { %2459 = vtanh.f32 %v2856_v53 }
 0x4b0   :  { %v2458_v38 = vpop.eup %2457 }
 0x4b1   :  { %696 = vrot.lane.b32.xlu0 %v2458_v38, %s2564_s17  ;;  %v2872_v10 = vpop.permute.xlu1 %703  ;;  %v2073_v38 = vsel %vm736_vm7, 1.0, %v2562_v27 }
 0x4bb   :  { %v2460_v59 = vpop.eup %2459 }
 0x4bc   :  { %622 = vrot.lane.b32.xlu0 %v2460_v59, %s2564_s17 }
 0x523   :  { %v697_v61 = vpop.permute.xlu0 %696 }
 0x524   :  { %v699_v62 = vmul.f32 %v2454_v48, %v697_v61 }
 0x526   :  { %v711_v3 = vsub.f32 %v699_v62, %v2806_v57 }
 0x528   :  { %v717_v43 = vmul.f32 %v2862_v4, %v711_v3  ;;  %v719_v3 = vsub.f32 %v2848_v45, %v2845_v36 }
 0x52a   :  { %v2866_v5 = vadd.f32 %v717_v43, %v2806_v57  ;;  %v720_v43 = vmul.f32 %v719_v3, %v2862_v4 }
 0x52c   :  { %v818_v6 = vpack.c.bf16 %v2866_v5, %v2866_v5 }
 0x52e   :  { %820 = vrot.lane.b32.xlu1 %v818_v6, %s2565_s1  ;;  %v623_v7 = vpop.permute.xlu0 %622  ;;  %v2909_v6 = vadd.f32 %v720_v43, %v2845_v36 }
 0x52f   :  { %v625_v8 = vmul.f32 %v2456_v33, %v623_v7 }
 0x531   :  { %v700_v9 = vsub.f32 %v625_v8, %v2814_v1 }
 0x533   :  { %v706_v11 = vmul.f32 %v2872_v10, %v700_v9 }
 0x535   :  { %v2876_v12 = vadd.f32 %v706_v11, %v2814_v1  ;;  %v708_v11 = vsub.f32 %v2856_v53, %v2853_v47 }
 0x537   :  { %v744_v13 = vpack.c.bf16 %v2876_v12, %v2876_v12 }
 0x539   :  { %746 = vrot.lane.b32.xlu0 %v744_v13, %s2565_s1  ;;  %v709_v13 = vmul.f32 %v708_v11, %v2872_v10 }
 0x5a0   :  { %v821_v14 = vpop.permute.xlu1 %820 }
 0x5a1   :  { %2291 = vmatmul.mubr.msk.bf16.vlgmr.msra.gmra.mxu1 %vm367_vm3, %v821_v14  ;;  %v2919_v14 = vadd.f32 %v709_v13, %v2853_v47 }
 0x5a2   :  { %2303 = vmatpush3.bf16.msra.mxu1 %v2697_v26  ;;  %2306 = vmatprep.mubr.msk.bf16.mxu1 %vm2563_vm0, %v2562_v27 }
 0x5a3   :  { %2304 = vmatprep.subr.bf16.mxu1 %v2562_v27 }
 0x5a6   :  { %2305 = vmatpush3.bf16.msra.mxu1 %v2716_v31 }
 0x5a7   :  { %2318 = vmatprep.subr.bf16.mxu1 %v2562_v27 }
 0x5ab   :  { %v747_v16 = vpop.permute.xlu0 %746 }
 0x5ac   :  { %2283 = vmatmul.mubr.msk.bf16.vlgmr.msra.gmra.mxu0 %vm367_vm3, %v747_v16 }
 0x5ad   :  { %2295 = vmatpush3.bf16.msra.mxu0 %v2704_v28  ;;  %2298 = vmatprep.mubr.msk.bf16.mxu0 %vm2563_vm0, %v2562_v27 }
 0x5ae   :  { %2296 = vmatprep.subr.bf16.mxu0 %v2562_v27 }
 0x5b1   :  { %2297 = vmatpush3.bf16.msra.mxu0 %v2723_v32 }
 0x5b2   :  { %2310 = vmatprep.subr.bf16.mxu0 %v2562_v27 }
 0x661   :  { %v859_v17 = vpop.f32.mrf.mxu1 }
 0x662   :  { %v865_v18 = vadd.f32 %v859_v17, %v2780_v2 }
 0x663   :  { %v2292_v19 = vpop.f32.mrf.mxu1 }
 0x664   :  { %2461 = vtanh.f32 %v865_v18  ;;  %v2078_v30 = vmul.f32 -1.442695, %v865_v18 }
 0x665   :  { %v862_v54 = vpop.f32.mrf.mxu1 }
 0x667   :  { %v2293_v20 = vpop.f32.mrf.mxu1 }
 0x66c   :  { %v785_v21 = vpop.f32.mrf.mxu0 }
 0x66d   :  { %v791_v22 = vadd.f32 %v785_v21, %v2754_v37 }
 0x66e   :  { %v2284_v23 = vpop.f32.mrf.mxu0 }
 0x66f   :  { %2463 = vtanh.f32 %v791_v22  ;;  %v2076_v2 = vmul.f32 -1.442695, %v791_v22 }
 0x670   :  { %v788_v48 = vpop.f32.mrf.mxu0  ;;  %2465 = vpow2.f32 %v2078_v30 }
 0x671   :  { %v2462_v24 = vpop.eup %2461  ;;  %2467 = vpow2.f32 %v2076_v2 }
 0x672   :  { %875 = vrot.lane.b32.xlu1 %v2462_v24, %s2564_s17  ;;  %v2285_v25 = vpop.f32.mrf.mxu0 }
 0x67c   :  { %v2464_v29 = vpop.eup %2463 }
 0x67d   :  { %801 = vrot.lane.b32.xlu0 %v2464_v29, %s2564_s17  ;;  %v2466_v33 = vpop.eup %2465 }
 0x67e   :  { %v869_v34 = vadd.f32 1.0, %v2466_v33  ;;  %v2468_v35 = vpop.eup %2467 }
 0x67f   :  { %v795_v40 = vadd.f32 1.0, %v2468_v35 }
 0x680   :  { %2469 = vrcp.f32 %v869_v34 }
 0x681   :  { %2471 = vrcp.f32 %v795_v40 }
 0x68d   :  { %v2470_v37 = vpop.eup %2469 }
 0x68e   :  { %v2472_v59 = vpop.eup %2471  ;;  %v873_v7 = vmul.f32 %v2470_v37, %v2909_v6 }
 0x68f   :  { %v799_v45 = vmul.f32 %v2472_v59, %v2919_v14 }
 0x6e4   :  { %v876_v41 = vpop.permute.xlu1 %875 }
 0x6e5   :  { %v878_v49 = vmul.f32 %v2470_v37, %v876_v41 }
 0x6e7   :  { %880 = vrot.lane.b32.xlu1 %v878_v49, %s2565_s1 }
 0x6eb   :  { %904 = vperm.xlu1 %2404, %v2074_v51  }
 0x6ef   :  { %893 = vperm.xlu1 %2404, %v2073_v38   ;;  %v802_v61 = vpop.permute.xlu0 %801 }
 0x6f0   :  { %v804_v62 = vmul.f32 %v2472_v59, %v802_v61 }
 0x6f2   :  { %806 = vrot.lane.b32.xlu0 %v804_v62, %s2565_s1 }
 0x759   :  { %v881_v8 = vpop.permute.xlu1 %880 }
 0x75a   :  { %v2912_v9 = vadd.f32 %v881_v8, %v873_v7 }
 0x75c   :  { %2473 = vtanh.f32 %v2912_v9 }
 0x764   :  { %v807_v16 = vpop.permute.xlu0 %806 }
 0x765   :  { %v2922_v36 = vadd.f32 %v807_v16, %v799_v45 }
 0x766   :  { %v2928_v20 = vpop.permute.xlu1 %904 }
 0x767   :  { %2475 = vtanh.f32 %v2922_v36 }
 0x769   :  { %v2474_v17 = vpop.eup %2473 }
 0x76a   :  { %886 = vrot.lane.b32.xlu0 %v2474_v17, %s2564_s17  ;;  %v2938_v25 = vpop.permute.xlu1 %893 }
 0x774   :  { %v2476_v18 = vpop.eup %2475 }
 0x775   :  { %812 = vrot.lane.b32.xlu0 %v2476_v18, %s2564_s17  ;;  %v2080_v18 = vsel %vm929_vm8, 1.0, %v2562_v27 }
 0x7dc   :  { %v887_v53 = vpop.permute.xlu0 %886 }
 0x7dd   :  { %v889_v19 = vmul.f32 %v2470_v37, %v887_v53  ;;  %v2079_v53 = vsel %vm926_vm9, 1.0, %v2562_v27 }
 0x7df   :  { %v901_v54 = vsub.f32 %v889_v19, %v2866_v5 }
 0x7e1   :  { %v907_v47 = vmul.f32 %v2928_v20, %v901_v54 }
 0x7e3   :  { %v2932_v21 = vadd.f32 %v907_v47, %v2866_v5 }
 0x7e5   :  { %v1008_v22 = vpack.c.bf16 %v2932_v21, %v2932_v21 }
 0x7e7   :  { %1010 = vrot.lane.b32.xlu1 %v1008_v22, %s2565_s1  ;;  %v813_v23 = vpop.permute.xlu0 %812  ;;  %v909_v22 = vsub.f32 %v2912_v9, %v2909_v6 }
 0x7e8   :  { %v815_v48 = vmul.f32 %v2472_v59, %v813_v23 }
 0x7e9   :  { %v910_v23 = vmul.f32 %v909_v22, %v2928_v20 }
 0x7ea   :  { %v890_v24 = vsub.f32 %v815_v48, %v2876_v12 }
 0x7eb   :  { %v2975_v48 = vadd.f32 %v910_v23, %v2909_v6 }
 0x7ec   :  { %v896_v29 = vmul.f32 %v2938_v25, %v890_v24 }
 0x7ee   :  { %v2942_v30 = vadd.f32 %v896_v29, %v2876_v12 }
 0x7f0   :  { %v934_v2 = vpack.c.bf16 %v2942_v30, %v2942_v30 }
 0x7f2   :  { %936 = vrot.lane.b32.xlu0 %v934_v2, %s2565_s1  ;;  %v898_v2 = vsub.f32 %v2922_v36, %v2919_v14 }
 0x859   :  { %v1011_v33 = vpop.permute.xlu1 %1010 }
 0x85a   :  { %2307 = vmatmul.mubr.msk.bf16.vlgmr.msra.gmra.mxu1 %vm367_vm3, %v1011_v33  ;;  %v899_v33 = vmul.f32 %v898_v2, %v2938_v25 }
 0x85b   :  { %2319 = vmatpush3.bf16.msra.mxu1 %v2697_v26  ;;  %2322 = vmatprep.mubr.msk.bf16.mxu1 %vm2563_vm0, %v2562_v27 }
 0x85c   :  { %2320 = vmatprep.subr.bf16.mxu1 %v2562_v27 }
 0x85f   :  { %2321 = vmatpush3.bf16.msra.mxu1 %v2716_v31 }
 0x860   :  { %2334 = vmatprep.subr.bf16.mxu1 %v2562_v27 }
 0x864   :  { %v937_v34 = vpop.permute.xlu0 %936 }
 0x865   :  { %2299 = vmatmul.mubr.msk.bf16.vlgmr.msra.gmra.mxu0 %vm367_vm3, %v937_v34  ;;  %v2985_v34 = vadd.f32 %v899_v33, %v2919_v14 }
 0x866   :  { %2311 = vmatpush3.bf16.msra.mxu0 %v2704_v28  ;;  %2314 = vmatprep.mubr.msk.bf16.mxu0 %vm2563_vm0, %v2562_v27 }
 0x867   :  { %2312 = vmatprep.subr.bf16.mxu0 %v2562_v27 }
 0x86a   :  { %2313 = vmatpush3.bf16.msra.mxu0 %v2723_v32 }
 0x86b   :  { %2326 = vmatprep.subr.bf16.mxu0 %v2562_v27 }
 0x91a   :  { %v1049_v35 = vpop.f32.mrf.mxu1 }
 0x91b   :  { %v1055_v40 = vadd.f32 %v1049_v35, %v2774_v58 }
 0x91c   :  { %v2308_v37 = vpop.f32.mrf.mxu1 }
 0x91d   :  { %2477 = vtanh.f32 %v1055_v40  ;;  %v2084_v7 = vmul.f32 -1.442695, %v1055_v40 }
 0x91e   :  { %v1052_v41 = vpop.f32.mrf.mxu1 }
 0x920   :  { %v2309_v49 = vpop.f32.mrf.mxu1 }
 0x925   :  { %v975_v51 = vpop.f32.mrf.mxu0 }
 0x926   :  { %v981_v38 = vadd.f32 %v975_v51, %v2760_v44 }
 0x927   :  { %v2300_v59 = vpop.f32.mrf.mxu0 }
 0x928   :  { %2479 = vtanh.f32 %v981_v38  ;;  %v2082_v58 = vmul.f32 -1.442695, %v981_v38 }
 0x929   :  { %v978_v61 = vpop.f32.mrf.mxu0  ;;  %2481 = vpow2.f32 %v2084_v7 }
 0x92a   :  { %v2478_v62 = vpop.eup %2477  ;;  %2483 = vpow2.f32 %v2082_v58 }
 0x92b   :  { %1065 = vrot.lane.b32.xlu1 %v2478_v62, %s2564_s17  ;;  %v2301_v3 = vpop.f32.mrf.mxu0 }
 0x935   :  { %v2480_v43 = vpop.eup %2479 }
 0x936   :  { %991 = vrot.lane.b32.xlu0 %v2480_v43, %s2564_s17  ;;  %v2482_v8 = vpop.eup %2481 }
 0x937   :  { %v1059_v11 = vadd.f32 1.0, %v2482_v8  ;;  %v2484_v13 = vpop.eup %2483 }
 0x938   :  { %v985_v45 = vadd.f32 1.0, %v2484_v13 }
 0x939   :  { %2485 = vrcp.f32 %v1059_v11 }
 0x93a   :  { %2487 = vrcp.f32 %v985_v45 }
 0x946   :  { %v2486_v44 = vpop.eup %2485 }
 0x947   :  { %v2488_v19 = vpop.eup %2487  ;;  %v1063_v24 = vmul.f32 %v2486_v44, %v2975_v48 }
 0x948   :  { %v989_v9 = vmul.f32 %v2488_v19, %v2985_v34 }
 0x99d   :  { %v1066_v16 = vpop.permute.xlu1 %1065 }
 0x99e   :  { %v1068_v17 = vmul.f32 %v2486_v44, %v1066_v16 }
 0x9a0   :  { %1070 = vrot.lane.b32.xlu1 %v1068_v17, %s2565_s1 }
 0x9a4   :  { %1094 = vperm.xlu1 %2404, %v2080_v18  }
 0x9a8   :  { %1083 = vperm.xlu1 %2404, %v2079_v53   ;;  %v992_v54 = vpop.permute.xlu0 %991 }
 0x9a9   :  { %v994_v47 = vmul.f32 %v2488_v19, %v992_v54 }
 0x9ab   :  { %996 = vrot.lane.b32.xlu0 %v994_v47, %s2565_s1 }
 0xa12   :  { %v1071_v15 = vpop.permute.xlu1 %1070 }
 0xa13   :  { %v2978_v29 = vadd.f32 %v1071_v15, %v1063_v24 }
 0xa15   :  { %2489 = vtanh.f32 %v2978_v29 }
 0xa1d   :  { %v997_v35 = vpop.permute.xlu0 %996 }
 0xa1e   :  { %v2988_v6 = vadd.f32 %v997_v35, %v989_v9 }
 0xa1f   :  { %v2994_v51 = vpop.permute.xlu1 %1094 }
 0xa20   :  { %2491 = vtanh.f32 %v2988_v6 }
 0xa22   :  { %v2490_v40 = vpop.eup %2489 }
 0xa23   :  { %1076 = vrot.lane.b32.xlu0 %v2490_v40, %s2564_s17  ;;  %v3004_v43 = vpop.permute.xlu1 %1083 }
 0xa2d   :  { %v2492_v37 = vpop.eup %2491 }
 0xa2e   :  { %1002 = vrot.lane.b32.xlu0 %v2492_v37, %s2564_s17 }
 0xa95   :  { %v1077_v36 = vpop.permute.xlu0 %1076 }
 0xa96   :  { %v1079_v41 = vmul.f32 %v2486_v44, %v1077_v36 }
 0xa98   :  { %v1091_v49 = vsub.f32 %v1079_v41, %v2932_v21 }
 0xa9a   :  { %v1097_v14 = vmul.f32 %v2994_v51, %v1091_v49 }
 0xa9c   :  { %v2998_v38 = vadd.f32 %v1097_v14, %v2932_v21  ;;  %v1099_v14 = vsub.f32 %v2978_v29, %v2975_v48 }
 0xa9e   :  { %v1192_v59 = vpack.c.bf16 %v2998_v38, %v2998_v38 }
 0xaa0   :  { %1194 = vrot.lane.b32.xlu1 %v1192_v59, %s2565_s1  ;;  %v1003_v61 = vpop.permute.xlu0 %1002  ;;  %v1100_v59 = vmul.f32 %v1099_v14, %v2994_v51 }
 0xaa1   :  { %v1005_v62 = vmul.f32 %v2488_v19, %v1003_v61 }
 0xaa2   :  { %v3037_v61 = vadd.f32 %v1100_v59, %v2975_v48 }
 0xaa3   :  { %v1080_v3 = vsub.f32 %v1005_v62, %v2942_v30 }
 0xaa5   :  { %v1086_v7 = vmul.f32 %v3004_v43, %v1080_v3 }
 0xaa7   :  { %v3008_v58 = vadd.f32 %v1086_v7, %v2942_v30 }
 0xaa9   :  { %v1118_v8 = vpack.c.bf16 %v3008_v58, %v3008_v58 }
 0xaab   :  { %1120 = vrot.lane.b32.xlu0 %v1118_v8, %s2565_s1  ;;  %v1088_v8 = vsub.f32 %v2988_v6, %v2985_v34 }
 0xb12   :  { %v1195_v11 = vpop.permute.xlu1 %1194 }
 0xb13   :  { %2323 = vmatmul.mubr.msk.bf16.vlgmr.msra.gmra.mxu1 %vm367_vm3, %v1195_v11  ;;  %v1089_v11 = vmul.f32 %v1088_v8, %v3004_v43 }
 0xb14   :  { %2335 = vmatpush3.bf16.msra.mxu1 %v2697_v26  ;;  %2338 = vmatprep.mubr.msk.bf16.mxu1 %vm2563_vm0, %v2562_v27 }
 0xb15   :  { %2336 = vmatprep.subr.bf16.mxu1 %v2562_v27 }
 0xb18   :  { %2337 = vmatpush3.bf16.msra.mxu1 %v2716_v31 }
 0xb19   :  { %2350 = vmatprep.subr.bf16.mxu1 %v2562_v27 }
 0xb1d   :  { %v1121_v13 = vpop.permute.xlu0 %1120 }
 0xb1e   :  { %2315 = vmatmul.mubr.msk.bf16.vlgmr.msra.gmra.mxu0 %vm367_vm3, %v1121_v13  ;;  %v3047_v13 = vadd.f32 %v1089_v11, %v2985_v34 }
 0xb1f   :  { %2327 = vmatpush3.bf16.msra.mxu0 %v2704_v28  ;;  %2330 = vmatprep.mubr.msk.bf16.mxu0 %vm2563_vm0, %v2562_v27 }
 0xb20   :  { %2328 = vmatprep.subr.bf16.mxu0 %v2562_v27 }
 0xb23   :  { %2329 = vmatpush3.bf16.msra.mxu0 %v2723_v32 }
 0xb24   :  { %2342 = vmatprep.subr.bf16.mxu0 %v2562_v27 }
 0xbd3   :  { %v1233_v45 = vpop.f32.mrf.mxu1 }
 0xbd4   :  { %v1239_v44 = vadd.f32 %v1233_v45, %v2762_v46 }
 0xbd5   :  { %v2324_v16 = vpop.f32.mrf.mxu1 }
 0xbd6   :  { %2493 = vtanh.f32 %v1239_v44  ;;  %v2088_v15 = vmul.f32 -1.442695, %v1239_v44 }
 0xbd7   :  { %v1236_v17 = vpop.f32.mrf.mxu1 }
 0xbd9   :  { %v2325_v18 = vpop.f32.mrf.mxu1 }
 0xbde   :  { %v1159_v53 = vpop.f32.mrf.mxu0 }
 0xbdf   :  { %v1165_v19 = vadd.f32 %v1159_v53, %v2772_v56 }
 0xbe0   :  { %v2316_v54 = vpop.f32.mrf.mxu0 }
 0xbe1   :  { %2495 = vtanh.f32 %v1165_v19  ;;  %v2086_v46 = vmul.f32 -1.442695, %v1165_v19 }
 0xbe2   :  { %v1162_v47 = vpop.f32.mrf.mxu0  ;;  %2497 = vpow2.f32 %v2088_v15 }
 0xbe3   :  { %v2494_v22 = vpop.eup %2493  ;;  %2499 = vpow2.f32 %v2086_v46 }
 0xbe4   :  { %1249 = vrot.lane.b32.xlu1 %v2494_v22, %s2564_s17  ;;  %v2317_v23 = vpop.f32.mrf.mxu0 }
 0xbee   :  { %v2496_v24 = vpop.eup %2495 }
 0xbef   :  { %1175 = vrot.lane.b32.xlu0 %v2496_v24, %s2564_s17  ;;  %v2498_v2 = vpop.eup %2497 }
 0xbf0   :  { %v1243_v33 = vadd.f32 1.0, %v2498_v2  ;;  %v2500_v9 = vpop.eup %2499 }
 0xbf1   :  { %v1169_v35 = vadd.f32 1.0, %v2500_v9 }
 0xbf2   :  { %2501 = vrcp.f32 %v1243_v33 }
 0xbf3   :  { %2503 = vrcp.f32 %v1169_v35 }
 0xbff   :  { %v2502_v56 = vpop.eup %2501 }
 0xc00   :  { %v2504_v36 = vpop.eup %2503  ;;  %v1247_v62 = vmul.f32 %v2502_v56, %v3037_v61 }
 0xc01   :  { %v1173_v29 = vmul.f32 %v2504_v36, %v3047_v13 }
 0xc56   :  { %v1250_v40 = vpop.permute.xlu1 %1249 }
 0xc57   :  { %v1252_v37 = vmul.f32 %v2502_v56, %v1250_v40 }
 0xc59   :  { %1254 = vrot.lane.b32.xlu1 %v1252_v37, %s2565_s1 }
 0xc61   :  { %v1176_v41 = vpop.permute.xlu0 %1175 }
 0xc62   :  { %v1178_v49 = vmul.f32 %v2504_v36, %v1176_v41 }
 0xc64   :  { %1180 = vrot.lane.b32.xlu0 %v1178_v49, %s2565_s1 }
 0xccb   :  { %v1255_v3 = vpop.permute.xlu1 %1254 }
 0xccc   :  { %v3040_v7 = vadd.f32 %v1255_v3, %v1247_v62 }
 0xcce   :  { %2505 = vtanh.f32 %v3040_v7 }
 0xcd6   :  { %v1181_v45 = vpop.permute.xlu0 %1180 }
 0xcd7   :  { %v3050_v48 = vadd.f32 %v1181_v45, %v1173_v29 }
 0xcd9   :  { %2507 = vtanh.f32 %v3050_v48 }
 0xcdb   :  { %v2506_v44 = vpop.eup %2505 }
 0xcdc   :  { %1260 = vrot.lane.b32.xlu1 %v2506_v44, %s2564_s17 }
 0xce6   :  { %v2508_v16 = vpop.eup %2507 }
 0xce7   :  { %1186 = vrot.lane.b32.xlu0 %v2508_v16, %s2564_s17  ;;  %v1273_v16 = vsub.f32 %v3040_v7, %v3037_v61 }
 0xd4e   :  { %v1261_v6 = vpop.permute.xlu1 %1260 }
 0xd4f   :  { %v1263_v17 = vmul.f32 %v2502_v56, %v1261_v6  ;;  %v1274_v6 = vmul.f32 %v1273_v16, %v3004_v43 }
 0xd51   :  { %v1270_v18 = vsub.f32 %v1263_v17, %v2998_v38  ;;  %v3095_v17 = vadd.f32 %v1274_v6, %v3037_v61 }
 0xd53   :  { %v1271_v34 = vmul.f32 %v1270_v18, %v3004_v43 }
 0xd55   :  { %v3058_v53 = vadd.f32 %v1271_v34, %v2998_v38  ;;  %v1267_v34 = vsub.f32 %v3050_v48, %v3047_v13 }
 0xd57   :  { %v1366_v19 = vpack.c.bf16 %v3058_v53, %v3058_v53 }
 0xd59   :  { %1368 = vrot.lane.b32.xlu1 %v1366_v19, %s2565_s1  ;;  %v1187_v54 = vpop.permute.xlu0 %1186 }
 0xd5a   :  { %v1189_v47 = vmul.f32 %v2504_v36, %v1187_v54 }
 0xd5c   :  { %v1264_v22 = vsub.f32 %v1189_v47, %v3008_v58  ;;  %v1268_v47 = vmul.f32 %v1267_v34, %v2994_v51 }
 0xd5e   :  { %v1265_v23 = vmul.f32 %v1264_v22, %v2994_v51  ;;  %v3105_v22 = vadd.f32 %v1268_v47, %v3047_v13 }
 0xd60   :  { %v3066_v24 = vadd.f32 %v1265_v23, %v3008_v58 }
 0xd62   :  { %v1292_v15 = vpack.c.bf16 %v3066_v24, %v3066_v24 }
 0xd64   :  { %1294 = vrot.lane.b32.xlu0 %v1292_v15, %s2565_s1 }
 0xdcb   :  { %v1369_v46 = vpop.permute.xlu1 %1368 }
 0xdcc   :  { %2339 = vmatmul.mubr.msk.bf16.vlgmr.msra.gmra.mxu1 %vm367_vm3, %v1369_v46 }
 0xdcd   :  { %2351 = vmatpush3.bf16.msra.mxu1 %v2697_v26  ;;  %2354 = vmatprep.mubr.msk.bf16.mxu1 %vm2563_vm0, %v2562_v27 }
 0xdce   :  { %2352 = vmatprep.subr.bf16.mxu1 %v2562_v27 }
 0xdd1   :  { %2353 = vmatpush3.bf16.msra.mxu1 %v2716_v31 }
 0xdd2   :  { %2366 = vmatprep.subr.bf16.mxu1 %v2562_v27 }
 0xdd6   :  { %v1295_v2 = vpop.permute.xlu0 %1294 }
 0xdd7   :  { %2331 = vmatmul.mubr.msk.bf16.vlgmr.msra.gmra.mxu0 %vm367_vm3, %v1295_v2 }
 0xdd8   :  { %2343 = vmatpush3.bf16.msra.mxu0 %v2704_v28  ;;  %2346 = vmatprep.mubr.msk.bf16.mxu0 %vm2563_vm0, %v2562_v27 }
 0xdd9   :  { %2344 = vmatprep.subr.bf16.mxu0 %v2562_v27 }
 0xddc   :  { %2345 = vmatpush3.bf16.msra.mxu0 %v2723_v32 }
 0xddd   :  { %2358 = vmatprep.subr.bf16.mxu0 %v2562_v27 }
 0xe8c   :  { %v1407_v26 = vpop.f32.mrf.mxu1 }
 0xe8d   :  { %v1413_v33 = vadd.f32 %v1407_v26, %v2756_v39 }
 0xe8e   :  { %v2340_v31 = vpop.f32.mrf.mxu1 }
 0xe8f   :  { %2509 = vtanh.f32 %v1413_v33  ;;  %v2092_v49 = vmul.f32 -1.442695, %v1413_v33 }
 0xe90   :  { %v1410_v9 = vpop.f32.mrf.mxu1 }
 0xe92   :  { %v2341_v35 = vpop.f32.mrf.mxu1 }
 0xe97   :  { %v1333_v56 = vpop.f32.mrf.mxu0 }
 0xe98   :  { %v1339_v40 = vadd.f32 %v1333_v56, %v2778_v63 }
 0xe99   :  { %v2332_v28 = vpop.f32.mrf.mxu0 }
 0xe9a   :  { %2511 = vtanh.f32 %v1339_v40  ;;  %v2090_v39 = vmul.f32 -1.442695, %v1339_v40 }
 0xe9b   :  { %v1336_v37 = vpop.f32.mrf.mxu0  ;;  %2513 = vpow2.f32 %v2092_v49 }
 0xe9c   :  { %v2510_v36 = vpop.eup %2509  ;;  %2515 = vpow2.f32 %v2090_v39  ;;  %v2559_v39 = vld [vmem:[%s3335_s3 + $0x8] sm:$0xff]  }
 0xe9d   :  { %1423 = vrot.lane.b32.xlu1 %v2510_v36, %s2564_s17  ;;  %v2333_v41 = vpop.f32.mrf.mxu0 }
 0xe9e   :  { %v2557_v41 = vld [vmem:[%s3334_s6 + $0x8] sm:$0xff]  }
 0xea7   :  { %v2512_v32 = vpop.eup %2511 }
 0xea8   :  { %1349 = vrot.lane.b32.xlu0 %v2512_v32, %s2564_s17  ;;  %v2514_v14 = vpop.eup %2513  ;;  %v2558_v32 = vld [vmem:[%s3334_s6] sm:$0xff]  }
 0xea9   :  { %v1417_v59 = vadd.f32 1.0, %v2514_v14  ;;  %v2516_v62 = vpop.eup %2515  ;;  %v2560_v14 = vld [vmem:[%s3335_s3] sm:$0xff]  }
 0xeaa   :  { %v1343_v3 = vadd.f32 1.0, %v2516_v62 }
 0xeab   :  { %2517 = vrcp.f32 %v1417_v59 }
 0xeac   :  { %2519 = vrcp.f32 %v1343_v3 }
 0xeb8   :  { %v2518_v63 = vpop.eup %2517 }
 0xeb9   :  { %v2520_v29 = vpop.eup %2519  ;;  %v1421_v18 = vmul.f32 %v2518_v63, %v3095_v17 }
 0xeba   :  { %v1347_v7 = vmul.f32 %v2520_v29, %v3105_v22 }
 0xf0f   :  { %v1424_v8 = vpop.permute.xlu1 %1423 }
 0xf10   :  { %v1426_v11 = vmul.f32 %v2518_v63, %v1424_v8 }
 0xf12   :  { %1428 = vrot.lane.b32.xlu1 %v1426_v11, %s2565_s1 }
 0xf1a   :  { %v1350_v45 = vpop.permute.xlu0 %1349 }
 0xf1b   :  { %v1352_v44 = vmul.f32 %v2520_v29, %v1350_v45 }
 0xf1d   :  { %1354 = vrot.lane.b32.xlu0 %v1352_v44, %s2565_s1 }
 0xf84   :  { %v1429_v19 = vpop.permute.xlu1 %1428 }
 0xf85   :  { %v3100_v54 = vadd.f32 %v1429_v19, %v1421_v18 }
 0xf87   :  { %2521 = vtanh.f32 %v3100_v54 }
 0xf8f   :  { %v1355_v23 = vpop.permute.xlu0 %1354 }
 0xf90   :  { %v3108_v61 = vadd.f32 %v1355_v23, %v1347_v7 }
 0xf92   :  { %2523 = vtanh.f32 %v3108_v61 }
 0xf94   :  { %v2522_v15 = vpop.eup %2521 }
 0xf95   :  { %1434 = vrot.lane.b32.xlu1 %v2522_v15, %s2564_s17 }
 0xf9f   :  { %v2524_v48 = vpop.eup %2523 }
 0xfa0   :  { %1360 = vrot.lane.b32.xlu0 %v2524_v48, %s2564_s17 }
0x1007   :  { %v1435_v46 = vpop.permute.xlu1 %1434 }
0x1008   :  { %v1437_v2 = vmul.f32 %v2518_v63, %v1435_v46 }
0x100a   :  { %v1444_v26 = vsub.f32 %v1437_v2, %v3058_v53 }
0x100c   :  { %v1445_v13 = vmul.f32 %v1444_v26, %v2938_v25  ;;  %v1447_v26 = vsub.f32 %v3100_v54, %v3095_v17 }
0x100e   :  { %v3116_v33 = vadd.f32 %v1445_v13, %v3058_v53  ;;  %v1448_v13 = vmul.f32 %v1447_v26, %v2938_v25 }
0x1010   :  { %v1540_v31 = vpack.c.bf16 %v3116_v33, %v3116_v33 }
0x1012   :  { %1542 = vrot.lane.b32.xlu1 %v1540_v31, %s2565_s1  ;;  %v1361_v9 = vpop.permute.xlu0 %1360  ;;  %v3159_v31 = vadd.f32 %v1448_v13, %v3095_v17 }
0x1013   :  { %v1363_v35 = vmul.f32 %v2520_v29, %v1361_v9 }
0x1015   :  { %v1438_v56 = vsub.f32 %v1363_v35, %v3066_v24  ;;  %v1441_v35 = vsub.f32 %v3108_v61, %v3105_v22 }
0x1017   :  { %v1439_v40 = vmul.f32 %v1438_v56, %v2928_v20 }
0x1019   :  { %v3124_v28 = vadd.f32 %v1439_v40, %v3066_v24 }
0x101b   :  { %v1466_v37 = vpack.c.bf16 %v3124_v28, %v3124_v28 }
0x101d   :  { %1468 = vrot.lane.b32.xlu0 %v1466_v37, %s2565_s1  ;;  %v1442_v37 = vmul.f32 %v1441_v35, %v2928_v20 }
0x1084   :  { %v1543_v36 = vpop.permute.xlu1 %1542 }
0x1085   :  { %2355 = vmatmul.mubr.msk.bf16.vlgmr.msra.gmra.mxu1 %vm367_vm3, %v1543_v36  ;;  %v3169_v36 = vadd.f32 %v1442_v37, %v3105_v22 }
0x1086   :  { %2367 = vmatpush3.bf16.msra.mxu1 %v2557_v41  ;;  %2370 = vmatprep.mubr.msk.bf16.mxu1 %vm2563_vm0, %v2562_v27 }
0x1087   :  { %2368 = vmatprep.subr.bf16.mxu1 %v2562_v27 }
0x108a   :  { %2369 = vmatpush3.bf16.msra.mxu1 %v2558_v32 }
0x108f   :  { %v1469_v49 = vpop.permute.xlu0 %1468 }
0x1090   :  { %2347 = vmatmul.mubr.msk.bf16.vlgmr.msra.gmra.mxu0 %vm367_vm3, %v1469_v49 }
0x1091   :  { %2359 = vmatpush3.bf16.msra.mxu0 %v2559_v39  ;;  %2362 = vmatprep.mubr.msk.bf16.mxu0 %vm2563_vm0, %v2562_v27 }
0x1092   :  { %2360 = vmatprep.subr.bf16.mxu0 %v2562_v27 }
0x1095   :  { %2361 = vmatpush3.bf16.msra.mxu0 %v2560_v14 }
0x1145   :  { %v1581_v59 = vpop.f32.mrf.mxu1 }
0x1146   :  { %v1587_v62 = vadd.f32 %v1581_v59, %v2766_v50 }
0x1147   :  { %v2356_v3 = vpop.f32.mrf.mxu1 }
0x1148   :  { %2525 = vtanh.f32 %v1587_v62  ;;  %v2096_v18 = vmul.f32 -1.442695, %v1587_v62 }
0x1149   :  { %v1584_v63 = vpop.f32.mrf.mxu1 }
0x114b   :  { %v2357_v8 = vpop.f32.mrf.mxu1 }
0x1150   :  { %v1507_v11 = vpop.f32.mrf.mxu0 }
0x1151   :  { %v1513_v29 = vadd.f32 %v1507_v11, %v2768_v52 }
0x1152   :  { %v2348_v45 = vpop.f32.mrf.mxu0 }
0x1153   :  { %2527 = vtanh.f32 %v1513_v29  ;;  %v2094_v50 = vmul.f32 -1.442695, %v1513_v29 }
0x1154   :  { %v1510_v44 = vpop.f32.mrf.mxu0  ;;  %2529 = vpow2.f32 %v2096_v18 }
0x1155   :  { %v2526_v16 = vpop.eup %2525  ;;  %2531 = vpow2.f32 %v2094_v50 }
0x1156   :  { %1597 = vrot.lane.b32.xlu1 %v2526_v16, %s2564_s17  ;;  %v2349_v27 = vpop.f32.mrf.mxu0 }
0x1160   :  { %v2528_v6 = vpop.eup %2527 }
0x1161   :  { %1523 = vrot.lane.b32.xlu0 %v2528_v6, %s2564_s17  ;;  %v2530_v34 = vpop.eup %2529 }
0x1162   :  { %v1591_v19 = vadd.f32 1.0, %v2530_v34  ;;  %v2532_v47 = vpop.eup %2531 }
0x1163   :  { %v1517_v7 = vadd.f32 1.0, %v2532_v47 }
0x1164   :  { %2533 = vrcp.f32 %v1591_v19 }
0x1165   :  { %2535 = vrcp.f32 %v1517_v7 }
0x1171   :  { %v2534_v52 = vpop.eup %2533 }
0x1172   :  { %v2536_v48 = vpop.eup %2535  ;;  %v1595_v9 = vmul.f32 %v2534_v52, %v3159_v31 }
0x1173   :  { %v1521_v54 = vmul.f32 %v2536_v48, %v3169_v36 }
0x11c8   :  { %v1598_v23 = vpop.permute.xlu1 %1597 }
0x11c9   :  { %v1600_v15 = vmul.f32 %v2534_v52, %v1598_v23 }
0x11cb   :  { %1602 = vrot.lane.b32.xlu1 %v1600_v15, %s2565_s1 }
0x11d3   :  { %v1524_v46 = vpop.permute.xlu0 %1523 }
0x11d4   :  { %v1526_v2 = vmul.f32 %v2536_v48, %v1524_v46 }
0x11d6   :  { %1528 = vrot.lane.b32.xlu0 %v1526_v2, %s2565_s1 }
0x123d   :  { %v1603_v56 = vpop.permute.xlu1 %1602 }
0x123e   :  { %v3164_v40 = vadd.f32 %v1603_v56, %v1595_v9 }
0x1240   :  { %2537 = vtanh.f32 %v3164_v40 }
0x1248   :  { %v1529_v41 = vpop.permute.xlu0 %1528 }
0x1249   :  { %v3172_v17 = vadd.f32 %v1529_v41, %v1521_v54 }
0x124b   :  { %2539 = vtanh.f32 %v3172_v17 }
0x124d   :  { %v2538_v32 = vpop.eup %2537 }
0x124e   :  { %1608 = vrot.lane.b32.xlu1 %v2538_v32, %s2564_s17  ;;  %v1621_v32 = vsub.f32 %v3164_v40, %v3159_v31 }
0x1258   :  { %v2540_v61 = vpop.eup %2539 }
0x1259   :  { %1534 = vrot.lane.b32.xlu0 %v2540_v61, %s2564_s17  ;;  %v1622_v61 = vmul.f32 %v1621_v32, %v2872_v10 }
0x12c0   :  { %v1609_v49 = vpop.permute.xlu1 %1608 }
0x12c1   :  { %v1611_v39 = vmul.f32 %v2534_v52, %v1609_v49  ;;  %v1623_v49 = vadd.f32 %v1622_v61, %v3159_v31  ;;  %v533_v31 = vmul.f32 %v2814_v1, %v2811_v0  ;;  %v2426_v1 = vld [vmem:[%s3339_s8] sm:$0xff]  }
0x12c3   :  { %v1618_v14 = vsub.f32 %v1611_v39, %v3116_v33 }
0x12c5   :  { %v1619_v22 = vmul.f32 %v1618_v14, %v2872_v10  ;;  %v1615_v14 = vsub.f32 %v3172_v17, %v3169_v36 }
0x12c7   :  { %v3180_v59 = vadd.f32 %v1619_v22, %v3116_v33 }
0x12c9   :  { %v1713_v62 = vpack.c.bf16 %v3180_v59, %v3180_v59  ;;  %v1631_v17 = vmul.f32 %v3180_v59, %v2872_v10 }
0x12cb   :  { %1715 = vrot.lane.b32.xlu1 %v1713_v62, %s2565_s1  ;;  %v1535_v3 = vpop.permute.xlu0 %1534 }
0x12cc   :  { %v1537_v63 = vmul.f32 %v2536_v48, %v1535_v3  ;;  %v1616_v3 = vmul.f32 %v1615_v14, %v2862_v4 }
0x12ce   :  { %v1612_v8 = vsub.f32 %v1537_v63, %v3124_v28  ;;  %v1617_v63 = vadd.f32 %v1616_v3, %v3169_v36  ;;  %v2425_v36 = vld [vmem:[%s3339_s8 + $0x8] sm:$0xff]  }
0x12cf   :  { %2386 = vmatprep.subr.bf16.mxu1 %v2425_v36 }
0x12d0   :  { %v1613_v11 = vmul.f32 %v1612_v8, %v2862_v4 }
0x12d2   :  { %v3188_v29 = vadd.f32 %v1613_v11, %v3124_v28 }
0x12d4   :  { %v1640_v45 = vpack.c.bf16 %v3188_v29, %v3188_v29 }
0x12d6   :  { %1642 = vrot.lane.b32.xlu0 %v1640_v45, %s2565_s1 }
0x133d   :  { %v1716_v44 = vpop.permute.xlu1 %1715 }
0x133e   :  { %2371 = vmatmul.mubr.msk.bf16.vlgmr.msra.gmra.mxu1 %vm367_vm3, %v1716_v44 }
0x133f   :  { %2387 = vmatpush3.bf16.msra.mxu1 %v2425_v36 }
0x1340   :  { %2388 = vmatprep.subr.bf16.mxu1 %v2426_v1 }
0x1343   :  { %2389 = vmatpush3.bf16.msra.mxu1 %v2426_v1 }
0x1348   :  { %v1643_v16 = vpop.permute.xlu0 %1642 }
0x1349   :  { %2363 = vmatmul.mubr.msk.bf16.vlgmr.msra.gmra.mxu0 %vm367_vm3, %v1643_v16  ;;  %v912_v16 = vmul.f32 %v2942_v30, %v2938_v25  ;;  %v1102_v30 = vmul.f32 %v3008_v58, %v3004_v43  ;;  %v2427_v58 = vld [vmem:[%s3340_s9 + $0x8] sm:$0xff]  }
0x134a   :  { %2374 = vmatprep.subr.bf16.mxu0 %v2427_v58 }
0x134b   :  { %2375 = vmatpush3.bf16.msra.mxu0 %v2427_v58 }
0x13fe   :  { %v1754_v27 = vpop.f32.mrf.mxu1 }
0x13ff   :  { %v1760_v6 = vadd.f32 %v1754_v27, %v2758_v42  ;;  %v722_v27 = vmul.f32 %v2876_v12, %v2872_v10  ;;  %v1457_v10 = vmul.f32 %v3116_v33, %v2938_v25  ;;  %v1276_v12 = vmul.f32 %v3066_v24, %v2994_v51 }
0x1400   :  { %v2372_v18 = vpop.f32.mrf.mxu1  ;;  %v1624_v25 = vmul.f32 %v3188_v29, %v2862_v4 }
0x1401   :  { %2541 = vtanh.f32 %v1760_v6  ;;  %v2100_v46 = vmul.f32 -1.442695, %v1760_v6  ;;  %v1283_v6 = vmul.f32 %v3058_v53, %v3004_v43  ;;  %v919_v18 = vmul.f32 %v2932_v21, %v2928_v20 }
0x1402   :  { %v1757_v50 = vpop.f32.mrf.mxu1  ;;  %v1109_v43 = vmul.f32 %v2998_v38, %v2994_v51  ;;  %v539_v21 = vmul.f32 %v2806_v57, %v2803_v55  ;;  %v2428_v57 = vld [vmem:[%s3340_s9] sm:$0xff]  }
0x1403   :  { %2376 = vmatprep.subr.bf16.mxu0 %v2428_v57 }
0x1404   :  { %v2373_v34 = vpop.f32.mrf.mxu1  ;;  %2377 = vmatpush3.bf16.msra.mxu0 %v2428_v57 }
0x1409   :  { %v1681_v19 = vpop.f32.mrf.mxu0 }
0x140a   :  { %v1687_v47 = vadd.f32 %v1681_v19, %v2776_v60 }
0x140b   :  { %v2364_v7 = vpop.f32.mrf.mxu0 }
0x140c   :  { %2543 = vtanh.f32 %v1687_v47  ;;  %v2098_v42 = vmul.f32 -1.442695, %v1687_v47 }
0x140d   :  { %v1684_v52 = vpop.f32.mrf.mxu0  ;;  %2545 = vpow2.f32 %v2100_v46  ;;  %v729_v46 = vmul.f32 %v2866_v5, %v2862_v4 }
0x140e   :  { %v2542_v23 = vpop.eup %2541  ;;  %2547 = vpow2.f32 %v2098_v42 }
0x140f   :  { %1770 = vrot.lane.b32.xlu1 %v2542_v23, %s2564_s17  ;;  %v2365_v15 = vpop.f32.mrf.mxu0  ;;  %v1450_v23 = vmul.f32 %v3124_v28, %v2928_v20 }
0x1419   :  { %v2544_v48 = vpop.eup %2543 }
0x141a   :  { %1697 = vrot.lane.b32.xlu0 %v2544_v48, %s2564_s17  ;;  %v2546_v2 = vpop.eup %2545 }
0x141b   :  { %v1764_v26 = vadd.f32 1.0, %v2546_v2  ;;  %v2548_v13 = vpop.eup %2547 }
0x141c   :  { %v1691_v9 = vadd.f32 1.0, %v2548_v13 }
0x141d   :  { %2549 = vrcp.f32 %v1764_v26 }
0x141e   :  { %2551 = vrcp.f32 %v1691_v9 }
0x142a   :  { %v2550_v60 = vpop.eup %2549 }
0x142b   :  { %v3200_v37 = vpop.eup %2551  ;;  %v1768_v39 = vmul.f32 %v2550_v60, %v1623_v49 }
0x142c   :  { %v1695_v8 = vmul.f32 %v3200_v37, %v1617_v63 }
0x1481   :  { %v1771_v35 = vpop.permute.xlu1 %1770 }
0x1482   :  { %v1773_v56 = vmul.f32 %v2550_v60, %v1771_v35 }
0x1484   :  { %1775 = vrot.lane.b32.xlu1 %v1773_v56, %s2565_s1 }
0x148c   :  { %v1698_v54 = vpop.permute.xlu0 %1697 }
0x148d   :  { %v1700_v41 = vmul.f32 %v3200_v37, %v1698_v54 }
0x148f   :  { %1702 = vrot.lane.b32.xlu0 %v1700_v41, %s2565_s1 }
0x14f6   :  { %v1776_v22 = vpop.permute.xlu1 %1775 }
0x14f7   :  { %v1778_v62 = vadd.f32 %v1776_v22, %v1768_v39 }
0x14f9   :  { %2553 = vtanh.f32 %v1778_v62 }
0x1501   :  { %v1703_v11 = vpop.permute.xlu0 %1702 }
0x1502   :  { %v1705_v45 = vadd.f32 %v1703_v11, %v1695_v8 }
0x1504   :  { %2555 = vtanh.f32 %v1705_v45 }
0x1506   :  { %v2554_v40 = vpop.eup %2553 }
0x1507   :  { %1781 = vrot.lane.b32.xlu1 %v2554_v40, %s2564_s17 }
0x150b   :  { %535 = vrot.lane.b32.xlu1 %v533_v31, %s2565_s1 }
0x150f   :  { %1633 = vrot.lane.b32.xlu1 %v1631_v17, %s2565_s1 }
0x1511   :  { %v2556_v44 = vpop.eup %2555 }
0x1512   :  { %1708 = vrot.lane.b32.xlu0 %v2556_v44, %s2564_s17 }
0x1513   :  { %914 = vrot.lane.b32.xlu1 %v912_v16, %s2565_s1 }
0x1516   :  { %724 = vrot.lane.b32.xlu0 %v722_v27, %s2565_s1 }
0x1517   :  { %1285 = vrot.lane.b32.xlu1 %v1283_v6, %s2565_s1 }
0x151a   :  { %1104 = vrot.lane.b32.xlu0 %v1102_v30, %s2565_s1 }
0x151b   :  { %921 = vrot.lane.b32.xlu1 %v919_v18, %s2565_s1 }
0x151e   :  { %1459 = vrot.lane.b32.xlu0 %v1457_v10, %s2565_s1  ;;  %v2113_v10 = vld [vmem:[%s3341_s10] ss:$0 sm:$0xff] }
0x151f   :  { %1278 = vrot.lane.b32.xlu1 %v1276_v12, %s2565_s1 }
0x1522   :  { %1111 = vrot.lane.b32.xlu0 %v1109_v43, %s2565_s1 }
0x1523   :  { %541 = vrot.lane.b32.xlu1 %v539_v21, %s2565_s1 }
0x1527   :  { %1626 = vrot.lane.b32.xlu1 %v1624_v25, %s2565_s1 }
0x1579   :  { %v1782_v53 = vpop.permute.xlu1 %1781 }
0x157a   :  { %v1784_v24 = vmul.f32 %v2550_v60, %v1782_v53 }
0x157c   :  { %v1788_v51 = vsub.f32 %v1784_v24, %v3180_v59 }
0x157d   :  { %v536_v38 = vpop.permute.xlu1 %535 }
0x157e   :  { %v1789_v33 = vmul.f32 %v1788_v51, %v2811_v0  ;;  %538 = vst.msk [vmem:[#allocation4] sm:$0xff] %vm367_vm3, %v536_v38 }
0x1580   :  { %v1790_v50 = vadd.f32 %v1789_v33, %v3180_v59 }
0x1581   :  { %v1634_v34 = vpop.permute.xlu1 %1633 }
0x1582   :  { %1637 = vst.msk [vmem:[#allocation5 + $0x8] sm:$0xff] %vm367_vm3, %v1634_v34  ;;  %v1798_v19 = vmul.f32 %v1790_v50, %v2811_v0 }
0x1584   :  { %1800 = vrot.lane.b32.xlu0 %v1798_v19, %s2565_s1  ;;  %v1709_v47 = vpop.permute.xlu0 %1708 }
0x1585   :  { %v1711_v7 = vmul.f32 %v3200_v37, %v1709_v47  ;;  %v915_v52 = vpop.permute.xlu1 %914  ;;  %v1804_v13 = vld [vmem:[#allocation4] sm:$0xff] }
0x1586   :  { %918 = vst.msk [vmem:[#allocation4 + $0x10] sm:$0xff] %vm367_vm3, %v915_v52 }
0x1587   :  { %v1785_v15 = vsub.f32 %v1711_v7, %v3188_v29 }
0x1588   :  { %1452 = vrot.lane.b32.xlu0 %v1450_v23, %s2565_s1  ;;  %v725_v59 = vpop.permute.xlu0 %724 }
0x1589   :  { %v1786_v48 = vmul.f32 %v1785_v15, %v2803_v55  ;;  %728 = vst.msk [vmem:[#allocation4 + $0x8] sm:$0xff] %vm367_vm3, %v725_v59  ;;  %v1286_v0 = vpop.permute.xlu1 %1285  ;;  %v1817_v39 = vld [vmem:[#allocation5 + $0x8] sm:$0xff] }
0x158a   :  { %1289 = vst.msk [vmem:[#allocation5 + $0x18] sm:$0xff] %vm367_vm3, %v1286_v0 }
0x158b   :  { %v1787_v42 = vadd.f32 %v1786_v48, %v3188_v29 }
0x158c   :  { %731 = vrot.lane.b32.xlu0 %v729_v46, %s2565_s1  ;;  %v1105_v20 = vpop.permute.xlu0 %1104 }
0x158d   :  { %1108 = vst.msk [vmem:[#allocation4 + $0x18] sm:$0xff] %vm367_vm3, %v1105_v20  ;;  %v922_v28 = vpop.permute.xlu1 %921  ;;  %v1791_v2 = vmul.f32 %v1787_v42, %v2803_v55  ;;  %v1806_v60 = vld [vmem:[#allocation4 + $0x10] sm:$0xff] }
0x158e   :  { %925 = vst.msk [vmem:[#allocation5 + $0x28] sm:$0xff] %vm367_vm3, %v922_v28 }
0x1590   :  { %1793 = vrot.lane.b32.xlu0 %v1791_v2, %s2565_s1  ;;  %v1460_v26 = vpop.permute.xlu0 %1459  ;;  %v1805_v9 = vld [vmem:[#allocation4 + $0x8] sm:$0xff] }
0x1591   :  { %1463 = vst.msk [vmem:[#allocation5 + $0x10] sm:$0xff] %vm367_vm3, %v1460_v26  ;;  %v1279_v4 = vpop.permute.xlu1 %1278  ;;  %v1812_v5 = vpack.c.bf16 %v1805_v9, %v1804_v13  ;;  %v1819_v62 = vld [vmem:[#allocation5 + $0x18] sm:$0xff] }
0x1592   :  { %1282 = vst.msk [vmem:[#allocation4 + $0x20] sm:$0xff] %vm367_vm3, %v1279_v4 }
0x1593   :  { %2390 = vmatprep.mubr.msk.bf16.mxu1 %vm367_vm3, %v1812_v5 }
0x1594   :  { %v1112_v29 = vpop.permute.xlu0 %1111  ;;  %v1807_v35 = vld [vmem:[#allocation4 + $0x18] sm:$0xff] }
0x1595   :  { %1115 = vst.msk [vmem:[#allocation5 + $0x20] sm:$0xff] %vm367_vm3, %v1112_v29  ;;  %v542_v55 = vpop.permute.xlu1 %541  ;;  %v1813_v56 = vpack.c.bf16 %v1807_v35, %v1806_v60  ;;  %v1821_v63 = vld [vmem:[#allocation5 + $0x28] sm:$0xff] }
0x1596   :  { %545 = vst.msk [vmem:[#allocation5 + $0x38] sm:$0xff] %vm367_vm3, %v542_v55 }
0x1597   :  { %2391 = vmatmul.mubr.msk.bf16.vlgmr.msra.gmra.mxu1 %vm367_vm3, %v1813_v56 }
0x1598   :  { %v1818_v32 = vld [vmem:[#allocation5 + $0x10] sm:$0xff] }
0x1599   :  { %v1627_v37 = vpop.permute.xlu1 %1626  ;;  %v1825_v3 = vpack.c.bf16 %v1819_v62, %v1818_v32  ;;  %v1808_v45 = vld [vmem:[#allocation4 + $0x20] sm:$0xff] }
0x159a   :  { %1630 = vst.msk [vmem:[#allocation4 + $0x30] sm:$0xff] %vm367_vm3, %v1627_v37 }
0x159c   :  { %v1820_v14 = vld [vmem:[#allocation5 + $0x20] sm:$0xff] }
0x159d   :  { %v1826_v8 = vpack.c.bf16 %v1821_v63, %v1820_v14  ;;  %v1823_v36 = vld [vmem:[#allocation5 + $0x38] sm:$0xff] }
0x15a1   :  { %v1810_v16 = vld [vmem:[#allocation4 + $0x30] sm:$0xff] }
0x15f6   :  { %v1801_v54 = vpop.permute.xlu0 %1800 }
0x15f7   :  { %1803 = vst.msk [vmem:[#allocation5] sm:$0xff] %vm367_vm3, %v1801_v54 }
0x15fa   :  { %v1453_v41 = vpop.permute.xlu0 %1452 }
0x15fb   :  { %1456 = vst.msk [vmem:[#allocation4 + $0x28] sm:$0xff] %vm367_vm3, %v1453_v41 }
0x15fe   :  { %v732_v61 = vpop.permute.xlu0 %731  ;;  %v1816_v49 = vld [vmem:[#allocation5] sm:$0xff] }
0x15ff   :  { %735 = vst.msk [vmem:[#allocation5 + $0x30] sm:$0xff] %vm367_vm3, %v732_v61  ;;  %v1824_v22 = vpack.c.bf16 %v1817_v39, %v1816_v49 }
0x1601   :  { %2378 = vmatprep.mubr.msk.bf16.mxu0 %vm367_vm3, %v1824_v22 }
0x1602   :  { %v1794_v11 = vpop.permute.xlu0 %1793  ;;  %2379 = vmatmul.mubr.msk.bf16.vlgmr.msra.gmra.mxu0 %vm367_vm3, %v1825_v3  ;;  %v1809_v40 = vld [vmem:[#allocation4 + $0x28] sm:$0xff] }
0x1603   :  { %1797 = vst.msk [vmem:[#allocation4 + $0x38] sm:$0xff] %vm367_vm3, %v1794_v11  ;;  %2382 = vmatprep.mubr.msk.bf16.mxu0 %vm367_vm3, %v1826_v8  ;;  %v1814_v31 = vpack.c.bf16 %v1809_v40, %v1808_v45 }
0x1605   :  { %2394 = vmatprep.mubr.msk.bf16.mxu1 %vm367_vm3, %v1814_v31 }
0x1606   :  { %v1822_v17 = vld [vmem:[#allocation5 + $0x30] sm:$0xff] }
0x1607   :  { %v1827_v44 = vpack.c.bf16 %v1823_v36, %v1822_v17 }
0x160a   :  { %2383 = vmatmul.mubr.msk.bf16.gmra.mxu0 %vm367_vm3, %v1827_v44  ;;  %v1811_v1 = vld [vmem:[#allocation4 + $0x38] sm:$0xff] }
0x160b   :  { %v1815_v27 = vpack.c.bf16 %v1811_v1, %v1810_v16 }
0x160d   :  { %2395 = vmatmul.mubr.msk.bf16.gmra.mxu1 %vm367_vm3, %v1815_v27 }
0x1657   :  { %v2392_v6 = vpop.f32.mrf.mxu1 }
0x1659   :  { %v1983_v30 = vpop.f32.mrf.mxu1 }
0x165b   :  { %v2393_v43 = vpop.f32.mrf.mxu1 }
0x165d   :  { %v1986_v51 = vpop.f32.mrf.mxu1 }
0x16c2   :  { %v2380_v18 = vpop.f32.mrf.mxu0 }
0x16c3   :  { %v1992_v12 = vadd.f32 %v2392_v6, %v2380_v18 }
0x16c4   :  { %v1894_v21 = vpop.f32.mrf.mxu0 }
0x16c5   :  { %v2023_v25 = vadd.f32 %v2113_v10, %v1992_v12  ;;  %v1984_v58 = vadd.f32 %v1983_v30, %v1894_v21 }
0x16c6   :  { %v2381_v53 = vpop.f32.mrf.mxu0 }
0x16c7   :  { %2031 = vst [vmem:[%s3342_s11 + $0x10] sm:$0xff] %v2023_v25  ;;  %v2021_v24 = vadd.f32 %v2113_v10, %v1984_v58  ;;  %v1995_v57 = vadd.f32 %v2393_v43, %v2381_v53 }
0x16c8   :  { %v1897_v38 = vpop.f32.mrf.mxu0 }
0x16c9   :  { %2029 = vst [vmem:[%s3342_s11] sm:$0xff] %v2021_v24  ;;  %v2024_v33 = vadd.f32 %v2113_v10, %v1995_v57  ;;  %v1987_v50 = vadd.f32 %v1986_v51, %v1897_v38 }
0x16ca   :  { %v2384_v34 = vpop.f32.mrf.mxu0 }
0x16cb   :  { %2032 = vst [vmem:[%s3342_s11 + $0x18] sm:$0xff] %v2024_v33  ;;  %v2022_v19 = vadd.f32 %v2113_v10, %v1987_v50 }
0x16cc   :  { %v1910_v47 = vpop.f32.mrf.mxu0 }
0x16cd   :  { %2030 = vst [vmem:[%s3342_s11 + $0x8] sm:$0xff] %v2022_v19  ;;  %v2396_v7 = vpop.f32.mrf.mxu1 }
0x16ce   :  { %v2008_v52 = vadd.f32 %v2396_v7, %v2384_v34  ;;  %v2385_v23 = vpop.f32.mrf.mxu0 }
0x16cf   :  { %v1999_v15 = vpop.f32.mrf.mxu1 }
0x16d0   :  { %v2027_v59 = vadd.f32 %v2113_v10, %v2008_v52  ;;  %v2000_v48 = vadd.f32 %v1999_v15, %v1910_v47  ;;  %v1913_v20 = vpop.f32.mrf.mxu0 }
0x16d1   :  { %v2397_v0 = vpop.f32.mrf.mxu1 }
0x16d2   :  { %2035 = vst [vmem:[%s3342_s11 + $0x30] sm:$0xff] %v2027_v59  ;;  %v2025_v46 = vadd.f32 %v2113_v10, %v2000_v48  ;;  %v2011_v42 = vadd.f32 %v2397_v0, %v2385_v23 }
0x16d3   :  { %v2002_v28 = vpop.f32.mrf.mxu1 }
0x16d4   :  { %2033 = vst [vmem:[%s3342_s11 + $0x20] sm:$0xff] %v2025_v46  ;;  %v2028_v2 = vadd.f32 %v2113_v10, %v2011_v42  ;;  %v2003_v26 = vadd.f32 %v2002_v28, %v1913_v20 }
0x16d6   :  { %2036 = vst [vmem:[%s3342_s11 + $0x38] sm:$0xff] %v2028_v2  ;;  %v2026_v13 = vadd.f32 %v2113_v10, %v2003_v26 }
0x16d8   :  { %2034 = vst [vmem:[%s3342_s11 + $0x28] sm:$0xff] %v2026_v13 }

</bundles_post_ra>
